<compile_context>
chip_gen: v5e
topology: v5e:2x2
jax: 0.10.0
libtpu: 0.0.40
codegen_flags: <defaults>
</compile_context>

<pallas_src>
import functools

import jax
import jax.numpy as jnp
from jax.experimental import pallas as pl
from jax.experimental.pallas import tpu as pltpu


# ---------------------------------------------------------------------------
# Fused whole-network kernel
# ---------------------------------------------------------------------------
def _build_kernel(*, T, B, L, ncls, block_channels, tau):
    TB = T * B
    BL = B * L
    TBL = T * B * L
    inv_tau = 1.0 / tau
    n_blocks = len(block_channels)

    def kernel(*refs):
        x_ref = refs[0]                       # (TBL, Cin0)   rows = ((t*B+b)*L + l)
        w_refs = refs[1:1 + 2 * n_blocks]     # per block: (3,Cin,2Cout), (3,Cout,Cout)
        wh_ref = refs[1 + 2 * n_blocks]       # (L, Cout, ncls)  (flatten folded in)
        o_ref = refs[2 + 2 * n_blocks]        # (T, B, ncls)
        stage = refs[3 + 2 * n_blocks]        # VMEM scratch (TB, L+2, Cmax)

        def stage_in(val, cin):
            # Write a (TBL, cin) activation into the zero-bordered staging
            # buffer.  Rows 0 and L+1 of every (t,b) slab stay zero, which
            # implements the Conv1d "same" zero padding with no jnp.pad.
            stage[:, 1:L + 1, :cin] = val.reshape(TB, L, cin)

        def conv_norm_lif(w_ref, cin, cout, v_th):
            # --- Conv1d(k=3, pad=1, no bias): 3 full-slab matmuls (M = TBL) ---
            xm1 = stage[:, 0:L, :cin].reshape(TBL, cin)      # x[l-1] (0 at l=0)
            xc = stage[:, 1:L + 1, :cin].reshape(TBL, cin)   # x[l]
            xp1 = stage[:, 2:L + 2, :cin].reshape(TBL, cin)  # x[l+1] (0 at l=L-1)
            y = (jnp.dot(xm1, w_ref[0], preferred_element_type=jnp.float32)
                 + jnp.dot(xc, w_ref[1], preferred_element_type=jnp.float32)
                 + jnp.dot(xp1, w_ref[2], preferred_element_type=jnp.float32))
            # --- min-max normalisation over L per (t, b, channel) ---
            y3 = y.reshape(TB, L, cout)
            mn = jnp.min(y3, axis=1, keepdims=True)
            mx = jnp.max(y3, axis=1, keepdims=True)
            yn = ((y3 - mn) * pl.reciprocal(mx - mn + 1e-12, approx=False)
                  ).reshape(TBL, cout)
            # --- LIF scan over T (T small -> static unroll is fine) ---
            v = jnp.zeros((BL, cout), jnp.float32)
            spikes = []
            for t in range(T):
                v = v + (yn[t * BL:(t + 1) * BL, :] - v) * inv_tau
                s = (v >= v_th).astype(jnp.float32)
                v = v * (1.0 - s)                 # hard reset to 0
                spikes.append(s)
            return jnp.concatenate(spikes, axis=0)            # (TBL, cout)

        # zero the staging scratch once (provides every conv boundary zero)
        stage[...] = jnp.zeros_like(stage)

        cur = x_ref[...]
        for bidx, (cin, cmid) in enumerate(block_channels):
            w01 = w_refs[2 * bidx]        # fused same-input columns [c1_0 | c0_1]
            w11 = w_refs[2 * bidx + 1]    # column-1 depth-1 conv
            stage_in(cur, cin)
            s01 = conv_norm_lif(w01, cin, 2 * cmid, 0.5)
            # channels [:cmid]  = joined0 (column 1, depth 0, mean of one)
            # channels [cmid:]  = column-0 output on the raw block input
            stage_in(s01, 2 * cmid)
            b_col = conv_norm_lif(w11, cmid, cmid, 0.5)       # consumes joined0
            a_col = stage[:, 1:L + 1, cmid:2 * cmid].reshape(TBL, cmid)
            cur = 0.5 * (a_col + b_col)   # eval-mode mean join
            # MaxPool1d(kernel_size=1) after each block == identity

        # --- Head: Flatten(C, L) -> Linear(no bias) -> LIF (v_th = 1.0) ---
        cout = block_channels[-1][1]
        stage_in(cur, cout)
        acc = jnp.zeros((TB, ncls), jnp.float32)
        for l in range(L):                # contraction over (l, c)
            acc = acc + jnp.dot(stage[:, 1 + l, :cout], wh_ref[l],
                                preferred_element_type=jnp.float32)
        v = jnp.zeros((B, ncls), jnp.float32)
        outs = []
        for t in range(T):
            v = v + (acc[t * B:(t + 1) * B, :] - v) * inv_tau
            s = (v >= 1.0).astype(jnp.float32)
            v = v * (1.0 - s)
            outs.append(s)
        o_ref[...] = jnp.stack(outs, axis=0)    # single (T, B, ncls) store

    return kernel


# ---------------------------------------------------------------------------
# One-time parameter re-layout (fractal column fusion + flatten folded in)
# ---------------------------------------------------------------------------
def prepare_params(params, *, L):
    blocks = []
    for blk in params["blocks"]:
        # concat the two columns that share the block input along Cout
        w01 = jnp.concatenate([blk["c1_0"], blk["c0_1"]], axis=0)       # (2Cout,Cin,3)
        w01 = jnp.transpose(w01, (2, 1, 0)).astype(jnp.float32)         # (3,Cin,2Cout)
        w11 = jnp.transpose(blk["c1_1"], (2, 1, 0)).astype(jnp.float32)  # (3,Cout,Cout)
        blocks.append((w01, w11))
    w_lin = params["linear"]                                            # (ncls, Cout*L)
    ncls = w_lin.shape[0]
    cout = params["blocks"][-1]["c1_1"].shape[0]
    # fold the C-major Flatten permutation into the weight: wh[l, c, n]
    wh = jnp.transpose(w_lin.reshape(ncls, cout, L), (2, 1, 0)).astype(jnp.float32)
    return {"blocks": blocks, "head": wh}


# ---------------------------------------------------------------------------
# Forward wrapper (single pallas_call for the whole network)
# ---------------------------------------------------------------------------
def lif_fractalnet_forward(x_tbcl, prepped, *, tau):
    """x_tbcl: [T, B, C, L] (PyTorch layout). Returns spikes [T, B, n_classes]."""
    T, B, C0, L = x_tbcl.shape
    ncls = prepped["head"].shape[-1]
    block_channels = tuple((int(w01.shape[1]), int(w01.shape[2]) // 2)
                           for (w01, _w11) in prepped["blocks"])
    cmax = max(max(cin, 2 * cmid) for cin, cmid in block_channels)

    # single entry-point layout change: rows ordered ((t*B + b)*L + l), C last
    x = jnp.transpose(x_tbcl, (0, 1, 3, 2)).reshape(T * B * L, C0)
    x = x.astype(jnp.float32)

    kern = _build_kernel(T=T, B=B, L=L, ncls=ncls,
                         block_channels=block_channels, tau=tau)
    flat_w = []
    for w01, w11 in prepped["blocks"]:
        flat_w += [w01, w11]

    return pl.pallas_call(
        kern,
        out_shape=jax.ShapeDtypeStruct((T, B, ncls), jnp.float32),
        scratch_shapes=[pltpu.VMEM((T * B, L + 2, cmax), jnp.float32)],
    )(x, *flat_w, prepped["head"])


# ---------------------------------------------------------------------------
# Deterministic parameter init (xavier_uniform, as in the module's init)
# ---------------------------------------------------------------------------
def xavier_uniform(key, shape, fan_in, fan_out):
    bound = (6.0 / (fan_in + fan_out)) ** 0.5
    return jax.random.uniform(key, shape, jnp.float32, -bound, bound)


def make_params(key, *, channel, init_channels, num_blocks, n_classes, C_L):
    params = {"blocks": []}
    C_in = channel
    C_out = init_channels
    for _ in range(num_blocks):
        ks = jax.random.split(key, 4)
        key = ks[0]
        blk = {
            # Conv1d weights in PyTorch layout [Cout, Cin, 3]
            "c1_0": xavier_uniform(ks[1], (C_out, C_in, 3), C_in * 3, C_out * 3),
            "c0_1": xavier_uniform(ks[2], (C_out, C_in, 3), C_in * 3, C_out * 3),
            "c1_1": xavier_uniform(ks[3], (C_out, C_out, 3), C_out * 3, C_out * 3),
        }
        params["blocks"].append(blk)
        C_in = C_out
    kf, _ = jax.random.split(key)
    F = C_out * C_L
    params["linear"] = xavier_uniform(kf, (n_classes, F), F, n_classes)
    return params


# ---------------------------------------------------------------------------
if __name__ == "__main__":
    # small config consistent with the module:
    # data_shape = (L=16, channel=4, n_classes=8), num_columns=2,
    # init_channels=16, len(dropout_probs)=2 blocks, T=4, batch=2, tau=2.0
    T, B = 4, 2
    channel, L, n_classes = 4, 16, 8
    init_channels = 16
    num_blocks = 2
    tau = 2.0

    key = jax.random.PRNGKey(0)
    k_x, k_p = jax.random.split(key)
    x = jax.random.normal(k_x, (T, B, channel, L), jnp.float32)   # [T, B, C, L]
    params = make_params(k_p, channel=channel, init_channels=init_channels,
                         num_blocks=num_blocks, n_classes=n_classes, C_L=L)
    prepped = prepare_params(params, L=L)

    fwd = jax.jit(functools.partial(lif_fractalnet_forward, tau=tau))
    out = fwd(x, prepped)
    jax.block_until_ready(out)
    assert out.shape == (T, B, n_classes), out.shape
    print("KERNEL_OK")
</pallas_src>

<mosaic_0001>
module attributes {stable_mosaic.version = 11 : i64} {
  func.func @kernel(%arg0: memref<128x4xf32, #tpu.memory_space<vmem>>, %arg1: memref<3x4x32xf32, #tpu.memory_space<vmem>>, %arg2: memref<3x16x16xf32, #tpu.memory_space<vmem>>, %arg3: memref<3x16x32xf32, #tpu.memory_space<vmem>>, %arg4: memref<3x16x16xf32, #tpu.memory_space<vmem>>, %arg5: memref<16x16x8xf32, #tpu.memory_space<vmem>>, %arg6: memref<4x2x8xf32, #tpu.memory_space<vmem>>, %arg7: memref<8x18x32xf32, #tpu.memory_space<vmem>>) attributes {dimension_semantics = [], scalar_prefetch = 0 : i64, scratch_operands = 1 : i64, tpu.core_type = #tpu.core_type<tc>} {
    %cst = arith.constant 0.000000e+00 : f32
    %0 = vector.broadcast %cst : f32 to vector<8x18x32xf32>
    %c0 = arith.constant 0 : index
    %c0_0 = arith.constant 0 : index
    %c0_1 = arith.constant 0 : index
    %1 = vector.load %arg7[%c0, %c0_0, %c0_1] : memref<8x18x32xf32, #tpu.memory_space<vmem>>, vector<8x18x32xf32>
    tpu.vector_store %arg7[%c0, %c0_0, %c0_1], %0 {strides = array<i32>} : memref<8x18x32xf32, #tpu.memory_space<vmem>>, vector<8x18x32xf32>,
    %c0_2 = arith.constant 0 : index
    %c0_3 = arith.constant 0 : index
    %2 = vector.load %arg0[%c0_2, %c0_3] : memref<128x4xf32, #tpu.memory_space<vmem>>, vector<128x4xf32>
    %3 = vector.shape_cast %2 : vector<128x4xf32> to vector<8x16x4xf32>
    %c0_4 = arith.constant 0 : index
    %c1 = arith.constant 1 : index
    %c0_5 = arith.constant 0 : index
    %4 = vector.load %arg7[%c0_4, %c1, %c0_5] : memref<8x18x32xf32, #tpu.memory_space<vmem>>, vector<8x16x4xf32>
    tpu.vector_store %arg7[%c0_4, %c1, %c0_5], %3 {strides = array<i32>} : memref<8x18x32xf32, #tpu.memory_space<vmem>>, vector<8x16x4xf32>,
    %c0_6 = arith.constant 0 : index
    %c0_7 = arith.constant 0 : index
    %c0_8 = arith.constant 0 : index
    %5 = vector.load %arg7[%c0_6, %c0_7, %c0_8] : memref<8x18x32xf32, #tpu.memory_space<vmem>>, vector<8x16x4xf32>
    %6 = vector.shape_cast %5 : vector<8x16x4xf32> to vector<128x4xf32>
    %c0_9 = arith.constant 0 : index
    %c1_10 = arith.constant 1 : index
    %c0_11 = arith.constant 0 : index
    %7 = vector.load %arg7[%c0_9, %c1_10, %c0_11] : memref<8x18x32xf32, #tpu.memory_space<vmem>>, vector<8x16x4xf32>
    %8 = vector.shape_cast %7 : vector<8x16x4xf32> to vector<128x4xf32>
    %c0_12 = arith.constant 0 : index
    %c2 = arith.constant 2 : index
    %c0_13 = arith.constant 0 : index
    %9 = vector.load %arg7[%c0_12, %c2, %c0_13] : memref<8x18x32xf32, #tpu.memory_space<vmem>>, vector<8x16x4xf32>
    %10 = vector.shape_cast %9 : vector<8x16x4xf32> to vector<128x4xf32>
    %c0_14 = arith.constant 0 : index
    %c0_15 = arith.constant 0 : index
    %c0_16 = arith.constant 0 : index
    %11 = vector.load %arg1[%c0_14, %c0_15, %c0_16] : memref<3x4x32xf32, #tpu.memory_space<vmem>>, vector<1x4x32xf32>
    %12 = vector.shape_cast %11 : vector<1x4x32xf32> to vector<4x32xf32>
    %cst_17 = arith.constant dense<0.000000e+00> : vector<128x32xf32>
    %13 = tpu.matmul %6, %12, %cst_17 {dimension_numbers = #tpu.dot_dimension_numbers<[1], [0], [0], [1], [0, 0, 1, 1], [], []>} : vector<128x4xf32>, vector<4x32xf32>, vector<128x32xf32> -> vector<128x32xf32>
    %c1_18 = arith.constant 1 : index
    %c0_19 = arith.constant 0 : index
    %c0_20 = arith.constant 0 : index
    %14 = vector.load %arg1[%c1_18, %c0_19, %c0_20] : memref<3x4x32xf32, #tpu.memory_space<vmem>>, vector<1x4x32xf32>
    %15 = vector.shape_cast %14 : vector<1x4x32xf32> to vector<4x32xf32>
    %cst_21 = arith.constant dense<0.000000e+00> : vector<128x32xf32>
    %16 = tpu.matmul %8, %15, %cst_21 {dimension_numbers = #tpu.dot_dimension_numbers<[1], [0], [0], [1], [0, 0, 1, 1], [], []>} : vector<128x4xf32>, vector<4x32xf32>, vector<128x32xf32> -> vector<128x32xf32>
    %17 = arith.addf %13, %16 : vector<128x32xf32>
    %c2_22 = arith.constant 2 : index
    %c0_23 = arith.constant 0 : index
    %c0_24 = arith.constant 0 : index
    %18 = vector.load %arg1[%c2_22, %c0_23, %c0_24] : memref<3x4x32xf32, #tpu.memory_space<vmem>>, vector<1x4x32xf32>
    %19 = vector.shape_cast %18 : vector<1x4x32xf32> to vector<4x32xf32>
    %cst_25 = arith.constant dense<0.000000e+00> : vector<128x32xf32>
    %20 = tpu.matmul %10, %19, %cst_25 {dimension_numbers = #tpu.dot_dimension_numbers<[1], [0], [0], [1], [0, 0, 1, 1], [], []>} : vector<128x4xf32>, vector<4x32xf32>, vector<128x32xf32> -> vector<128x32xf32>
    %21 = arith.addf %17, %20 : vector<128x32xf32>
    %22 = vector.shape_cast %21 : vector<128x32xf32> to vector<8x16x32xf32>
    %cst_26 = arith.constant dense<0x7F800000> : vector<8x32xf32>
    %23 = vector.multi_reduction <minimumf>, %22, %cst_26 [1] : vector<8x16x32xf32> to vector<8x32xf32>
    %24 = vector.shape_cast %23 : vector<8x32xf32> to vector<8x1x32xf32>
    %cst_27 = arith.constant dense<0xFF800000> : vector<8x32xf32>
    %25 = vector.multi_reduction <maximumf>, %22, %cst_27 [1] : vector<8x16x32xf32> to vector<8x32xf32>
    %26 = vector.shape_cast %25 : vector<8x32xf32> to vector<8x1x32xf32>
    %27 = vector.broadcast %24 : vector<8x1x32xf32> to vector<8x16x32xf32>
    %28 = arith.subf %22, %27 : vector<8x16x32xf32>
    %29 = arith.subf %26, %24 : vector<8x1x32xf32>
    %cst_28 = arith.constant 9.99999996E-13 : f32
    %30 = vector.broadcast %cst_28 : f32 to vector<8x1x32xf32>
    %31 = arith.addf %29, %30 : vector<8x1x32xf32>
    %32 = tpu.reciprocal %31 : vector<8x1x32xf32> -> vector<8x1x32xf32>
    %33 = vector.broadcast %32 : vector<8x1x32xf32> to vector<8x16x32xf32>
    %34 = arith.mulf %28, %33 : vector<8x16x32xf32>
    %35 = vector.shape_cast %34 : vector<8x16x32xf32> to vector<128x32xf32>
    %cst_29 = arith.constant 0.000000e+00 : f32
    %36 = vector.broadcast %cst_29 : f32 to vector<32x32xf32>
    %37 = vector.extract_strided_slice %35 {offsets = [0, 0], sizes = [32, 32], strides = [1, 1]} : vector<128x32xf32> to vector<32x32xf32>
    %38 = arith.subf %37, %36 : vector<32x32xf32>
    %cst_30 = arith.constant 5.000000e-01 : f32
    %39 = vector.broadcast %cst_30 : f32 to vector<32x32xf32>
    %40 = arith.mulf %38, %39 : vector<32x32xf32>
    %41 = arith.addf %36, %40 : vector<32x32xf32>
    %cst_31 = arith.constant 5.000000e-01 : f32
    %42 = vector.broadcast %cst_31 : f32 to vector<32x32xf32>
    %43 = arith.cmpf oge, %41, %42 : vector<32x32xf32>
    %44 = arith.extui %43 : vector<32x32xi1> to vector<32x32xi32>
    %45 = arith.sitofp %44 : vector<32x32xi32> to vector<32x32xf32>
    %cst_32 = arith.constant 1.000000e+00 : f32
    %46 = vector.broadcast %cst_32 : f32 to vector<32x32xf32>
    %47 = arith.subf %46, %45 : vector<32x32xf32>
    %48 = arith.mulf %41, %47 : vector<32x32xf32>
    %49 = vector.extract_strided_slice %35 {offsets = [32, 0], sizes = [32, 32], strides = [1, 1]} : vector<128x32xf32> to vector<32x32xf32>
    %50 = arith.subf %49, %48 : vector<32x32xf32>
    %cst_33 = arith.constant 5.000000e-01 : f32
    %51 = vector.broadcast %cst_33 : f32 to vector<32x32xf32>
    %52 = arith.mulf %50, %51 : vector<32x32xf32>
    %53 = arith.addf %48, %52 : vector<32x32xf32>
    %cst_34 = arith.constant 5.000000e-01 : f32
    %54 = vector.broadcast %cst_34 : f32 to vector<32x32xf32>
    %55 = arith.cmpf oge, %53, %54 : vector<32x32xf32>
    %56 = arith.extui %55 : vector<32x32xi1> to vector<32x32xi32>
    %57 = arith.sitofp %56 : vector<32x32xi32> to vector<32x32xf32>
    %cst_35 = arith.constant 1.000000e+00 : f32
    %58 = vector.broadcast %cst_35 : f32 to vector<32x32xf32>
    %59 = arith.subf %58, %57 : vector<32x32xf32>
    %60 = arith.mulf %53, %59 : vector<32x32xf32>
    %61 = vector.extract_strided_slice %35 {offsets = [64, 0], sizes = [32, 32], strides = [1, 1]} : vector<128x32xf32> to vector<32x32xf32>
    %62 = arith.subf %61, %60 : vector<32x32xf32>
    %cst_36 = arith.constant 5.000000e-01 : f32
    %63 = vector.broadcast %cst_36 : f32 to vector<32x32xf32>
    %64 = arith.mulf %62, %63 : vector<32x32xf32>
    %65 = arith.addf %60, %64 : vector<32x32xf32>
    %cst_37 = arith.constant 5.000000e-01 : f32
    %66 = vector.broadcast %cst_37 : f32 to vector<32x32xf32>
    %67 = arith.cmpf oge, %65, %66 : vector<32x32xf32>
    %68 = arith.extui %67 : vector<32x32xi1> to vector<32x32xi32>
    %69 = arith.sitofp %68 : vector<32x32xi32> to vector<32x32xf32>
    %cst_38 = arith.constant 1.000000e+00 : f32
    %70 = vector.broadcast %cst_38 : f32 to vector<32x32xf32>
    %71 = arith.subf %70, %69 : vector<32x32xf32>
    %72 = arith.mulf %65, %71 : vector<32x32xf32>
    %73 = vector.extract_strided_slice %35 {offsets = [96, 0], sizes = [32, 32], strides = [1, 1]} : vector<128x32xf32> to vector<32x32xf32>
    %74 = arith.subf %73, %72 : vector<32x32xf32>
    %cst_39 = arith.constant 5.000000e-01 : f32
    %75 = vector.broadcast %cst_39 : f32 to vector<32x32xf32>
    %76 = arith.mulf %74, %75 : vector<32x32xf32>
    %77 = arith.addf %72, %76 : vector<32x32xf32>
    %cst_40 = arith.constant 5.000000e-01 : f32
    %78 = vector.broadcast %cst_40 : f32 to vector<32x32xf32>
    %79 = arith.cmpf oge, %77, %78 : vector<32x32xf32>
    %80 = arith.extui %79 : vector<32x32xi1> to vector<32x32xi32>
    %81 = arith.sitofp %80 : vector<32x32xi32> to vector<32x32xf32>
    %82 = tpu.concatenate %45, %57, %69, %81 in 0 : vector<32x32xf32>, vector<32x32xf32>, vector<32x32xf32>, vector<32x32xf32> -> vector<128x32xf32>
    %83 = vector.shape_cast %82 : vector<128x32xf32> to vector<8x16x32xf32>
    %c0_41 = arith.constant 0 : index
    %c1_42 = arith.constant 1 : index
    %c0_43 = arith.constant 0 : index
    %84 = vector.load %arg7[%c0_41, %c1_42, %c0_43] : memref<8x18x32xf32, #tpu.memory_space<vmem>>, vector<8x16x32xf32>
    tpu.vector_store %arg7[%c0_41, %c1_42, %c0_43], %83 {strides = array<i32>} : memref<8x18x32xf32, #tpu.memory_space<vmem>>, vector<8x16x32xf32>,
    %c0_44 = arith.constant 0 : index
    %c0_45 = arith.constant 0 : index
    %c0_46 = arith.constant 0 : index
    %85 = vector.load %arg7[%c0_44, %c0_45, %c0_46] : memref<8x18x32xf32, #tpu.memory_space<vmem>>, vector<8x16x16xf32>
    %86 = vector.shape_cast %85 : vector<8x16x16xf32> to vector<128x16xf32>
    %c0_47 = arith.constant 0 : index
    %c1_48 = arith.constant 1 : index
    %c0_49 = arith.constant 0 : index
    %87 = vector.load %arg7[%c0_47, %c1_48, %c0_49] : memref<8x18x32xf32, #tpu.memory_space<vmem>>, vector<8x16x16xf32>
    %88 = vector.shape_cast %87 : vector<8x16x16xf32> to vector<128x16xf32>
    %c0_50 = arith.constant 0 : index
    %c2_51 = arith.constant 2 : index
    %c0_52 = arith.constant 0 : index
    %89 = vector.load %arg7[%c0_50, %c2_51, %c0_52] : memref<8x18x32xf32, #tpu.memory_space<vmem>>, vector<8x16x16xf32>
    %90 = vector.shape_cast %89 : vector<8x16x16xf32> to vector<128x16xf32>
    %c0_53 = arith.constant 0 : index
    %c0_54 = arith.constant 0 : index
    %c0_55 = arith.constant 0 : index
    %91 = vector.load %arg2[%c0_53, %c0_54, %c0_55] : memref<3x16x16xf32, #tpu.memory_space<vmem>>, vector<1x16x16xf32>
    %92 = vector.shape_cast %91 : vector<1x16x16xf32> to vector<16x16xf32>
    %cst_56 = arith.constant dense<0.000000e+00> : vector<128x16xf32>
    %93 = tpu.matmul %86, %92, %cst_56 {dimension_numbers = #tpu.dot_dimension_numbers<[1], [0], [0], [1], [0, 0, 1, 1], [], []>} : vector<128x16xf32>, vector<16x16xf32>, vector<128x16xf32> -> vector<128x16xf32>
    %c1_57 = arith.constant 1 : index
    %c0_58 = arith.constant 0 : index
    %c0_59 = arith.constant 0 : index
    %94 = vector.load %arg2[%c1_57, %c0_58, %c0_59] : memref<3x16x16xf32, #tpu.memory_space<vmem>>, vector<1x16x16xf32>
    %95 = vector.shape_cast %94 : vector<1x16x16xf32> to vector<16x16xf32>
    %cst_60 = arith.constant dense<0.000000e+00> : vector<128x16xf32>
    %96 = tpu.matmul %88, %95, %cst_60 {dimension_numbers = #tpu.dot_dimension_numbers<[1], [0], [0], [1], [0, 0, 1, 1], [], []>} : vector<128x16xf32>, vector<16x16xf32>, vector<128x16xf32> -> vector<128x16xf32>
    %97 = arith.addf %93, %96 : vector<128x16xf32>
    %c2_61 = arith.constant 2 : index
    %c0_62 = arith.constant 0 : index
    %c0_63 = arith.constant 0 : index
    %98 = vector.load %arg2[%c2_61, %c0_62, %c0_63] : memref<3x16x16xf32, #tpu.memory_space<vmem>>, vector<1x16x16xf32>
    %99 = vector.shape_cast %98 : vector<1x16x16xf32> to vector<16x16xf32>
    %cst_64 = arith.constant dense<0.000000e+00> : vector<128x16xf32>
    %100 = tpu.matmul %90, %99, %cst_64 {dimension_numbers = #tpu.dot_dimension_numbers<[1], [0], [0], [1], [0, 0, 1, 1], [], []>} : vector<128x16xf32>, vector<16x16xf32>, vector<128x16xf32> -> vector<128x16xf32>
    %101 = arith.addf %97, %100 : vector<128x16xf32>
    %102 = vector.shape_cast %101 : vector<128x16xf32> to vector<8x16x16xf32>
    %cst_65 = arith.constant dense<0x7F800000> : vector<8x16xf32>
    %103 = vector.multi_reduction <minimumf>, %102, %cst_65 [1] : vector<8x16x16xf32> to vector<8x16xf32>
    %104 = vector.shape_cast %103 : vector<8x16xf32> to vector<8x1x16xf32>
    %cst_66 = arith.constant dense<0xFF800000> : vector<8x16xf32>
    %105 = vector.multi_reduction <maximumf>, %102, %cst_66 [1] : vector<8x16x16xf32> to vector<8x16xf32>
    %106 = vector.shape_cast %105 : vector<8x16xf32> to vector<8x1x16xf32>
    %107 = vector.broadcast %104 : vector<8x1x16xf32> to vector<8x16x16xf32>
    %108 = arith.subf %102, %107 : vector<8x16x16xf32>
    %109 = arith.subf %106, %104 : vector<8x1x16xf32>
    %cst_67 = arith.constant 9.99999996E-13 : f32
    %110 = vector.broadcast %cst_67 : f32 to vector<8x1x16xf32>
    %111 = arith.addf %109, %110 : vector<8x1x16xf32>
    %112 = tpu.reciprocal %111 : vector<8x1x16xf32> -> vector<8x1x16xf32>
    %113 = vector.broadcast %112 : vector<8x1x16xf32> to vector<8x16x16xf32>
    %114 = arith.mulf %108, %113 : vector<8x16x16xf32>
    %115 = vector.shape_cast %114 : vector<8x16x16xf32> to vector<128x16xf32>
    %cst_68 = arith.constant 0.000000e+00 : f32
    %116 = vector.broadcast %cst_68 : f32 to vector<32x16xf32>
    %117 = vector.extract_strided_slice %115 {offsets = [0, 0], sizes = [32, 16], strides = [1, 1]} : vector<128x16xf32> to vector<32x16xf32>
    %118 = arith.subf %117, %116 : vector<32x16xf32>
    %cst_69 = arith.constant 5.000000e-01 : f32
    %119 = vector.broadcast %cst_69 : f32 to vector<32x16xf32>
    %120 = arith.mulf %118, %119 : vector<32x16xf32>
    %121 = arith.addf %116, %120 : vector<32x16xf32>
    %cst_70 = arith.constant 5.000000e-01 : f32
    %122 = vector.broadcast %cst_70 : f32 to vector<32x16xf32>
    %123 = arith.cmpf oge, %121, %122 : vector<32x16xf32>
    %124 = arith.extui %123 : vector<32x16xi1> to vector<32x16xi32>
    %125 = arith.sitofp %124 : vector<32x16xi32> to vector<32x16xf32>
    %cst_71 = arith.constant 1.000000e+00 : f32
    %126 = vector.broadcast %cst_71 : f32 to vector<32x16xf32>
    %127 = arith.subf %126, %125 : vector<32x16xf32>
    %128 = arith.mulf %121, %127 : vector<32x16xf32>
    %129 = vector.extract_strided_slice %115 {offsets = [32, 0], sizes = [32, 16], strides = [1, 1]} : vector<128x16xf32> to vector<32x16xf32>
    %130 = arith.subf %129, %128 : vector<32x16xf32>
    %cst_72 = arith.constant 5.000000e-01 : f32
    %131 = vector.broadcast %cst_72 : f32 to vector<32x16xf32>
    %132 = arith.mulf %130, %131 : vector<32x16xf32>
    %133 = arith.addf %128, %132 : vector<32x16xf32>
    %cst_73 = arith.constant 5.000000e-01 : f32
    %134 = vector.broadcast %cst_73 : f32 to vector<32x16xf32>
    %135 = arith.cmpf oge, %133, %134 : vector<32x16xf32>
    %136 = arith.extui %135 : vector<32x16xi1> to vector<32x16xi32>
    %137 = arith.sitofp %136 : vector<32x16xi32> to vector<32x16xf32>
    %cst_74 = arith.constant 1.000000e+00 : f32
    %138 = vector.broadcast %cst_74 : f32 to vector<32x16xf32>
    %139 = arith.subf %138, %137 : vector<32x16xf32>
    %140 = arith.mulf %133, %139 : vector<32x16xf32>
    %141 = vector.extract_strided_slice %115 {offsets = [64, 0], sizes = [32, 16], strides = [1, 1]} : vector<128x16xf32> to vector<32x16xf32>
    %142 = arith.subf %141, %140 : vector<32x16xf32>
    %cst_75 = arith.constant 5.000000e-01 : f32
    %143 = vector.broadcast %cst_75 : f32 to vector<32x16xf32>
    %144 = arith.mulf %142, %143 : vector<32x16xf32>
    %145 = arith.addf %140, %144 : vector<32x16xf32>
    %cst_76 = arith.constant 5.000000e-01 : f32
    %146 = vector.broadcast %cst_76 : f32 to vector<32x16xf32>
    %147 = arith.cmpf oge, %145, %146 : vector<32x16xf32>
    %148 = arith.extui %147 : vector<32x16xi1> to vector<32x16xi32>
    %149 = arith.sitofp %148 : vector<32x16xi32> to vector<32x16xf32>
    %cst_77 = arith.constant 1.000000e+00 : f32
    %150 = vector.broadcast %cst_77 : f32 to vector<32x16xf32>
    %151 = arith.subf %150, %149 : vector<32x16xf32>
    %152 = arith.mulf %145, %151 : vector<32x16xf32>
    %153 = vector.extract_strided_slice %115 {offsets = [96, 0], sizes = [32, 16], strides = [1, 1]} : vector<128x16xf32> to vector<32x16xf32>
    %154 = arith.subf %153, %152 : vector<32x16xf32>
    %cst_78 = arith.constant 5.000000e-01 : f32
    %155 = vector.broadcast %cst_78 : f32 to vector<32x16xf32>
    %156 = arith.mulf %154, %155 : vector<32x16xf32>
    %157 = arith.addf %152, %156 : vector<32x16xf32>
    %cst_79 = arith.constant 5.000000e-01 : f32
    %158 = vector.broadcast %cst_79 : f32 to vector<32x16xf32>
    %159 = arith.cmpf oge, %157, %158 : vector<32x16xf32>
    %160 = arith.extui %159 : vector<32x16xi1> to vector<32x16xi32>
    %161 = arith.sitofp %160 : vector<32x16xi32> to vector<32x16xf32>
    %162 = tpu.concatenate %125, %137, %149, %161 in 0 : vector<32x16xf32>, vector<32x16xf32>, vector<32x16xf32>, vector<32x16xf32> -> vector<128x16xf32>
    %c0_80 = arith.constant 0 : index
    %c1_81 = arith.constant 1 : index
    %c16 = arith.constant 16 : index
    %163 = vector.load %arg7[%c0_80, %c1_81, %c16] : memref<8x18x32xf32, #tpu.memory_space<vmem>>, vector<8x16x16xf32>
    %164 = vector.shape_cast %163 : vector<8x16x16xf32> to vector<128x16xf32>
    %165 = arith.addf %164, %162 : vector<128x16xf32>
    %cst_82 = arith.constant 5.000000e-01 : f32
    %166 = vector.broadcast %cst_82 : f32 to vector<128x16xf32>
    %167 = arith.mulf %166, %165 : vector<128x16xf32>
    %168 = vector.shape_cast %167 : vector<128x16xf32> to vector<8x16x16xf32>
    %c0_83 = arith.constant 0 : index
    %c1_84 = arith.constant 1 : index
    %c0_85 = arith.constant 0 : index
    %169 = vector.load %arg7[%c0_83, %c1_84, %c0_85] : memref<8x18x32xf32, #tpu.memory_space<vmem>>, vector<8x16x16xf32>
    tpu.vector_store %arg7[%c0_83, %c1_84, %c0_85], %168 {strides = array<i32>} : memref<8x18x32xf32, #tpu.memory_space<vmem>>, vector<8x16x16xf32>,
    %c0_86 = arith.constant 0 : index
    %c0_87 = arith.constant 0 : index
    %c0_88 = arith.constant 0 : index
    %170 = vector.load %arg7[%c0_86, %c0_87, %c0_88] : memref<8x18x32xf32, #tpu.memory_space<vmem>>, vector<8x16x16xf32>
    %171 = vector.shape_cast %170 : vector<8x16x16xf32> to vector<128x16xf32>
    %c0_89 = arith.constant 0 : index
    %c1_90 = arith.constant 1 : index
    %c0_91 = arith.constant 0 : index
    %172 = vector.load %arg7[%c0_89, %c1_90, %c0_91] : memref<8x18x32xf32, #tpu.memory_space<vmem>>, vector<8x16x16xf32>
    %173 = vector.shape_cast %172 : vector<8x16x16xf32> to vector<128x16xf32>
    %c0_92 = arith.constant 0 : index
    %c2_93 = arith.constant 2 : index
    %c0_94 = arith.constant 0 : index
    %174 = vector.load %arg7[%c0_92, %c2_93, %c0_94] : memref<8x18x32xf32, #tpu.memory_space<vmem>>, vector<8x16x16xf32>
    %175 = vector.shape_cast %174 : vector<8x16x16xf32> to vector<128x16xf32>
    %c0_95 = arith.constant 0 : index
    %c0_96 = arith.constant 0 : index
    %c0_97 = arith.constant 0 : index
    %176 = vector.load %arg3[%c0_95, %c0_96, %c0_97] : memref<3x16x32xf32, #tpu.memory_space<vmem>>, vector<1x16x32xf32>
    %177 = vector.shape_cast %176 : vector<1x16x32xf32> to vector<16x32xf32>
    %cst_98 = arith.constant dense<0.000000e+00> : vector<128x32xf32>
    %178 = tpu.matmul %171, %177, %cst_98 {dimension_numbers = #tpu.dot_dimension_numbers<[1], [0], [0], [1], [0, 0, 1, 1], [], []>} : vector<128x16xf32>, vector<16x32xf32>, vector<128x32xf32> -> vector<128x32xf32>
    %c1_99 = arith.constant 1 : index
    %c0_100 = arith.constant 0 : index
    %c0_101 = arith.constant 0 : index
    %179 = vector.load %arg3[%c1_99, %c0_100, %c0_101] : memref<3x16x32xf32, #tpu.memory_space<vmem>>, vector<1x16x32xf32>
    %180 = vector.shape_cast %179 : vector<1x16x32xf32> to vector<16x32xf32>
    %cst_102 = arith.constant dense<0.000000e+00> : vector<128x32xf32>
    %181 = tpu.matmul %173, %180, %cst_102 {dimension_numbers = #tpu.dot_dimension_numbers<[1], [0], [0], [1], [0, 0, 1, 1], [], []>} : vector<128x16xf32>, vector<16x32xf32>, vector<128x32xf32> -> vector<128x32xf32>
    %182 = arith.addf %178, %181 : vector<128x32xf32>
    %c2_103 = arith.constant 2 : index
    %c0_104 = arith.constant 0 : index
    %c0_105 = arith.constant 0 : index
    %183 = vector.load %arg3[%c2_103, %c0_104, %c0_105] : memref<3x16x32xf32, #tpu.memory_space<vmem>>, vector<1x16x32xf32>
    %184 = vector.shape_cast %183 : vector<1x16x32xf32> to vector<16x32xf32>
    %cst_106 = arith.constant dense<0.000000e+00> : vector<128x32xf32>
    %185 = tpu.matmul %175, %184, %cst_106 {dimension_numbers = #tpu.dot_dimension_numbers<[1], [0], [0], [1], [0, 0, 1, 1], [], []>} : vector<128x16xf32>, vector<16x32xf32>, vector<128x32xf32> -> vector<128x32xf32>
    %186 = arith.addf %182, %185 : vector<128x32xf32>
    %187 = vector.shape_cast %186 : vector<128x32xf32> to vector<8x16x32xf32>
    %cst_107 = arith.constant dense<0x7F800000> : vector<8x32xf32>
    %188 = vector.multi_reduction <minimumf>, %187, %cst_107 [1] : vector<8x16x32xf32> to vector<8x32xf32>
    %189 = vector.shape_cast %188 : vector<8x32xf32> to vector<8x1x32xf32>
    %cst_108 = arith.constant dense<0xFF800000> : vector<8x32xf32>
    %190 = vector.multi_reduction <maximumf>, %187, %cst_108 [1] : vector<8x16x32xf32> to vector<8x32xf32>
    %191 = vector.shape_cast %190 : vector<8x32xf32> to vector<8x1x32xf32>
    %192 = vector.broadcast %189 : vector<8x1x32xf32> to vector<8x16x32xf32>
    %193 = arith.subf %187, %192 : vector<8x16x32xf32>
    %194 = arith.subf %191, %189 : vector<8x1x32xf32>
    %cst_109 = arith.constant 9.99999996E-13 : f32
    %195 = vector.broadcast %cst_109 : f32 to vector<8x1x32xf32>
    %196 = arith.addf %194, %195 : vector<8x1x32xf32>
    %197 = tpu.reciprocal %196 : vector<8x1x32xf32> -> vector<8x1x32xf32>
    %198 = vector.broadcast %197 : vector<8x1x32xf32> to vector<8x16x32xf32>
    %199 = arith.mulf %193, %198 : vector<8x16x32xf32>
    %200 = vector.shape_cast %199 : vector<8x16x32xf32> to vector<128x32xf32>
    %cst_110 = arith.constant 0.000000e+00 : f32
    %201 = vector.broadcast %cst_110 : f32 to vector<32x32xf32>
    %202 = vector.extract_strided_slice %200 {offsets = [0, 0], sizes = [32, 32], strides = [1, 1]} : vector<128x32xf32> to vector<32x32xf32>
    %203 = arith.subf %202, %201 : vector<32x32xf32>
    %cst_111 = arith.constant 5.000000e-01 : f32
    %204 = vector.broadcast %cst_111 : f32 to vector<32x32xf32>
    %205 = arith.mulf %203, %204 : vector<32x32xf32>
    %206 = arith.addf %201, %205 : vector<32x32xf32>
    %cst_112 = arith.constant 5.000000e-01 : f32
    %207 = vector.broadcast %cst_112 : f32 to vector<32x32xf32>
    %208 = arith.cmpf oge, %206, %207 : vector<32x32xf32>
    %209 = arith.extui %208 : vector<32x32xi1> to vector<32x32xi32>
    %210 = arith.sitofp %209 : vector<32x32xi32> to vector<32x32xf32>
    %cst_113 = arith.constant 1.000000e+00 : f32
    %211 = vector.broadcast %cst_113 : f32 to vector<32x32xf32>
    %212 = arith.subf %211, %210 : vector<32x32xf32>
    %213 = arith.mulf %206, %212 : vector<32x32xf32>
    %214 = vector.extract_strided_slice %200 {offsets = [32, 0], sizes = [32, 32], strides = [1, 1]} : vector<128x32xf32> to vector<32x32xf32>
    %215 = arith.subf %214, %213 : vector<32x32xf32>
    %cst_114 = arith.constant 5.000000e-01 : f32
    %216 = vector.broadcast %cst_114 : f32 to vector<32x32xf32>
    %217 = arith.mulf %215, %216 : vector<32x32xf32>
    %218 = arith.addf %213, %217 : vector<32x32xf32>
    %cst_115 = arith.constant 5.000000e-01 : f32
    %219 = vector.broadcast %cst_115 : f32 to vector<32x32xf32>
    %220 = arith.cmpf oge, %218, %219 : vector<32x32xf32>
    %221 = arith.extui %220 : vector<32x32xi1> to vector<32x32xi32>
    %222 = arith.sitofp %221 : vector<32x32xi32> to vector<32x32xf32>
    %cst_116 = arith.constant 1.000000e+00 : f32
    %223 = vector.broadcast %cst_116 : f32 to vector<32x32xf32>
    %224 = arith.subf %223, %222 : vector<32x32xf32>
    %225 = arith.mulf %218, %224 : vector<32x32xf32>
    %226 = vector.extract_strided_slice %200 {offsets = [64, 0], sizes = [32, 32], strides = [1, 1]} : vector<128x32xf32> to vector<32x32xf32>
    %227 = arith.subf %226, %225 : vector<32x32xf32>
    %cst_117 = arith.constant 5.000000e-01 : f32
    %228 = vector.broadcast %cst_117 : f32 to vector<32x32xf32>
    %229 = arith.mulf %227, %228 : vector<32x32xf32>
    %230 = arith.addf %225, %229 : vector<32x32xf32>
    %cst_118 = arith.constant 5.000000e-01 : f32
    %231 = vector.broadcast %cst_118 : f32 to vector<32x32xf32>
    %232 = arith.cmpf oge, %230, %231 : vector<32x32xf32>
    %233 = arith.extui %232 : vector<32x32xi1> to vector<32x32xi32>
    %234 = arith.sitofp %233 : vector<32x32xi32> to vector<32x32xf32>
    %cst_119 = arith.constant 1.000000e+00 : f32
    %235 = vector.broadcast %cst_119 : f32 to vector<32x32xf32>
    %236 = arith.subf %235, %234 : vector<32x32xf32>
    %237 = arith.mulf %230, %236 : vector<32x32xf32>
    %238 = vector.extract_strided_slice %200 {offsets = [96, 0], sizes = [32, 32], strides = [1, 1]} : vector<128x32xf32> to vector<32x32xf32>
    %239 = arith.subf %238, %237 : vector<32x32xf32>
    %cst_120 = arith.constant 5.000000e-01 : f32
    %240 = vector.broadcast %cst_120 : f32 to vector<32x32xf32>
    %241 = arith.mulf %239, %240 : vector<32x32xf32>
    %242 = arith.addf %237, %241 : vector<32x32xf32>
    %cst_121 = arith.constant 5.000000e-01 : f32
    %243 = vector.broadcast %cst_121 : f32 to vector<32x32xf32>
    %244 = arith.cmpf oge, %242, %243 : vector<32x32xf32>
    %245 = arith.extui %244 : vector<32x32xi1> to vector<32x32xi32>
    %246 = arith.sitofp %245 : vector<32x32xi32> to vector<32x32xf32>
    %247 = tpu.concatenate %210, %222, %234, %246 in 0 : vector<32x32xf32>, vector<32x32xf32>, vector<32x32xf32>, vector<32x32xf32> -> vector<128x32xf32>
    %248 = vector.shape_cast %247 : vector<128x32xf32> to vector<8x16x32xf32>
    %c0_122 = arith.constant 0 : index
    %c1_123 = arith.constant 1 : index
    %c0_124 = arith.constant 0 : index
    %249 = vector.load %arg7[%c0_122, %c1_123, %c0_124] : memref<8x18x32xf32, #tpu.memory_space<vmem>>, vector<8x16x32xf32>
    tpu.vector_store %arg7[%c0_122, %c1_123, %c0_124], %248 {strides = array<i32>} : memref<8x18x32xf32, #tpu.memory_space<vmem>>, vector<8x16x32xf32>,
    %c0_125 = arith.constant 0 : index
    %c0_126 = arith.constant 0 : index
    %c0_127 = arith.constant 0 : index
    %250 = vector.load %arg7[%c0_125, %c0_126, %c0_127] : memref<8x18x32xf32, #tpu.memory_space<vmem>>, vector<8x16x16xf32>
    %251 = vector.shape_cast %250 : vector<8x16x16xf32> to vector<128x16xf32>
    %c0_128 = arith.constant 0 : index
    %c1_129 = arith.constant 1 : index
    %c0_130 = arith.constant 0 : index
    %252 = vector.load %arg7[%c0_128, %c1_129, %c0_130] : memref<8x18x32xf32, #tpu.memory_space<vmem>>, vector<8x16x16xf32>
    %253 = vector.shape_cast %252 : vector<8x16x16xf32> to vector<128x16xf32>
    %c0_131 = arith.constant 0 : index
    %c2_132 = arith.constant 2 : index
    %c0_133 = arith.constant 0 : index
    %254 = vector.load %arg7[%c0_131, %c2_132, %c0_133] : memref<8x18x32xf32, #tpu.memory_space<vmem>>, vector<8x16x16xf32>
    %255 = vector.shape_cast %254 : vector<8x16x16xf32> to vector<128x16xf32>
    %c0_134 = arith.constant 0 : index
    %c0_135 = arith.constant 0 : index
    %c0_136 = arith.constant 0 : index
    %256 = vector.load %arg4[%c0_134, %c0_135, %c0_136] : memref<3x16x16xf32, #tpu.memory_space<vmem>>, vector<1x16x16xf32>
    %257 = vector.shape_cast %256 : vector<1x16x16xf32> to vector<16x16xf32>
    %cst_137 = arith.constant dense<0.000000e+00> : vector<128x16xf32>
    %258 = tpu.matmul %251, %257, %cst_137 {dimension_numbers = #tpu.dot_dimension_numbers<[1], [0], [0], [1], [0, 0, 1, 1], [], []>} : vector<128x16xf32>, vector<16x16xf32>, vector<128x16xf32> -> vector<128x16xf32>
    %c1_138 = arith.constant 1 : index
    %c0_139 = arith.constant 0 : index
    %c0_140 = arith.constant 0 : index
    %259 = vector.load %arg4[%c1_138, %c0_139, %c0_140] : memref<3x16x16xf32, #tpu.memory_space<vmem>>, vector<1x16x16xf32>
    %260 = vector.shape_cast %259 : vector<1x16x16xf32> to vector<16x16xf32>
    %cst_141 = arith.constant dense<0.000000e+00> : vector<128x16xf32>
    %261 = tpu.matmul %253, %260, %cst_141 {dimension_numbers = #tpu.dot_dimension_numbers<[1], [0], [0], [1], [0, 0, 1, 1], [], []>} : vector<128x16xf32>, vector<16x16xf32>, vector<128x16xf32> -> vector<128x16xf32>
    %262 = arith.addf %258, %261 : vector<128x16xf32>
    %c2_142 = arith.constant 2 : index
    %c0_143 = arith.constant 0 : index
    %c0_144 = arith.constant 0 : index
    %263 = vector.load %arg4[%c2_142, %c0_143, %c0_144] : memref<3x16x16xf32, #tpu.memory_space<vmem>>, vector<1x16x16xf32>
    %264 = vector.shape_cast %263 : vector<1x16x16xf32> to vector<16x16xf32>
    %cst_145 = arith.constant dense<0.000000e+00> : vector<128x16xf32>
    %265 = tpu.matmul %255, %264, %cst_145 {dimension_numbers = #tpu.dot_dimension_numbers<[1], [0], [0], [1], [0, 0, 1, 1], [], []>} : vector<128x16xf32>, vector<16x16xf32>, vector<128x16xf32> -> vector<128x16xf32>
    %266 = arith.addf %262, %265 : vector<128x16xf32>
    %267 = vector.shape_cast %266 : vector<128x16xf32> to vector<8x16x16xf32>
    %cst_146 = arith.constant dense<0x7F800000> : vector<8x16xf32>
    %268 = vector.multi_reduction <minimumf>, %267, %cst_146 [1] : vector<8x16x16xf32> to vector<8x16xf32>
    %269 = vector.shape_cast %268 : vector<8x16xf32> to vector<8x1x16xf32>
    %cst_147 = arith.constant dense<0xFF800000> : vector<8x16xf32>
    %270 = vector.multi_reduction <maximumf>, %267, %cst_147 [1] : vector<8x16x16xf32> to vector<8x16xf32>
    %271 = vector.shape_cast %270 : vector<8x16xf32> to vector<8x1x16xf32>
    %272 = vector.broadcast %269 : vector<8x1x16xf32> to vector<8x16x16xf32>
    %273 = arith.subf %267, %272 : vector<8x16x16xf32>
    %274 = arith.subf %271, %269 : vector<8x1x16xf32>
    %cst_148 = arith.constant 9.99999996E-13 : f32
    %275 = vector.broadcast %cst_148 : f32 to vector<8x1x16xf32>
    %276 = arith.addf %274, %275 : vector<8x1x16xf32>
    %277 = tpu.reciprocal %276 : vector<8x1x16xf32> -> vector<8x1x16xf32>
    %278 = vector.broadcast %277 : vector<8x1x16xf32> to vector<8x16x16xf32>
    %279 = arith.mulf %273, %278 : vector<8x16x16xf32>
    %280 = vector.shape_cast %279 : vector<8x16x16xf32> to vector<128x16xf32>
    %cst_149 = arith.constant 0.000000e+00 : f32
    %281 = vector.broadcast %cst_149 : f32 to vector<32x16xf32>
    %282 = vector.extract_strided_slice %280 {offsets = [0, 0], sizes = [32, 16], strides = [1, 1]} : vector<128x16xf32> to vector<32x16xf32>
    %283 = arith.subf %282, %281 : vector<32x16xf32>
    %cst_150 = arith.constant 5.000000e-01 : f32
    %284 = vector.broadcast %cst_150 : f32 to vector<32x16xf32>
    %285 = arith.mulf %283, %284 : vector<32x16xf32>
    %286 = arith.addf %281, %285 : vector<32x16xf32>
    %cst_151 = arith.constant 5.000000e-01 : f32
    %287 = vector.broadcast %cst_151 : f32 to vector<32x16xf32>
    %288 = arith.cmpf oge, %286, %287 : vector<32x16xf32>
    %289 = arith.extui %288 : vector<32x16xi1> to vector<32x16xi32>
    %290 = arith.sitofp %289 : vector<32x16xi32> to vector<32x16xf32>
    %cst_152 = arith.constant 1.000000e+00 : f32
    %291 = vector.broadcast %cst_152 : f32 to vector<32x16xf32>
    %292 = arith.subf %291, %290 : vector<32x16xf32>
    %293 = arith.mulf %286, %292 : vector<32x16xf32>
    %294 = vector.extract_strided_slice %280 {offsets = [32, 0], sizes = [32, 16], strides = [1, 1]} : vector<128x16xf32> to vector<32x16xf32>
    %295 = arith.subf %294, %293 : vector<32x16xf32>
    %cst_153 = arith.constant 5.000000e-01 : f32
    %296 = vector.broadcast %cst_153 : f32 to vector<32x16xf32>
    %297 = arith.mulf %295, %296 : vector<32x16xf32>
    %298 = arith.addf %293, %297 : vector<32x16xf32>
    %cst_154 = arith.constant 5.000000e-01 : f32
    %299 = vector.broadcast %cst_154 : f32 to vector<32x16xf32>
    %300 = arith.cmpf oge, %298, %299 : vector<32x16xf32>
    %301 = arith.extui %300 : vector<32x16xi1> to vector<32x16xi32>
    %302 = arith.sitofp %301 : vector<32x16xi32> to vector<32x16xf32>
    %cst_155 = arith.constant 1.000000e+00 : f32
    %303 = vector.broadcast %cst_155 : f32 to vector<32x16xf32>
    %304 = arith.subf %303, %302 : vector<32x16xf32>
    %305 = arith.mulf %298, %304 : vector<32x16xf32>
    %306 = vector.extract_strided_slice %280 {offsets = [64, 0], sizes = [32, 16], strides = [1, 1]} : vector<128x16xf32> to vector<32x16xf32>
    %307 = arith.subf %306, %305 : vector<32x16xf32>
    %cst_156 = arith.constant 5.000000e-01 : f32
    %308 = vector.broadcast %cst_156 : f32 to vector<32x16xf32>
    %309 = arith.mulf %307, %308 : vector<32x16xf32>
    %310 = arith.addf %305, %309 : vector<32x16xf32>
    %cst_157 = arith.constant 5.000000e-01 : f32
    %311 = vector.broadcast %cst_157 : f32 to vector<32x16xf32>
    %312 = arith.cmpf oge, %310, %311 : vector<32x16xf32>
    %313 = arith.extui %312 : vector<32x16xi1> to vector<32x16xi32>
    %314 = arith.sitofp %313 : vector<32x16xi32> to vector<32x16xf32>
    %cst_158 = arith.constant 1.000000e+00 : f32
    %315 = vector.broadcast %cst_158 : f32 to vector<32x16xf32>
    %316 = arith.subf %315, %314 : vector<32x16xf32>
    %317 = arith.mulf %310, %316 : vector<32x16xf32>
    %318 = vector.extract_strided_slice %280 {offsets = [96, 0], sizes = [32, 16], strides = [1, 1]} : vector<128x16xf32> to vector<32x16xf32>
    %319 = arith.subf %318, %317 : vector<32x16xf32>
    %cst_159 = arith.constant 5.000000e-01 : f32
    %320 = vector.broadcast %cst_159 : f32 to vector<32x16xf32>
    %321 = arith.mulf %319, %320 : vector<32x16xf32>
    %322 = arith.addf %317, %321 : vector<32x16xf32>
    %cst_160 = arith.constant 5.000000e-01 : f32
    %323 = vector.broadcast %cst_160 : f32 to vector<32x16xf32>
    %324 = arith.cmpf oge, %322, %323 : vector<32x16xf32>
    %325 = arith.extui %324 : vector<32x16xi1> to vector<32x16xi32>
    %326 = arith.sitofp %325 : vector<32x16xi32> to vector<32x16xf32>
    %327 = tpu.concatenate %290, %302, %314, %326 in 0 : vector<32x16xf32>, vector<32x16xf32>, vector<32x16xf32>, vector<32x16xf32> -> vector<128x16xf32>
    %c0_161 = arith.constant 0 : index
    %c1_162 = arith.constant 1 : index
    %c16_163 = arith.constant 16 : index
    %328 = vector.load %arg7[%c0_161, %c1_162, %c16_163] : memref<8x18x32xf32, #tpu.memory_space<vmem>>, vector<8x16x16xf32>
    %329 = vector.shape_cast %328 : vector<8x16x16xf32> to vector<128x16xf32>
    %330 = arith.addf %329, %327 : vector<128x16xf32>
    %cst_164 = arith.constant 5.000000e-01 : f32
    %331 = vector.broadcast %cst_164 : f32 to vector<128x16xf32>
    %332 = arith.mulf %331, %330 : vector<128x16xf32>
    %333 = vector.shape_cast %332 : vector<128x16xf32> to vector<8x16x16xf32>
    %c0_165 = arith.constant 0 : index
    %c1_166 = arith.constant 1 : index
    %c0_167 = arith.constant 0 : index
    %334 = vector.load %arg7[%c0_165, %c1_166, %c0_167] : memref<8x18x32xf32, #tpu.memory_space<vmem>>, vector<8x16x16xf32>
    tpu.vector_store %arg7[%c0_165, %c1_166, %c0_167], %333 {strides = array<i32>} : memref<8x18x32xf32, #tpu.memory_space<vmem>>, vector<8x16x16xf32>,
    %cst_168 = arith.constant 0.000000e+00 : f32
    %335 = vector.broadcast %cst_168 : f32 to vector<8x8xf32>
    %c0_169 = arith.constant 0 : index
    %c1_170 = arith.constant 1 : index
    %c0_171 = arith.constant 0 : index
    %336 = vector.load %arg7[%c0_169, %c1_170, %c0_171] : memref<8x18x32xf32, #tpu.memory_space<vmem>>, vector<8x1x16xf32>
    %337 = vector.shape_cast %336 : vector<8x1x16xf32> to vector<8x16xf32>
    %c0_172 = arith.constant 0 : index
    %c0_173 = arith.constant 0 : index
    %c0_174 = arith.constant 0 : index
    %338 = vector.load %arg5[%c0_172, %c0_173, %c0_174] : memref<16x16x8xf32, #tpu.memory_space<vmem>>, vector<1x16x8xf32>
    %339 = vector.shape_cast %338 : vector<1x16x8xf32> to vector<16x8xf32>
    %cst_175 = arith.constant dense<0.000000e+00> : vector<8x8xf32>
    %340 = tpu.matmul %337, %339, %cst_175 {dimension_numbers = #tpu.dot_dimension_numbers<[1], [0], [0], [1], [0, 0, 1, 1], [], []>} : vector<8x16xf32>, vector<16x8xf32>, vector<8x8xf32> -> vector<8x8xf32>
    %341 = arith.addf %335, %340 : vector<8x8xf32>
    %c0_176 = arith.constant 0 : index
    %c2_177 = arith.constant 2 : index
    %c0_178 = arith.constant 0 : index
    %342 = vector.load %arg7[%c0_176, %c2_177, %c0_178] : memref<8x18x32xf32, #tpu.memory_space<vmem>>, vector<8x1x16xf32>
    %343 = vector.shape_cast %342 : vector<8x1x16xf32> to vector<8x16xf32>
    %c1_179 = arith.constant 1 : index
    %c0_180 = arith.constant 0 : index
    %c0_181 = arith.constant 0 : index
    %344 = vector.load %arg5[%c1_179, %c0_180, %c0_181] : memref<16x16x8xf32, #tpu.memory_space<vmem>>, vector<1x16x8xf32>
    %345 = vector.shape_cast %344 : vector<1x16x8xf32> to vector<16x8xf32>
    %cst_182 = arith.constant dense<0.000000e+00> : vector<8x8xf32>
    %346 = tpu.matmul %343, %345, %cst_182 {dimension_numbers = #tpu.dot_dimension_numbers<[1], [0], [0], [1], [0, 0, 1, 1], [], []>} : vector<8x16xf32>, vector<16x8xf32>, vector<8x8xf32> -> vector<8x8xf32>
    %347 = arith.addf %341, %346 : vector<8x8xf32>
    %c0_183 = arith.constant 0 : index
    %c3 = arith.constant 3 : index
    %c0_184 = arith.constant 0 : index
    %348 = vector.load %arg7[%c0_183, %c3, %c0_184] : memref<8x18x32xf32, #tpu.memory_space<vmem>>, vector<8x1x16xf32>
    %349 = vector.shape_cast %348 : vector<8x1x16xf32> to vector<8x16xf32>
    %c2_185 = arith.constant 2 : index
    %c0_186 = arith.constant 0 : index
    %c0_187 = arith.constant 0 : index
    %350 = vector.load %arg5[%c2_185, %c0_186, %c0_187] : memref<16x16x8xf32, #tpu.memory_space<vmem>>, vector<1x16x8xf32>
    %351 = vector.shape_cast %350 : vector<1x16x8xf32> to vector<16x8xf32>
    %cst_188 = arith.constant dense<0.000000e+00> : vector<8x8xf32>
    %352 = tpu.matmul %349, %351, %cst_188 {dimension_numbers = #tpu.dot_dimension_numbers<[1], [0], [0], [1], [0, 0, 1, 1], [], []>} : vector<8x16xf32>, vector<16x8xf32>, vector<8x8xf32> -> vector<8x8xf32>
    %353 = arith.addf %347, %352 : vector<8x8xf32>
    %c0_189 = arith.constant 0 : index
    %c4 = arith.constant 4 : index
    %c0_190 = arith.constant 0 : index
    %354 = vector.load %arg7[%c0_189, %c4, %c0_190] : memref<8x18x32xf32, #tpu.memory_space<vmem>>, vector<8x1x16xf32>
    %355 = vector.shape_cast %354 : vector<8x1x16xf32> to vector<8x16xf32>
    %c3_191 = arith.constant 3 : index
    %c0_192 = arith.constant 0 : index
    %c0_193 = arith.constant 0 : index
    %356 = vector.load %arg5[%c3_191, %c0_192, %c0_193] : memref<16x16x8xf32, #tpu.memory_space<vmem>>, vector<1x16x8xf32>
    %357 = vector.shape_cast %356 : vector<1x16x8xf32> to vector<16x8xf32>
    %cst_194 = arith.constant dense<0.000000e+00> : vector<8x8xf32>
    %358 = tpu.matmul %355, %357, %cst_194 {dimension_numbers = #tpu.dot_dimension_numbers<[1], [0], [0], [1], [0, 0, 1, 1], [], []>} : vector<8x16xf32>, vector<16x8xf32>, vector<8x8xf32> -> vector<8x8xf32>
    %359 = arith.addf %353, %358 : vector<8x8xf32>
    %c0_195 = arith.constant 0 : index
    %c5 = arith.constant 5 : index
    %c0_196 = arith.constant 0 : index
    %360 = vector.load %arg7[%c0_195, %c5, %c0_196] : memref<8x18x32xf32, #tpu.memory_space<vmem>>, vector<8x1x16xf32>
    %361 = vector.shape_cast %360 : vector<8x1x16xf32> to vector<8x16xf32>
    %c4_197 = arith.constant 4 : index
    %c0_198 = arith.constant 0 : index
    %c0_199 = arith.constant 0 : index
    %362 = vector.load %arg5[%c4_197, %c0_198, %c0_199] : memref<16x16x8xf32, #tpu.memory_space<vmem>>, vector<1x16x8xf32>
    %363 = vector.shape_cast %362 : vector<1x16x8xf32> to vector<16x8xf32>
    %cst_200 = arith.constant dense<0.000000e+00> : vector<8x8xf32>
    %364 = tpu.matmul %361, %363, %cst_200 {dimension_numbers = #tpu.dot_dimension_numbers<[1], [0], [0], [1], [0, 0, 1, 1], [], []>} : vector<8x16xf32>, vector<16x8xf32>, vector<8x8xf32> -> vector<8x8xf32>
    %365 = arith.addf %359, %364 : vector<8x8xf32>
    %c0_201 = arith.constant 0 : index
    %c6 = arith.constant 6 : index
    %c0_202 = arith.constant 0 : index
    %366 = vector.load %arg7[%c0_201, %c6, %c0_202] : memref<8x18x32xf32, #tpu.memory_space<vmem>>, vector<8x1x16xf32>
    %367 = vector.shape_cast %366 : vector<8x1x16xf32> to vector<8x16xf32>
    %c5_203 = arith.constant 5 : index
    %c0_204 = arith.constant 0 : index
    %c0_205 = arith.constant 0 : index
    %368 = vector.load %arg5[%c5_203, %c0_204, %c0_205] : memref<16x16x8xf32, #tpu.memory_space<vmem>>, vector<1x16x8xf32>
    %369 = vector.shape_cast %368 : vector<1x16x8xf32> to vector<16x8xf32>
    %cst_206 = arith.constant dense<0.000000e+00> : vector<8x8xf32>
    %370 = tpu.matmul %367, %369, %cst_206 {dimension_numbers = #tpu.dot_dimension_numbers<[1], [0], [0], [1], [0, 0, 1, 1], [], []>} : vector<8x16xf32>, vector<16x8xf32>, vector<8x8xf32> -> vector<8x8xf32>
    %371 = arith.addf %365, %370 : vector<8x8xf32>
    %c0_207 = arith.constant 0 : index
    %c7 = arith.constant 7 : index
    %c0_208 = arith.constant 0 : index
    %372 = vector.load %arg7[%c0_207, %c7, %c0_208] : memref<8x18x32xf32, #tpu.memory_space<vmem>>, vector<8x1x16xf32>
    %373 = vector.shape_cast %372 : vector<8x1x16xf32> to vector<8x16xf32>
    %c6_209 = arith.constant 6 : index
    %c0_210 = arith.constant 0 : index
    %c0_211 = arith.constant 0 : index
    %374 = vector.load %arg5[%c6_209, %c0_210, %c0_211] : memref<16x16x8xf32, #tpu.memory_space<vmem>>, vector<1x16x8xf32>
    %375 = vector.shape_cast %374 : vector<1x16x8xf32> to vector<16x8xf32>
    %cst_212 = arith.constant dense<0.000000e+00> : vector<8x8xf32>
    %376 = tpu.matmul %373, %375, %cst_212 {dimension_numbers = #tpu.dot_dimension_numbers<[1], [0], [0], [1], [0, 0, 1, 1], [], []>} : vector<8x16xf32>, vector<16x8xf32>, vector<8x8xf32> -> vector<8x8xf32>
    %377 = arith.addf %371, %376 : vector<8x8xf32>
    %c0_213 = arith.constant 0 : index
    %c8 = arith.constant 8 : index
    %c0_214 = arith.constant 0 : index
    %378 = vector.load %arg7[%c0_213, %c8, %c0_214] : memref<8x18x32xf32, #tpu.memory_space<vmem>>, vector<8x1x16xf32>
    %379 = vector.shape_cast %378 : vector<8x1x16xf32> to vector<8x16xf32>
    %c7_215 = arith.constant 7 : index
    %c0_216 = arith.constant 0 : index
    %c0_217 = arith.constant 0 : index
    %380 = vector.load %arg5[%c7_215, %c0_216, %c0_217] : memref<16x16x8xf32, #tpu.memory_space<vmem>>, vector<1x16x8xf32>
    %381 = vector.shape_cast %380 : vector<1x16x8xf32> to vector<16x8xf32>
    %cst_218 = arith.constant dense<0.000000e+00> : vector<8x8xf32>
    %382 = tpu.matmul %379, %381, %cst_218 {dimension_numbers = #tpu.dot_dimension_numbers<[1], [0], [0], [1], [0, 0, 1, 1], [], []>} : vector<8x16xf32>, vector<16x8xf32>, vector<8x8xf32> -> vector<8x8xf32>
    %383 = arith.addf %377, %382 : vector<8x8xf32>
    %c0_219 = arith.constant 0 : index
    %c9 = arith.constant 9 : index
    %c0_220 = arith.constant 0 : index
    %384 = vector.load %arg7[%c0_219, %c9, %c0_220] : memref<8x18x32xf32, #tpu.memory_space<vmem>>, vector<8x1x16xf32>
    %385 = vector.shape_cast %384 : vector<8x1x16xf32> to vector<8x16xf32>
    %c8_221 = arith.constant 8 : index
    %c0_222 = arith.constant 0 : index
    %c0_223 = arith.constant 0 : index
    %386 = vector.load %arg5[%c8_221, %c0_222, %c0_223] : memref<16x16x8xf32, #tpu.memory_space<vmem>>, vector<1x16x8xf32>
    %387 = vector.shape_cast %386 : vector<1x16x8xf32> to vector<16x8xf32>
    %cst_224 = arith.constant dense<0.000000e+00> : vector<8x8xf32>
    %388 = tpu.matmul %385, %387, %cst_224 {dimension_numbers = #tpu.dot_dimension_numbers<[1], [0], [0], [1], [0, 0, 1, 1], [], []>} : vector<8x16xf32>, vector<16x8xf32>, vector<8x8xf32> -> vector<8x8xf32>
    %389 = arith.addf %383, %388 : vector<8x8xf32>
    %c0_225 = arith.constant 0 : index
    %c10 = arith.constant 10 : index
    %c0_226 = arith.constant 0 : index
    %390 = vector.load %arg7[%c0_225, %c10, %c0_226] : memref<8x18x32xf32, #tpu.memory_space<vmem>>, vector<8x1x16xf32>
    %391 = vector.shape_cast %390 : vector<8x1x16xf32> to vector<8x16xf32>
    %c9_227 = arith.constant 9 : index
    %c0_228 = arith.constant 0 : index
    %c0_229 = arith.constant 0 : index
    %392 = vector.load %arg5[%c9_227, %c0_228, %c0_229] : memref<16x16x8xf32, #tpu.memory_space<vmem>>, vector<1x16x8xf32>
    %393 = vector.shape_cast %392 : vector<1x16x8xf32> to vector<16x8xf32>
    %cst_230 = arith.constant dense<0.000000e+00> : vector<8x8xf32>
    %394 = tpu.matmul %391, %393, %cst_230 {dimension_numbers = #tpu.dot_dimension_numbers<[1], [0], [0], [1], [0, 0, 1, 1], [], []>} : vector<8x16xf32>, vector<16x8xf32>, vector<8x8xf32> -> vector<8x8xf32>
    %395 = arith.addf %389, %394 : vector<8x8xf32>
    %c0_231 = arith.constant 0 : index
    %c11 = arith.constant 11 : index
    %c0_232 = arith.constant 0 : index
    %396 = vector.load %arg7[%c0_231, %c11, %c0_232] : memref<8x18x32xf32, #tpu.memory_space<vmem>>, vector<8x1x16xf32>
    %397 = vector.shape_cast %396 : vector<8x1x16xf32> to vector<8x16xf32>
    %c10_233 = arith.constant 10 : index
    %c0_234 = arith.constant 0 : index
    %c0_235 = arith.constant 0 : index
    %398 = vector.load %arg5[%c10_233, %c0_234, %c0_235] : memref<16x16x8xf32, #tpu.memory_space<vmem>>, vector<1x16x8xf32>
    %399 = vector.shape_cast %398 : vector<1x16x8xf32> to vector<16x8xf32>
    %cst_236 = arith.constant dense<0.000000e+00> : vector<8x8xf32>
    %400 = tpu.matmul %397, %399, %cst_236 {dimension_numbers = #tpu.dot_dimension_numbers<[1], [0], [0], [1], [0, 0, 1, 1], [], []>} : vector<8x16xf32>, vector<16x8xf32>, vector<8x8xf32> -> vector<8x8xf32>
    %401 = arith.addf %395, %400 : vector<8x8xf32>
    %c0_237 = arith.constant 0 : index
    %c12 = arith.constant 12 : index
    %c0_238 = arith.constant 0 : index
    %402 = vector.load %arg7[%c0_237, %c12, %c0_238] : memref<8x18x32xf32, #tpu.memory_space<vmem>>, vector<8x1x16xf32>
    %403 = vector.shape_cast %402 : vector<8x1x16xf32> to vector<8x16xf32>
    %c11_239 = arith.constant 11 : index
    %c0_240 = arith.constant 0 : index
    %c0_241 = arith.constant 0 : index
    %404 = vector.load %arg5[%c11_239, %c0_240, %c0_241] : memref<16x16x8xf32, #tpu.memory_space<vmem>>, vector<1x16x8xf32>
    %405 = vector.shape_cast %404 : vector<1x16x8xf32> to vector<16x8xf32>
    %cst_242 = arith.constant dense<0.000000e+00> : vector<8x8xf32>
    %406 = tpu.matmul %403, %405, %cst_242 {dimension_numbers = #tpu.dot_dimension_numbers<[1], [0], [0], [1], [0, 0, 1, 1], [], []>} : vector<8x16xf32>, vector<16x8xf32>, vector<8x8xf32> -> vector<8x8xf32>
    %407 = arith.addf %401, %406 : vector<8x8xf32>
    %c0_243 = arith.constant 0 : index
    %c13 = arith.constant 13 : index
    %c0_244 = arith.constant 0 : index
    %408 = vector.load %arg7[%c0_243, %c13, %c0_244] : memref<8x18x32xf32, #tpu.memory_space<vmem>>, vector<8x1x16xf32>
    %409 = vector.shape_cast %408 : vector<8x1x16xf32> to vector<8x16xf32>
    %c12_245 = arith.constant 12 : index
    %c0_246 = arith.constant 0 : index
    %c0_247 = arith.constant 0 : index
    %410 = vector.load %arg5[%c12_245, %c0_246, %c0_247] : memref<16x16x8xf32, #tpu.memory_space<vmem>>, vector<1x16x8xf32>
    %411 = vector.shape_cast %410 : vector<1x16x8xf32> to vector<16x8xf32>
    %cst_248 = arith.constant dense<0.000000e+00> : vector<8x8xf32>
    %412 = tpu.matmul %409, %411, %cst_248 {dimension_numbers = #tpu.dot_dimension_numbers<[1], [0], [0], [1], [0, 0, 1, 1], [], []>} : vector<8x16xf32>, vector<16x8xf32>, vector<8x8xf32> -> vector<8x8xf32>
    %413 = arith.addf %407, %412 : vector<8x8xf32>
    %c0_249 = arith.constant 0 : index
    %c14 = arith.constant 14 : index
    %c0_250 = arith.constant 0 : index
    %414 = vector.load %arg7[%c0_249, %c14, %c0_250] : memref<8x18x32xf32, #tpu.memory_space<vmem>>, vector<8x1x16xf32>
    %415 = vector.shape_cast %414 : vector<8x1x16xf32> to vector<8x16xf32>
    %c13_251 = arith.constant 13 : index
    %c0_252 = arith.constant 0 : index
    %c0_253 = arith.constant 0 : index
    %416 = vector.load %arg5[%c13_251, %c0_252, %c0_253] : memref<16x16x8xf32, #tpu.memory_space<vmem>>, vector<1x16x8xf32>
    %417 = vector.shape_cast %416 : vector<1x16x8xf32> to vector<16x8xf32>
    %cst_254 = arith.constant dense<0.000000e+00> : vector<8x8xf32>
    %418 = tpu.matmul %415, %417, %cst_254 {dimension_numbers = #tpu.dot_dimension_numbers<[1], [0], [0], [1], [0, 0, 1, 1], [], []>} : vector<8x16xf32>, vector<16x8xf32>, vector<8x8xf32> -> vector<8x8xf32>
    %419 = arith.addf %413, %418 : vector<8x8xf32>
    %c0_255 = arith.constant 0 : index
    %c15 = arith.constant 15 : index
    %c0_256 = arith.constant 0 : index
    %420 = vector.load %arg7[%c0_255, %c15, %c0_256] : memref<8x18x32xf32, #tpu.memory_space<vmem>>, vector<8x1x16xf32>
    %421 = vector.shape_cast %420 : vector<8x1x16xf32> to vector<8x16xf32>
    %c14_257 = arith.constant 14 : index
    %c0_258 = arith.constant 0 : index
    %c0_259 = arith.constant 0 : index
    %422 = vector.load %arg5[%c14_257, %c0_258, %c0_259] : memref<16x16x8xf32, #tpu.memory_space<vmem>>, vector<1x16x8xf32>
    %423 = vector.shape_cast %422 : vector<1x16x8xf32> to vector<16x8xf32>
    %cst_260 = arith.constant dense<0.000000e+00> : vector<8x8xf32>
    %424 = tpu.matmul %421, %423, %cst_260 {dimension_numbers = #tpu.dot_dimension_numbers<[1], [0], [0], [1], [0, 0, 1, 1], [], []>} : vector<8x16xf32>, vector<16x8xf32>, vector<8x8xf32> -> vector<8x8xf32>
    %425 = arith.addf %419, %424 : vector<8x8xf32>
    %c0_261 = arith.constant 0 : index
    %c16_262 = arith.constant 16 : index
    %c0_263 = arith.constant 0 : index
    %426 = vector.load %arg7[%c0_261, %c16_262, %c0_263] : memref<8x18x32xf32, #tpu.memory_space<vmem>>, vector<8x1x16xf32>
    %427 = vector.shape_cast %426 : vector<8x1x16xf32> to vector<8x16xf32>
    %c15_264 = arith.constant 15 : index
    %c0_265 = arith.constant 0 : index
    %c0_266 = arith.constant 0 : index
    %428 = vector.load %arg5[%c15_264, %c0_265, %c0_266] : memref<16x16x8xf32, #tpu.memory_space<vmem>>, vector<1x16x8xf32>
    %429 = vector.shape_cast %428 : vector<1x16x8xf32> to vector<16x8xf32>
    %cst_267 = arith.constant dense<0.000000e+00> : vector<8x8xf32>
    %430 = tpu.matmul %427, %429, %cst_267 {dimension_numbers = #tpu.dot_dimension_numbers<[1], [0], [0], [1], [0, 0, 1, 1], [], []>} : vector<8x16xf32>, vector<16x8xf32>, vector<8x8xf32> -> vector<8x8xf32>
    %431 = arith.addf %425, %430 : vector<8x8xf32>
    %cst_268 = arith.constant 0.000000e+00 : f32
    %432 = vector.broadcast %cst_268 : f32 to vector<2x8xf32>
    %433 = vector.extract_strided_slice %431 {offsets = [0, 0], sizes = [2, 8], strides = [1, 1]} : vector<8x8xf32> to vector<2x8xf32>
    %434 = arith.subf %433, %432 : vector<2x8xf32>
    %cst_269 = arith.constant 5.000000e-01 : f32
    %435 = vector.broadcast %cst_269 : f32 to vector<2x8xf32>
    %436 = arith.mulf %434, %435 : vector<2x8xf32>
    %437 = arith.addf %432, %436 : vector<2x8xf32>
    %cst_270 = arith.constant 1.000000e+00 : f32
    %438 = vector.broadcast %cst_270 : f32 to vector<2x8xf32>
    %439 = arith.cmpf oge, %437, %438 : vector<2x8xf32>
    %440 = arith.extui %439 : vector<2x8xi1> to vector<2x8xi32>
    %441 = arith.sitofp %440 : vector<2x8xi32> to vector<2x8xf32>
    %cst_271 = arith.constant 1.000000e+00 : f32
    %442 = vector.broadcast %cst_271 : f32 to vector<2x8xf32>
    %443 = arith.subf %442, %441 : vector<2x8xf32>
    %444 = arith.mulf %437, %443 : vector<2x8xf32>
    %445 = vector.extract_strided_slice %431 {offsets = [2, 0], sizes = [2, 8], strides = [1, 1]} : vector<8x8xf32> to vector<2x8xf32>
    %446 = arith.subf %445, %444 : vector<2x8xf32>
    %cst_272 = arith.constant 5.000000e-01 : f32
    %447 = vector.broadcast %cst_272 : f32 to vector<2x8xf32>
    %448 = arith.mulf %446, %447 : vector<2x8xf32>
    %449 = arith.addf %444, %448 : vector<2x8xf32>
    %cst_273 = arith.constant 1.000000e+00 : f32
    %450 = vector.broadcast %cst_273 : f32 to vector<2x8xf32>
    %451 = arith.cmpf oge, %449, %450 : vector<2x8xf32>
    %452 = arith.extui %451 : vector<2x8xi1> to vector<2x8xi32>
    %453 = arith.sitofp %452 : vector<2x8xi32> to vector<2x8xf32>
    %cst_274 = arith.constant 1.000000e+00 : f32
    %454 = vector.broadcast %cst_274 : f32 to vector<2x8xf32>
    %455 = arith.subf %454, %453 : vector<2x8xf32>
    %456 = arith.mulf %449, %455 : vector<2x8xf32>
    %457 = vector.extract_strided_slice %431 {offsets = [4, 0], sizes = [2, 8], strides = [1, 1]} : vector<8x8xf32> to vector<2x8xf32>
    %458 = arith.subf %457, %456 : vector<2x8xf32>
    %cst_275 = arith.constant 5.000000e-01 : f32
    %459 = vector.broadcast %cst_275 : f32 to vector<2x8xf32>
    %460 = arith.mulf %458, %459 : vector<2x8xf32>
    %461 = arith.addf %456, %460 : vector<2x8xf32>
    %cst_276 = arith.constant 1.000000e+00 : f32
    %462 = vector.broadcast %cst_276 : f32 to vector<2x8xf32>
    %463 = arith.cmpf oge, %461, %462 : vector<2x8xf32>
    %464 = arith.extui %463 : vector<2x8xi1> to vector<2x8xi32>
    %465 = arith.sitofp %464 : vector<2x8xi32> to vector<2x8xf32>
    %cst_277 = arith.constant 1.000000e+00 : f32
    %466 = vector.broadcast %cst_277 : f32 to vector<2x8xf32>
    %467 = arith.subf %466, %465 : vector<2x8xf32>
    %468 = arith.mulf %461, %467 : vector<2x8xf32>
    %469 = vector.extract_strided_slice %431 {offsets = [6, 0], sizes = [2, 8], strides = [1, 1]} : vector<8x8xf32> to vector<2x8xf32>
    %470 = arith.subf %469, %468 : vector<2x8xf32>
    %cst_278 = arith.constant 5.000000e-01 : f32
    %471 = vector.broadcast %cst_278 : f32 to vector<2x8xf32>
    %472 = arith.mulf %470, %471 : vector<2x8xf32>
    %473 = arith.addf %468, %472 : vector<2x8xf32>
    %cst_279 = arith.constant 1.000000e+00 : f32
    %474 = vector.broadcast %cst_279 : f32 to vector<2x8xf32>
    %475 = arith.cmpf oge, %473, %474 : vector<2x8xf32>
    %476 = arith.extui %475 : vector<2x8xi1> to vector<2x8xi32>
    %477 = arith.sitofp %476 : vector<2x8xi32> to vector<2x8xf32>
    %478 = vector.shape_cast %441 : vector<2x8xf32> to vector<1x2x8xf32>
    %479 = vector.shape_cast %453 : vector<2x8xf32> to vector<1x2x8xf32>
    %480 = vector.shape_cast %465 : vector<2x8xf32> to vector<1x2x8xf32>
    %481 = vector.shape_cast %477 : vector<2x8xf32> to vector<1x2x8xf32>
    %482 = tpu.concatenate %478, %479, %480, %481 in 0 : vector<1x2x8xf32>, vector<1x2x8xf32>, vector<1x2x8xf32>, vector<1x2x8xf32> -> vector<4x2x8xf32>
    %c0_280 = arith.constant 0 : index
    %c0_281 = arith.constant 0 : index
    %c0_282 = arith.constant 0 : index
    %483 = vector.load %arg6[%c0_280, %c0_281, %c0_282] : memref<4x2x8xf32, #tpu.memory_space<vmem>>, vector<4x2x8xf32>
    tpu.vector_store %arg6[%c0_280, %c0_281, %c0_282], %482 {strides = array<i32>} : memref<4x2x8xf32, #tpu.memory_space<vmem>>, vector<4x2x8xf32>,
    return
  }
}

</mosaic_0001>

<bundles_post_ra>
// kernel: lif_fractalnet_forward.1
= control target key start
LH: loop header
LB: loop body
LE: loop exit
PB: predicated region body
PF: predicated region fallthrough
CT: control target
= control target key end

     0   :  { %vm182_vm0 = vcmask 1043456   ;;  %vm24_vm1 = vcmask 261120   ;;  %vm27_vm2 = vcmask 254976   ;;  %v7437_v1 = vmov 0.0   ;;  %s7430_s0 = inlined_call_operand.vmem [shape: f32[128,4], index: 0, kind: input, shape index: {}]   ;;  %s7431_s1 = inlined_call_operand.vmem [shape: f32[3,4,32], index: 1, kind: input, shape index: {}]   ;;  %s7432_s2 = inlined_call_operand.vmem [shape: f32[3,16,16], index: 2, kind: input, shape index: {}]   ;;  %s7433_s3 = inlined_call_operand.vmem [shape: f32[3,16,32], index: 3, kind: input, shape index: {}]   ;;  %s7434_s4 = inlined_call_operand.vmem [shape: f32[3,16,16], index: 4, kind: input, shape index: {}]   ;;  %s7435_s5 = inlined_call_operand.vmem [shape: f32[16,16,8], index: 5, kind: input, shape index: {}]   ;;  %s7436_s6 = inlined_call_operand.hbm [shape: f32[4,2,8], index: 6, kind: output, shape index: {}]  }
   0x1   :  { %v4804_v0 = vld [vmem:[%s7431_s1 + $0x8] sm:$0xf]  ;;  %25 = vst.msk [vmem:[#allocation2] sm:$0xff] %vm24_vm1, %v7437_v1  ;;  %v50_v2 = vld [vmem:[%s7430_s0] sm:$0xff]  ;;  %vm66_vm3 = vcmask 31744  }
   0x2   :  { %4805 = vmatpush.msk.msra.mxu2 %vm182_vm0, %v4804_v0  ;;  %v4769_v3 = vld [vmem:[%s7431_s1 + $0x4] sm:$0xf]  ;;  %26 = vst.msk [vmem:[#allocation2 + $0x8] sm:$0xff] %vm24_vm1, %v7437_v1  ;;  %v51_v4 = vld [vmem:[%s7430_s0 + $0x8] sm:$0xff]  ;;  %v131_v5 = vld [vmem:[%s7431_s1] sm:$0xf] }
   0x3   :  { %4770 = vmatpush.msk.msra.mxu0 %vm182_vm0, %v4769_v3  ;;  %28 = vst.msk [vmem:[#allocation2 + $0x10] sm:$0x3] %vm27_vm2, %v7437_v1  ;;  %4787 = vmatpush.msk.msra.mxu1 %vm182_vm0, %v131_v5 }
   0x4   :  { %11 = vsyncpa [#allocation4], 0  ;;  %67 = vst.msk [vmem:[#allocation2 + $0x1] sm:$0xff] %vm66_vm3, %v50_v2  ;;  %v52_v12 = vld [vmem:[%s7430_s0 + $0x10] sm:$0xff]  ;;  %v53_v13 = vld [vmem:[%s7430_s0 + $0x18] sm:$0xff]  ;;  %vm990_vm10 = vcmask 130048  }
   0x5   :  { %68 = vst.msk [vmem:[#allocation2 + $0x9] sm:$0xff] %vm66_vm3, %v51_v4  ;;  %v54_v14 = vld [vmem:[%s7430_s0 + $0x20] sm:$0xff]  ;;  %v55_v15 = vld [vmem:[%s7430_s0 + $0x28] sm:$0xff]  ;;  %v56_v16 = vld [vmem:[%s7430_s0 + $0x30] sm:$0xff]  ;;  %s5260_s20 = smov 112   ;;  %s4757_s26 = sshll.u32 %s7436_s6, 4  ;;  %s4758_s26 = int_to_ptr.hbm [resolvable:$true] %s4757_s26 }
   0x6   :  { %29 = vst.msk [vmem:[#allocation2 + $0x18] sm:$0xff] %vm24_vm1, %v7437_v1  ;;  %v57_v17 = vld [vmem:[%s7430_s0 + $0x38] sm:$0xff]  ;;  %v58_v24 = vld [vmem:[%s7430_s0 + $0x40] sm:$0xff]  ;;  %v59_v25 = vld [vmem:[%s7430_s0 + $0x48] sm:$0xff]  ;;  %s5262_s27 = smov 32   ;;  %s5263_s28 = smov 2  }
   0x7   :  { %30 = vst.msk [vmem:[#allocation2 + $0x20] sm:$0xff] %vm24_vm1, %v7437_v1  ;;  %v986_v29 = vld [vmem:[%s7432_s2 + $0x8] sm:$0xff]  ;;  %v60_v33 = vld [vmem:[%s7430_s0 + $0x50] sm:$0xff]  ;;  %v61_v34 = vld [vmem:[%s7430_s0 + $0x58] sm:$0xff] }
   0x8   :  { %31 = vst.msk [vmem:[#allocation2 + $0x28] sm:$0x3] %vm27_vm2, %v7437_v1  ;;  %1166 = vmatpush.msrb.mxu0 %v986_v29  ;;  %v4873_v35 = vld [vmem:[%s7432_s2 + $0x28] sm:$0xff]  ;;  %v62_v42 = vld [vmem:[%s7430_s0 + $0x60] sm:$0xff]  ;;  %v64_v50 = vld [vmem:[%s7430_s0 + $0x70] sm:$0xff] }
   0x9   :  { %32 = vst.msk [vmem:[#allocation2 + $0x30] sm:$0xff] %vm24_vm1, %v7437_v1  ;;  %1282 = vmatpush.msrb.mxu1 %v4873_v35  ;;  %v63_v43 = vld [vmem:[%s7430_s0 + $0x68] sm:$0xff]  ;;  %v65_v51 = vld [vmem:[%s7430_s0 + $0x78] sm:$0xff]  ;;  %v985_v61 = vld [vmem:[%s7432_s2] sm:$0xff] }
   0xa   :  { %33 = vst.msk [vmem:[#allocation2 + $0x38] sm:$0xff] %vm24_vm1, %v7437_v1  ;;  %v4872_v62 = vld [vmem:[%s7432_s2 + $0x20] sm:$0xff]  ;;  %1167 = vmatpush.msrb.mxu0 %v985_v61 }
   0xb   :  { %34 = vst.msk [vmem:[#allocation2 + $0x40] sm:$0x3] %vm27_vm2, %v7437_v1  ;;  %v99_v6 = vld [vmem:[#allocation2 + $0x1] sm:$0xff]  ;;  %1283 = vmatpush.msrb.mxu1 %v4872_v62 }
   0xc   :  { %v83_v7 = vld [vmem:[#allocation2] sm:$0xff]  ;;  %35 = vst.msk [vmem:[#allocation2 + $0x48] sm:$0xff] %vm24_vm1, %v7437_v1  ;;  %4771 = vmatmul.msk.f32.vlgmr.msra.gmra.mxu0 %vm66_vm3, %v99_v6  ;;  %v100_v9 = vld [vmem:[#allocation2 + $0x9] sm:$0xff] }
   0xd   :  { %v115_v8 = vld [vmem:[#allocation2 + $0x2] sm:$0xff]  ;;  %4788 = vmatmul.msk.f32.vlgmr.msra.gmra.mxu1 %vm66_vm3, %v83_v7  ;;  %36 = vst.msk [vmem:[#allocation2 + $0x50] sm:$0xff] %vm24_vm1, %v7437_v1  ;;  %v116_v11 = vld [vmem:[#allocation2 + $0xa] sm:$0xff] }
   0xe   :  { %4806 = vmatmul.msk.f32.vlgmr.msra.gmra.mxu2 %vm66_vm3, %v115_v8  ;;  %37 = vst.msk [vmem:[#allocation2 + $0x58] sm:$0x3] %vm27_vm2, %v7437_v1  ;;  %v84_v10 = vld [vmem:[#allocation2 + $0x8] sm:$0xff] }
   0xf   :  { %38 = vst.msk [vmem:[#allocation2 + $0x60] sm:$0xff] %vm24_vm1, %v7437_v1 }
  0x10   :  { %39 = vst.msk [vmem:[#allocation2 + $0x68] sm:$0xff] %vm24_vm1, %v7437_v1 }
  0x11   :  { %40 = vst.msk [vmem:[#allocation2 + $0x70] sm:$0x3] %vm27_vm2, %v7437_v1 }
  0x12   :  { %41 = vst.msk [vmem:[#allocation2 + $0x78] sm:$0xff] %vm24_vm1, %v7437_v1 }
  0x13   :  { %42 = vst.msk [vmem:[#allocation2 + $0x80] sm:$0xff] %vm24_vm1, %v7437_v1 }
  0x14   :  { %43 = vst.msk [vmem:[#allocation2 + $0x88] sm:$0x3] %vm27_vm2, %v7437_v1  ;;  %4772 = vmatmul.msk.f32.gmra.mxu0 %vm66_vm3, %v100_v9 }
  0x15   :  { %4789 = vmatmul.msk.f32.gmra.mxu1 %vm66_vm3, %v84_v10  ;;  %44 = vst.msk [vmem:[#allocation2 + $0x90] sm:$0xff] %vm24_vm1, %v7437_v1 }
  0x16   :  { %4807 = vmatmul.msk.f32.gmra.mxu2 %vm66_vm3, %v116_v11  ;;  %45 = vst.msk [vmem:[#allocation2 + $0x98] sm:$0xff] %vm24_vm1, %v7437_v1 }
  0x17   :  { %46 = vst.msk [vmem:[#allocation2 + $0xa0] sm:$0x3] %vm27_vm2, %v7437_v1 }
  0x18   :  { %47 = vst.msk [vmem:[#allocation2 + $0xa8] sm:$0xff] %vm24_vm1, %v7437_v1 }
  0x19   :  { %48 = vst.msk [vmem:[#allocation2 + $0xb0] sm:$0xff] %vm24_vm1, %v7437_v1 }
  0x1a   :  { %49 = vst.msk [vmem:[#allocation2 + $0xb8] sm:$0x3] %vm27_vm2, %v7437_v1 }
  0x1b   :  { %69 = vst.msk [vmem:[#allocation2 + $0x19] sm:$0xff] %vm66_vm3, %v52_v12 }
  0x1c   :  { %70 = vst.msk [vmem:[#allocation2 + $0x21] sm:$0xff] %vm66_vm3, %v53_v13 }
  0x1d   :  { %71 = vst.msk [vmem:[#allocation2 + $0x31] sm:$0xff] %vm66_vm3, %v54_v14 }
  0x1e   :  { %72 = vst.msk [vmem:[#allocation2 + $0x39] sm:$0xff] %vm66_vm3, %v55_v15 }
  0x1f   :  { %73 = vst.msk [vmem:[#allocation2 + $0x49] sm:$0xff] %vm66_vm3, %v56_v16 }
  0x20   :  { %74 = vst.msk [vmem:[#allocation2 + $0x51] sm:$0xff] %vm66_vm3, %v57_v17 }
  0x21   :  { %75 = vst.msk [vmem:[#allocation2 + $0x61] sm:$0xff] %vm66_vm3, %v58_v24 }
  0x22   :  { %v101_v18 = vld [vmem:[#allocation2 + $0x19] sm:$0xff]  ;;  %76 = vst.msk [vmem:[#allocation2 + $0x69] sm:$0xff] %vm66_vm3, %v59_v25 }
  0x23   :  { %v85_v19 = vld [vmem:[#allocation2 + $0x18] sm:$0xff]  ;;  %4773 = vmatmul.msk.f32.gmra.mxu0 %vm66_vm3, %v101_v18  ;;  %v102_v21 = vld [vmem:[#allocation2 + $0x21] sm:$0xff]  ;;  %77 = vst.msk [vmem:[#allocation2 + $0x79] sm:$0xff] %vm66_vm3, %v60_v33 }
  0x24   :  { %v117_v20 = vld [vmem:[#allocation2 + $0x1a] sm:$0xff]  ;;  %4790 = vmatmul.msk.f32.gmra.mxu1 %vm66_vm3, %v85_v19  ;;  %v118_v23 = vld [vmem:[#allocation2 + $0x22] sm:$0xff]  ;;  %v103_v26 = vld [vmem:[#allocation2 + $0x31] sm:$0xff]  ;;  %78 = vst.msk [vmem:[#allocation2 + $0x81] sm:$0xff] %vm66_vm3, %v61_v34 }
  0x25   :  { %4808 = vmatmul.msk.f32.gmra.mxu2 %vm66_vm3, %v117_v20  ;;  %v86_v22 = vld [vmem:[#allocation2 + $0x20] sm:$0xff]  ;;  %v87_v27 = vld [vmem:[#allocation2 + $0x30] sm:$0xff]  ;;  %v88_v31 = vld [vmem:[#allocation2 + $0x38] sm:$0xff]  ;;  %79 = vst.msk [vmem:[#allocation2 + $0x91] sm:$0xff] %vm66_vm3, %v62_v42 }
  0x26   :  { %v119_v28 = vld [vmem:[#allocation2 + $0x32] sm:$0xff]  ;;  %v120_v32 = vld [vmem:[#allocation2 + $0x3a] sm:$0xff]  ;;  %v105_v36 = vld [vmem:[#allocation2 + $0x49] sm:$0xff]  ;;  %80 = vst.msk [vmem:[#allocation2 + $0x99] sm:$0xff] %vm66_vm3, %v63_v43 }
  0x27   :  { %v104_v30 = vld [vmem:[#allocation2 + $0x39] sm:$0xff]  ;;  %v89_v37 = vld [vmem:[#allocation2 + $0x48] sm:$0xff]  ;;  %v106_v39 = vld [vmem:[#allocation2 + $0x51] sm:$0xff]  ;;  %81 = vst.msk [vmem:[#allocation2 + $0xa9] sm:$0xff] %vm66_vm3, %v64_v50 }
  0x28   :  { %v121_v38 = vld [vmem:[#allocation2 + $0x4a] sm:$0xff]  ;;  %v122_v41 = vld [vmem:[#allocation2 + $0x52] sm:$0xff]  ;;  %v107_v44 = vld [vmem:[#allocation2 + $0x61] sm:$0xff]  ;;  %82 = vst.msk [vmem:[#allocation2 + $0xb1] sm:$0xff] %vm66_vm3, %v65_v51 }
  0x29   :  { %v90_v40 = vld [vmem:[#allocation2 + $0x50] sm:$0xff]  ;;  %v91_v45 = vld [vmem:[#allocation2 + $0x60] sm:$0xff]  ;;  %v92_v48 = vld [vmem:[#allocation2 + $0x68] sm:$0xff] }
  0x2a   :  { %v123_v46 = vld [vmem:[#allocation2 + $0x62] sm:$0xff]  ;;  %v124_v49 = vld [vmem:[#allocation2 + $0x6a] sm:$0xff]  ;;  %v109_v52 = vld [vmem:[#allocation2 + $0x79] sm:$0xff] }
  0x2b   :  { %4774 = vmatmul.msk.f32.gmra.mxu0 %vm66_vm3, %v102_v21  ;;  %v108_v47 = vld [vmem:[#allocation2 + $0x69] sm:$0xff]  ;;  %v93_v53 = vld [vmem:[#allocation2 + $0x78] sm:$0xff]  ;;  %v110_v55 = vld [vmem:[#allocation2 + $0x81] sm:$0xff] }
  0x2c   :  { %4791 = vmatmul.msk.f32.gmra.mxu1 %vm66_vm3, %v86_v22  ;;  %v125_v54 = vld [vmem:[#allocation2 + $0x7a] sm:$0xff]  ;;  %v126_v57 = vld [vmem:[#allocation2 + $0x82] sm:$0xff]  ;;  %v111_v58 = vld [vmem:[#allocation2 + $0x91] sm:$0xff] }
  0x2d   :  { %4809 = vmatmul.msk.f32.gmra.mxu2 %vm66_vm3, %v118_v23  ;;  %v94_v56 = vld [vmem:[#allocation2 + $0x80] sm:$0xff]  ;;  %v95_v59 = vld [vmem:[#allocation2 + $0x90] sm:$0xff]  ;;  %v96_v0 = vld [vmem:[#allocation2 + $0x98] sm:$0xff] }
  0x2e   :  { %v127_v60 = vld [vmem:[#allocation2 + $0x92] sm:$0xff]  ;;  %v128_v2 = vld [vmem:[#allocation2 + $0x9a] sm:$0xff]  ;;  %v113_v3 = vld [vmem:[#allocation2 + $0xa9] sm:$0xff] }
  0x2f   :  { %v112_v63 = vld [vmem:[#allocation2 + $0x99] sm:$0xff]  ;;  %v97_v4 = vld [vmem:[#allocation2 + $0xa8] sm:$0xff]  ;;  %v114_v6 = vld [vmem:[#allocation2 + $0xb1] sm:$0xff] }
  0x30   :  { %v129_v5 = vld [vmem:[#allocation2 + $0xaa] sm:$0xff]  ;;  %v130_v8 = vld [vmem:[#allocation2 + $0xb2] sm:$0xff] }
  0x31   :  { %v98_v7 = vld [vmem:[#allocation2 + $0xb0] sm:$0xff] }
  0x33   :  { %4775 = vmatmul.msk.f32.gmra.mxu0 %vm66_vm3, %v103_v26 }
  0x34   :  { %4792 = vmatmul.msk.f32.gmra.mxu1 %vm66_vm3, %v87_v27 }
  0x35   :  { %4810 = vmatmul.msk.f32.gmra.mxu2 %vm66_vm3, %v119_v28 }
  0x3b   :  { %4776 = vmatmul.msk.f32.gmra.mxu0 %vm66_vm3, %v104_v30 }
  0x3c   :  { %4793 = vmatmul.msk.f32.gmra.mxu1 %vm66_vm3, %v88_v31 }
  0x3d   :  { %4811 = vmatmul.msk.f32.gmra.mxu2 %vm66_vm3, %v120_v32 }
  0x43   :  { %4777 = vmatmul.msk.f32.gmra.mxu0 %vm66_vm3, %v105_v36 }
  0x44   :  { %4794 = vmatmul.msk.f32.gmra.mxu1 %vm66_vm3, %v89_v37 }
  0x45   :  { %4812 = vmatmul.msk.f32.gmra.mxu2 %vm66_vm3, %v121_v38 }
  0x4b   :  { %4778 = vmatmul.msk.f32.gmra.mxu0 %vm66_vm3, %v106_v39 }
  0x4c   :  { %4795 = vmatmul.msk.f32.gmra.mxu1 %vm66_vm3, %v90_v40 }
  0x4d   :  { %4813 = vmatmul.msk.f32.gmra.mxu2 %vm66_vm3, %v122_v41 }
  0x53   :  { %4779 = vmatmul.msk.f32.gmra.mxu0 %vm66_vm3, %v107_v44 }
  0x54   :  { %4796 = vmatmul.msk.f32.gmra.mxu1 %vm66_vm3, %v91_v45 }
  0x55   :  { %4814 = vmatmul.msk.f32.gmra.mxu2 %vm66_vm3, %v123_v46 }
  0x5b   :  { %4780 = vmatmul.msk.f32.gmra.mxu0 %vm66_vm3, %v108_v47 }
  0x5c   :  { %4797 = vmatmul.msk.f32.gmra.mxu1 %vm66_vm3, %v92_v48 }
  0x5d   :  { %4815 = vmatmul.msk.f32.gmra.mxu2 %vm66_vm3, %v124_v49 }
  0x63   :  { %4781 = vmatmul.msk.f32.gmra.mxu0 %vm66_vm3, %v109_v52 }
  0x64   :  { %4798 = vmatmul.msk.f32.gmra.mxu1 %vm66_vm3, %v93_v53 }
  0x65   :  { %4816 = vmatmul.msk.f32.gmra.mxu2 %vm66_vm3, %v125_v54 }
  0x6b   :  { %4782 = vmatmul.msk.f32.gmra.mxu0 %vm66_vm3, %v110_v55  ;;  %v4839_v55 = vld [vmem:[%s7432_s2 + $0x18] sm:$0xff] }
  0x6c   :  { %4799 = vmatmul.msk.f32.gmra.mxu1 %vm66_vm3, %v94_v56  ;;  %1053 = vmatpush.msra.mxu3 %v4839_v55 }
  0x6d   :  { %4817 = vmatmul.msk.f32.gmra.mxu2 %vm66_vm3, %v126_v57 }
  0x73   :  { %4783 = vmatmul.msk.f32.gmra.mxu0 %vm66_vm3, %v111_v58 }
  0x74   :  { %4800 = vmatmul.msk.f32.gmra.mxu1 %vm66_vm3, %v95_v59  ;;  %v4838_v59 = vld [vmem:[%s7432_s2 + $0x10] sm:$0xff]  ;;  %s5259_s2 = smov 16  }
  0x75   :  { %4818 = vmatmul.msk.f32.gmra.mxu2 %vm66_vm3, %v127_v60  ;;  %1054 = vmatpush.msra.mxu3 %v4838_v59 }
  0x7b   :  { %4784 = vmatmul.msk.f32.gmra.mxu0 %vm66_vm3, %v112_v63 }
  0x7c   :  { %4801 = vmatmul.msk.f32.gmra.mxu1 %vm66_vm3, %v96_v0 }
  0x7d   :  { %4819 = vmatmul.msk.f32.gmra.mxu2 %vm66_vm3, %v128_v2 }
  0x83   :  { %4785 = vmatmul.msk.f32.gmra.mxu0 %vm66_vm3, %v113_v3 }
  0x84   :  { %4802 = vmatmul.msk.f32.gmra.mxu1 %vm66_vm3, %v97_v4 }
  0x85   :  { %4820 = vmatmul.msk.f32.gmra.mxu2 %vm66_vm3, %v129_v5 }
  0x89   :  { %v203_v9 = vpop.f32.mrf.mxu0 }
  0x8a   :  { %v319_v10 = vpop.f32.mrf.mxu1 }
  0x8b   :  { %4786 = vmatmul.msk.f32.gmra.mxu0 %vm66_vm3, %v114_v6  ;;  %v320_v14 = vadd.f32 %v319_v10, %v203_v9 }
  0x8c   :  { %4803 = vmatmul.msk.f32.gmra.mxu1 %vm66_vm3, %v98_v7 }
  0x8d   :  { %4821 = vmatmul.msk.f32.gmra.mxu2 %vm66_vm3, %v130_v8 }
  0x91   :  { %v437_v11 = vpop.f32.mrf.mxu2  ;;  %v206_v12 = vpop.f32.mrf.mxu0 }
  0x92   :  { %v322_v13 = vpop.f32.mrf.mxu1  ;;  %v5480_v16 = vadd.f32 %v437_v11, %v320_v14 }
  0x93   :  { %v323_v15 = vadd.f32 %v322_v13, %v206_v12 }
  0x94   :  { %v501_v19 = vsel %vm24_vm1, %v5480_v16, inf  ;;  %v573_v20 = vsel %vm24_vm1, %v5480_v16, -inf }
  0x99   :  { %v440_v17 = vpop.f32.mrf.mxu2 }
  0x9a   :  { %v5482_v18 = vadd.f32 %v440_v17, %v323_v15 }
  0x9c   :  { %v502_v21 = vsel %vm24_vm1, %v5482_v18, inf  ;;  %v574_v22 = vsel %vm24_vm1, %v5482_v18, -inf }
  0x9d   :  { %v503_v23 = vmin.f32 %v501_v19, %v502_v21  ;;  %v575_v24 = vmax.f32 %v573_v20, %v574_v22 }
  0x9f   :  { %v504_v25 = vrot.slane %v503_v23, 4  ;;  %v576_v26 = vrot.slane %v575_v24, 4 }
  0xa0   :  { %v209_v29 = vpop.f32.mrf.mxu0 }
  0xa1   :  { %v505_v27 = vmin.f32 %v503_v23, %v504_v25  ;;  %v577_v28 = vmax.f32 %v575_v24, %v576_v26  ;;  %v325_v30 = vpop.f32.mrf.mxu1 }
  0xa2   :  { %v326_v40 = vadd.f32 %v325_v30, %v209_v29 }
  0xa3   :  { %v506_v31 = vrot.slane %v505_v27, 2  ;;  %v578_v32 = vrot.slane %v577_v28, 2 }
  0xa5   :  { %v507_v33 = vmin.f32 %v505_v27, %v506_v31  ;;  %v579_v34 = vmax.f32 %v577_v28, %v578_v32 }
  0xa7   :  { %v508_v35 = vrot.slane %v507_v33, 1  ;;  %v580_v36 = vrot.slane %v579_v34, 1 }
  0xa8   :  { %v443_v37 = vpop.f32.mrf.mxu2  ;;  %v212_v41 = vpop.f32.mrf.mxu0 }
  0xa9   :  { %v509_v38 = vmin.f32 %v507_v33, %v508_v35  ;;  %v581_v39 = vmax.f32 %v579_v34, %v580_v36  ;;  %v328_v42 = vpop.f32.mrf.mxu1  ;;  %v5492_v45 = vadd.f32 %v443_v37, %v326_v40 }
  0xaa   :  { %v329_v46 = vadd.f32 %v328_v42, %v212_v41 }
  0xab   :  { %v661_v43 = vsub.f32 %v581_v39, %v509_v38  ;;  %v510_v48 = vsel %vm24_vm1, %v5492_v45, inf  ;;  %v582_v49 = vsel %vm24_vm1, %v5492_v45, -inf  ;;  %v645_v12 = vsub.f32 %v5480_v16, %v509_v38 }
  0xac   :  { %v646_v17 = vsub.f32 %v5482_v18, %v509_v38 }
  0xad   :  { %v669_v44 = vadd.f32 1e-12, %v661_v43 }
  0xaf   :  { %5138 = vrcp.f32 %v669_v44  ;;  %v686_v4 = vand.u32 2147483647, %v669_v44  ;;  %v688_v5 = vand.u32 2147483648, %v669_v44  ;;  %vm682_vm5 = vweird.f32 %v669_v44 }
  0xb0   :  { %v446_v47 = vpop.f32.mrf.mxu2  ;;  %v215_v51 = vpop.f32.mrf.mxu0 }
  0xb1   :  { %v5498_v50 = vadd.f32 %v446_v47, %v329_v46  ;;  %v331_v52 = vpop.f32.mrf.mxu1  ;;  %v689_v19 = vor.u32 1.1754944e-38, %v688_v5  ;;  %vm687_vm7 = vcmp.eq.f32.partialorder %v686_v4, 8.507059e+37 }
  0xb2   :  { %v332_v6 = vadd.f32 %v331_v52, %v215_v51 }
  0xb3   :  { %v511_v53 = vsel %vm24_vm1, %v5498_v50, inf  ;;  %v583_v54 = vsel %vm24_vm1, %v5498_v50, -inf }
  0xb4   :  { %v512_v56 = vmin.f32 %v510_v48, %v511_v53  ;;  %v584_v57 = vmax.f32 %v582_v49, %v583_v54 }
  0xb5   :  { %v5139_v58 = vpop.eup %5138 }
  0xb6   :  { %v678_v60 = vmul.f32 %v5139_v58, %v669_v44  ;;  %v513_v61 = vrot.slane %v512_v56, 4  ;;  %v585_v62 = vrot.slane %v584_v57, 4  ;;  %vm683_vm4 = vweird.f32 %v5139_v58 }
  0xb7   :  { %vm684_vm6 = vmor %vm682_vm5, %vm683_vm4 }
  0xb8   :  { %v679_v63 = vsub.f32 1.0, %v678_v60  ;;  %v514_v0 = vmin.f32 %v512_v56, %v513_v61  ;;  %v586_v2 = vmax.f32 %v584_v57, %v585_v62  ;;  %v449_v3 = vpop.f32.mrf.mxu2  ;;  %v218_v7 = vpop.f32.mrf.mxu0 }
  0xb9   :  { %v334_v8 = vpop.f32.mrf.mxu1  ;;  %v5512_v20 = vadd.f32 %v449_v3, %v332_v6 }
  0xba   :  { %v680_v9 = vmul.f32 %v5139_v58, %v679_v63  ;;  %v515_v10 = vrot.slane %v514_v0, 2  ;;  %v587_v11 = vrot.slane %v586_v2, 2  ;;  %v335_v21 = vadd.f32 %v334_v8, %v218_v7 }
  0xbb   :  { %v519_v30 = vsel %vm24_vm1, %v5512_v20, inf  ;;  %v591_v18 = vsel %vm24_vm1, %v5512_v20, -inf }
  0xbc   :  { %v681_v13 = vadd.f32 %v5139_v58, %v680_v9  ;;  %v516_v14 = vmin.f32 %v514_v0, %v515_v10  ;;  %v588_v15 = vmax.f32 %v586_v2, %v587_v11 }
  0xbe   :  { %v685_v22 = vsel %vm684_vm6, %v5139_v58, %v681_v13  ;;  %v517_v23 = vrot.slane %v516_v14, 1  ;;  %v589_v24 = vrot.slane %v588_v15, 1 }
  0xbf   :  { %v690_v25 = vsel %vm687_vm7, %v689_v19, %v685_v22 }
  0xc0   :  { %v789_v26 = vmul.f32 %v690_v25, %v645_v12  ;;  %v790_v27 = vmul.f32 %v690_v25, %v646_v17  ;;  %v5514_v28 = vmin.f32 %v516_v14, %v517_v23  ;;  %v590_v16 = vmax.f32 %v588_v15, %v589_v24  ;;  %v452_v29 = vpop.f32.mrf.mxu2  ;;  %v221_v32 = vpop.f32.mrf.mxu0 }
  0xc1   :  { %v5520_v31 = vadd.f32 %v452_v29, %v335_v21  ;;  %v337_v33 = vpop.f32.mrf.mxu1 }
  0xc2   :  { %v5522_v34 = vmul.f32 0.5, %v789_v26  ;;  %v5524_v35 = vmul.f32 0.5, %v790_v27  ;;  %v662_v36 = vsub.f32 %v590_v16, %v5514_v28  ;;  %v338_v51 = vadd.f32 %v337_v33, %v221_v32 }
  0xc3   :  { %v520_v37 = vsel %vm24_vm1, %v5520_v31, inf  ;;  %v592_v38 = vsel %vm24_vm1, %v5520_v31, -inf  ;;  %v647_v15 = vsub.f32 %v5492_v45, %v5514_v28  ;;  %v648_v17 = vsub.f32 %v5498_v50, %v5514_v28 }
  0xc4   :  { %vm813_vm8 = vcmp.ge.f32.partialorder %v5522_v34, 0.5  ;;  %vm814_vm9 = vcmp.ge.f32.partialorder %v5524_v35, 0.5  ;;  %v521_v39 = vmin.f32 %v519_v30, %v520_v37  ;;  %v593_v40 = vmax.f32 %v591_v18, %v592_v38 }
  0xc5   :  { %v5534_v41 = vsel %vm813_vm8, 1.0, %v7437_v1  ;;  %v5537_v42 = vsel %vm814_vm9, 1.0, %v7437_v1  ;;  %v670_v43 = vadd.f32 1e-12, %v662_v36 }
  0xc6   :  { %921 = vst.msk [vmem:[#allocation2 + $0x1] sm:$0xff] %vm24_vm1, %v5534_v41  ;;  %v522_v44 = vrot.slane %v521_v39, 4  ;;  %v594_v46 = vrot.slane %v593_v40, 4 }
  0xc7   :  { %922 = vst.msk [vmem:[#allocation2 + $0x9] sm:$0xff] %vm24_vm1, %v5537_v42  ;;  %5140 = vrcp.f32 %v670_v43  ;;  %vm696_vm11 = vweird.f32 %v670_v43  ;;  %v700_v4 = vand.u32 2147483647, %v670_v43  ;;  %v702_v5 = vand.u32 2147483648, %v670_v43 }
  0xc8   :  { %v523_v47 = vmin.f32 %v521_v39, %v522_v44  ;;  %v595_v48 = vmax.f32 %v593_v40, %v594_v46  ;;  %v455_v49 = vpop.f32.mrf.mxu2  ;;  %v224_v52 = vpop.f32.mrf.mxu0 }
  0xc9   :  { %v340_v53 = vpop.f32.mrf.mxu1  ;;  %v5543_v59 = vadd.f32 %v455_v49, %v338_v51  ;;  %vm701_vm14 = vcmp.eq.f32.partialorder %v700_v4, 8.507059e+37  ;;  %v703_v23 = vor.u32 1.1754944e-38, %v702_v5 }
  0xca   :  { %v524_v54 = vrot.slane %v523_v47, 2  ;;  %v596_v55 = vrot.slane %v595_v48, 2  ;;  %v341_v60 = vadd.f32 %v340_v53, %v224_v52 }
  0xcb   :  { %v528_v10 = vsel %vm24_vm1, %v5543_v59, inf  ;;  %v600_v11 = vsel %vm24_vm1, %v5543_v59, -inf }
  0xcc   :  { %v525_v56 = vmin.f32 %v523_v47, %v524_v54  ;;  %v597_v57 = vmax.f32 %v595_v48, %v596_v55 }
  0xcd   :  { %v5141_v58 = vpop.eup %5140  ;;  %v953_v61 = vld [vmem:[#allocation2 + $0x1] sm:$0xff] }
  0xce   :  { %v937_v62 = vld [vmem:[#allocation2] sm:$0xff]  ;;  %v692_v63 = vmul.f32 %v5141_v58, %v670_v43  ;;  %v526_v0 = vrot.slane %v525_v56, 1  ;;  %v598_v2 = vrot.slane %v597_v57, 1  ;;  %4840 = vmatmul.msk.f32.vlgmr.msra.gmra.mxu3 %vm990_vm10, %v953_v61  ;;  %vm697_vm12 = vweird.f32 %v5141_v58  ;;  %v954_v28 = vld [vmem:[#allocation2 + $0x9] sm:$0xff] }
  0xcf   :  { %4856 = vmatmul.msk.f32.vlgmr.msrb.gmra.mxu0 %vm990_vm10, %v937_v62  ;;  %v969_v3 = vld [vmem:[#allocation2 + $0x2] sm:$0xff]  ;;  %vm5562_vm13 = vmor %vm696_vm11, %vm697_vm12  ;;  %v970_v30 = vld [vmem:[#allocation2 + $0xa] sm:$0xff] }
  0xd0   :  { %4874 = vmatmul.msk.f32.vlgmr.msrb.gmra.mxu1 %vm990_vm10, %v969_v3  ;;  %v693_v6 = vsub.f32 1.0, %v692_v63  ;;  %v5548_v7 = vmin.f32 %v525_v56, %v526_v0  ;;  %v599_v8 = vmax.f32 %v597_v57, %v598_v2  ;;  %v458_v9 = vpop.f32.mrf.mxu2  ;;  %v227_v13 = vpop.f32.mrf.mxu0  ;;  %v938_v16 = vld [vmem:[#allocation2 + $0x8] sm:$0xff]  ;;  %v826_v2 = vsub.f32 1.0, %v5537_v42 }
  0xd1   :  { %v5554_v12 = vadd.f32 %v458_v9, %v341_v60  ;;  %v343_v14 = vpop.f32.mrf.mxu1 }
  0xd2   :  { %v694_v19 = vmul.f32 %v5141_v58, %v693_v6  ;;  %v663_v21 = vsub.f32 %v599_v8, %v5548_v7  ;;  %v344_v38 = vadd.f32 %v343_v14, %v227_v13  ;;  %v649_v3 = vsub.f32 %v5512_v20, %v5548_v7 }
  0xd3   :  { %v529_v24 = vsel %vm24_vm1, %v5554_v12, inf  ;;  %v601_v25 = vsel %vm24_vm1, %v5554_v12, -inf  ;;  %v650_v6 = vsub.f32 %v5520_v31, %v5548_v7 }
  0xd4   :  { %v695_v45 = vadd.f32 %v5141_v58, %v694_v19  ;;  %v671_v26 = vadd.f32 1e-12, %v663_v21  ;;  %v530_v27 = vmin.f32 %v528_v10, %v529_v24  ;;  %v602_v50 = vmax.f32 %v600_v11, %v601_v25 }
  0xd6   :  { %v699_v29 = vsel %vm5562_vm13, %v5141_v58, %v695_v45  ;;  %5142 = vrcp.f32 %v671_v26  ;;  %4841 = vmatmul.msk.f32.gmra.mxu3 %vm990_vm10, %v954_v28  ;;  %v531_v32 = vrot.slane %v530_v27, 4  ;;  %v603_v33 = vrot.slane %v602_v50, 4 }
  0xd7   :  { %4857 = vmatmul.msk.f32.gmra.mxu0 %vm990_vm10, %v938_v16  ;;  %v704_v18 = vsel %vm701_vm14, %v703_v23, %v699_v29  ;;  %v825_v58 = vsub.f32 1.0, %v5534_v41  ;;  %v716_v60 = vand.u32 2147483648, %v671_v26  ;;  %vm710_vm2 = vweird.f32 %v671_v26 }
  0xd8   :  { %4875 = vmatmul.msk.f32.gmra.mxu1 %vm990_vm10, %v970_v30  ;;  %v791_v36 = vmul.f32 %v704_v18, %v647_v15  ;;  %v792_v37 = vmul.f32 %v704_v18, %v648_v17  ;;  %v461_v39 = vpop.f32.mrf.mxu2  ;;  %v532_v40 = vmin.f32 %v530_v27, %v531_v32  ;;  %v604_v43 = vmax.f32 %v602_v50, %v603_v33  ;;  %v230_v44 = vpop.f32.mrf.mxu0 }
  0xd9   :  { %v346_v46 = vpop.f32.mrf.mxu1  ;;  %v5581_v53 = vadd.f32 %v461_v39, %v344_v38  ;;  %v714_v0 = vand.u32 2147483647, %v671_v26  ;;  %v717_v42 = vor.u32 1.1754944e-38, %v716_v60  ;;  %v830_v29 = vmul.f32 %v826_v2, %v5524_v35 }
  0xda   :  { %v5575_v47 = vmul.f32 0.5, %v791_v36  ;;  %v5577_v48 = vmul.f32 0.5, %v792_v37  ;;  %v533_v49 = vrot.slane %v532_v40, 2  ;;  %v605_v51 = vrot.slane %v604_v43, 2 }
  0xdb   :  { %v347_v57 = vadd.f32 %v346_v46, %v230_v44  ;;  %v537_v9 = vsel %vm24_vm1, %v5581_v53, inf  ;;  %v609_v17 = vsel %vm24_vm1, %v5581_v53, -inf  ;;  %vm715_vm5 = vcmp.eq.f32.partialorder %v714_v0, 8.507059e+37 }
  0xdc   :  { %v5143_v52 = vpop.eup %5142  ;;  %vm815_vm15 = vcmp.ge.f32.partialorder %v5575_v47, 0.5  ;;  %vm816_vm0 = vcmp.ge.f32.partialorder %v5577_v48, 0.5  ;;  %v534_v61 = vmin.f32 %v532_v40, %v533_v49  ;;  %v606_v62 = vmax.f32 %v604_v43, %v605_v51 }
  0xdd   :  { %v5584_v54 = vsel %vm815_vm15, 1.0, %v7437_v1  ;;  %v5587_v55 = vsel %vm816_vm0, 1.0, %v7437_v1  ;;  %v706_v56 = vmul.f32 %v5143_v52, %v671_v26  ;;  %vm711_vm3 = vweird.f32 %v5143_v52 }
  0xde   :  { %923 = vst.msk [vmem:[#allocation2 + $0x19] sm:$0xff] %vm24_vm1, %v5584_v54  ;;  %v535_v4 = vrot.slane %v534_v61, 1  ;;  %v607_v41 = vrot.slane %v606_v62, 1  ;;  %vm5603_vm4 = vmor %vm710_vm2, %vm711_vm3  ;;  %v829_v26 = vmul.f32 %v825_v58, %v5522_v34 }
  0xdf   :  { %924 = vst.msk [vmem:[#allocation2 + $0x21] sm:$0xff] %vm24_vm1, %v5587_v55  ;;  %v707_v63 = vsub.f32 1.0, %v706_v56 }
  0xe0   :  { %v464_v5 = vpop.f32.mrf.mxu2  ;;  %v233_v11 = vpop.f32.mrf.mxu0  ;;  %v5607_v20 = vmin.f32 %v534_v61, %v535_v4  ;;  %v608_v15 = vmax.f32 %v606_v62, %v607_v41 }
  0xe1   :  { %v708_v8 = vmul.f32 %v5143_v52, %v707_v63  ;;  %v5601_v10 = vadd.f32 %v464_v5, %v347_v57  ;;  %v349_v13 = vpop.f32.mrf.mxu1 }
  0xe2   :  { %v664_v21 = vsub.f32 %v608_v15, %v5607_v20  ;;  %v350_v33 = vadd.f32 %v349_v13, %v233_v11 }
  0xe3   :  { %v709_v31 = vadd.f32 %v5143_v52, %v708_v8  ;;  %v538_v7 = vsel %vm24_vm1, %v5601_v10, inf  ;;  %v610_v19 = vsel %vm24_vm1, %v5601_v10, -inf }
  0xe4   :  { %v539_v22 = vmin.f32 %v537_v9, %v538_v7  ;;  %v611_v24 = vmax.f32 %v609_v17, %v610_v19  ;;  %v5619_v50 = vadd.f32 1e-12, %v664_v21  ;;  %v827_v17 = vsub.f32 1.0, %v5584_v54 }
  0xe5   :  { %v713_v23 = vsel %vm5603_vm4, %v5143_v52, %v709_v31  ;;  %v955_v25 = vld [vmem:[#allocation2 + $0x19] sm:$0xff]  ;;  %v828_v19 = vsub.f32 1.0, %v5587_v55  ;;  %v652_v55 = vsub.f32 %v5554_v12, %v5607_v20 }
  0xe6   :  { %v939_v45 = vld [vmem:[#allocation2 + $0x18] sm:$0xff]  ;;  %v718_v27 = vsel %vm715_vm5, %v717_v42, %v713_v23  ;;  %v540_v28 = vrot.slane %v539_v22, 4  ;;  %4842 = vmatmul.msk.f32.gmra.mxu3 %vm990_vm10, %v955_v25  ;;  %v612_v32 = vrot.slane %v611_v24, 4  ;;  %5144 = vrcp.f32 %v5619_v50  ;;  %v956_v35 = vld [vmem:[#allocation2 + $0x21] sm:$0xff] }
  0xe7   :  { %4858 = vmatmul.msk.f32.gmra.mxu0 %vm990_vm10, %v939_v45  ;;  %v971_v16 = vld [vmem:[#allocation2 + $0x1a] sm:$0xff]  ;;  %v793_v30 = vmul.f32 %v718_v27, %v649_v3  ;;  %v794_v18 = vmul.f32 %v718_v27, %v650_v6  ;;  %v972_v57 = vld [vmem:[#allocation2 + $0x22] sm:$0xff]  ;;  %vm724_vm6 = vweird.f32 %v5619_v50  ;;  %v728_v2 = vand.u32 2147483647, %v5619_v50 }
  0xe8   :  { %4876 = vmatmul.msk.f32.gmra.mxu1 %vm990_vm10, %v971_v16  ;;  %v467_v34 = vpop.f32.mrf.mxu2  ;;  %v541_v38 = vmin.f32 %v539_v22, %v540_v28  ;;  %v613_v39 = vmax.f32 %v611_v24, %v612_v32  ;;  %v236_v40 = vpop.f32.mrf.mxu0  ;;  %v940_v63 = vld [vmem:[#allocation2 + $0x20] sm:$0xff]  ;;  %v730_v4 = vand.u32 2147483648, %v5619_v50  ;;  %v651_v24 = vsub.f32 %v5543_v59, %v5607_v20 }
  0xe9   :  { %v833_v36 = vsub.f32 %v793_v30, %v829_v26  ;;  %v834_v37 = vsub.f32 %v794_v18, %v830_v29  ;;  %v352_v43 = vpop.f32.mrf.mxu1  ;;  %v5626_v52 = vadd.f32 %v467_v34, %v350_v33  ;;  %vm729_vm12 = vcmp.eq.f32.partialorder %v728_v2, 8.507059e+37 }
  0xea   :  { %v542_v49 = vrot.slane %v541_v38, 2  ;;  %v614_v51 = vrot.slane %v613_v39, 2  ;;  %v353_v56 = vadd.f32 %v352_v43, %v236_v40  ;;  %v731_v54 = vor.u32 1.1754944e-38, %v730_v4 }
  0xeb   :  { %v837_v44 = vmul.f32 0.5, %v833_v36  ;;  %v838_v46 = vmul.f32 0.5, %v834_v37  ;;  %v546_v13 = vsel %vm24_vm1, %v5626_v52, inf  ;;  %v618_v22 = vsel %vm24_vm1, %v5626_v52, -inf }
  0xec   :  { %v543_v61 = vmin.f32 %v541_v38, %v542_v49  ;;  %v615_v62 = vmax.f32 %v613_v39, %v614_v51  ;;  %v5145_v0 = vpop.eup %5144  ;;  %v832_v30 = vmul.f32 %v828_v19, %v5577_v48 }
  0xed   :  { %v5628_v58 = vadd.f32 %v837_v44, %v829_v26  ;;  %v5630_v60 = vadd.f32 %v838_v46, %v830_v29  ;;  %v720_v3 = vmul.f32 %v5145_v0, %v5619_v50  ;;  %vm725_vm9 = vweird.f32 %v5145_v0 }
  0xee   :  { %4843 = vmatmul.msk.f32.gmra.mxu3 %vm990_vm10, %v956_v35  ;;  %v544_v41 = vrot.slane %v543_v61, 1  ;;  %v616_v5 = vrot.slane %v615_v62, 1  ;;  %vm726_vm11 = vmor %vm724_vm6, %vm725_vm9  ;;  %v831_v29 = vmul.f32 %v827_v17, %v5575_v47 }
  0xef   :  { %4859 = vmatmul.msk.f32.gmra.mxu0 %vm990_vm10, %v940_v63  ;;  %vm845_vm7 = vcmp.ge.f32.partialorder %v5628_v58, 0.5  ;;  %vm846_vm8 = vcmp.ge.f32.partialorder %v5630_v60, 0.5  ;;  %v721_v11 = vsub.f32 1.0, %v720_v3 }
  0xf0   :  { %4877 = vmatmul.msk.f32.gmra.mxu1 %vm990_vm10, %v972_v57  ;;  %v5642_v6 = vsel %vm845_vm7, 1.0, %v7437_v1  ;;  %v5645_v8 = vsel %vm846_vm8, 1.0, %v7437_v1  ;;  %v470_v9 = vpop.f32.mrf.mxu2  ;;  %v239_v42 = vpop.f32.mrf.mxu0  ;;  %v5654_v31 = vmin.f32 %v543_v61, %v544_v41  ;;  %v617_v7 = vmax.f32 %v615_v62, %v616_v5 }
  0xf1   :  { %925 = vst.msk [vmem:[#allocation2 + $0x31] sm:$0xff] %vm24_vm1, %v5642_v6  ;;  %v5651_v14 = vadd.f32 %v470_v9, %v353_v56  ;;  %v355_v15 = vpop.f32.mrf.mxu1  ;;  %v722_v21 = vmul.f32 %v5145_v0, %v721_v11  ;;  %v857_v63 = vsub.f32 1.0, %v5642_v6 }
  0xf2   :  { %926 = vst.msk [vmem:[#allocation2 + $0x39] sm:$0xff] %vm24_vm1, %v5645_v8  ;;  %v665_v25 = vsub.f32 %v617_v7, %v5654_v31  ;;  %v356_v32 = vadd.f32 %v355_v15, %v239_v42 }
  0xf3   :  { %v547_v23 = vsel %vm24_vm1, %v5651_v14, inf  ;;  %v723_v26 = vadd.f32 %v5145_v0, %v722_v21  ;;  %v619_v27 = vsel %vm24_vm1, %v5651_v14, -inf }
  0xf4   :  { %v548_v45 = vmin.f32 %v546_v13, %v547_v23  ;;  %v5673_v28 = vadd.f32 1e-12, %v665_v25  ;;  %v620_v59 = vmax.f32 %v618_v22, %v619_v27  ;;  %v653_v27 = vsub.f32 %v5581_v53, %v5654_v31 }
  0xf5   :  { %v727_v50 = vsel %vm726_vm11, %v5145_v0, %v723_v26 }
  0xf6   :  { %v549_v16 = vrot.slane %v548_v45, 4  ;;  %v732_v18 = vsel %vm729_vm12, %v731_v54, %v727_v50  ;;  %5146 = vrcp.f32 %v5673_v28  ;;  %v621_v40 = vrot.slane %v620_v59, 4 }
  0xf7   :  { %v795_v34 = vmul.f32 %v732_v18, %v651_v24  ;;  %v796_v36 = vmul.f32 %v732_v18, %v652_v55  ;;  %vm738_vm13 = vweird.f32 %v5673_v28  ;;  %v742_v62 = vand.u32 2147483647, %v5673_v28 }
  0xf8   :  { %v473_v33 = vpop.f32.mrf.mxu2  ;;  %v957_v12 = vld [vmem:[#allocation2 + $0x31] sm:$0xff]  ;;  %v550_v37 = vmin.f32 %v548_v45, %v549_v16  ;;  %v242_v39 = vpop.f32.mrf.mxu0  ;;  %v622_v46 = vmax.f32 %v620_v59, %v621_v40  ;;  %v744_v41 = vand.u32 2147483648, %v5673_v28  ;;  %v858_v45 = vsub.f32 1.0, %v5645_v8 }
  0xf9   :  { %v941_v20 = vld [vmem:[#allocation2 + $0x30] sm:$0xff]  ;;  %4844 = vmatmul.msk.f32.gmra.mxu3 %vm990_vm10, %v957_v12  ;;  %v358_v47 = vpop.f32.mrf.mxu1  ;;  %v835_v48 = vsub.f32 %v795_v34, %v831_v29  ;;  %v836_v43 = vsub.f32 %v796_v36, %v832_v30  ;;  %v5681_v49 = vadd.f32 %v473_v33, %v356_v32  ;;  %v958_v42 = vld [vmem:[#allocation2 + $0x39] sm:$0xff]  ;;  %vm743_vm3 = vcmp.eq.f32.partialorder %v742_v62, 8.507059e+37 }
  0xfa   :  { %4860 = vmatmul.msk.f32.gmra.mxu0 %vm990_vm10, %v941_v20  ;;  %v973_v38 = vld [vmem:[#allocation2 + $0x32] sm:$0xff]  ;;  %v551_v44 = vrot.slane %v550_v37, 2  ;;  %v359_v57 = vadd.f32 %v358_v47, %v242_v39  ;;  %v623_v0 = vrot.slane %v622_v46, 2  ;;  %v974_v7 = vld [vmem:[#allocation2 + $0x3a] sm:$0xff]  ;;  %v745_v16 = vor.u32 1.1754944e-38, %v744_v41 }
  0xfb   :  { %4878 = vmatmul.msk.f32.gmra.mxu1 %vm990_vm10, %v973_v38  ;;  %v839_v51 = vmul.f32 0.5, %v835_v48  ;;  %v840_v35 = vmul.f32 0.5, %v836_v43  ;;  %v555_v11 = vsel %vm24_vm1, %v5681_v49, inf  ;;  %v942_v15 = vld [vmem:[#allocation2 + $0x38] sm:$0xff]  ;;  %v627_v55 = vsel %vm24_vm1, %v5681_v49, -inf }
  0xfc   :  { %v552_v56 = vmin.f32 %v550_v37, %v551_v44  ;;  %v5147_v61 = vpop.eup %5146  ;;  %v624_v9 = vmax.f32 %v622_v46, %v623_v0 }
  0xfd   :  { %v5686_v2 = vadd.f32 %v839_v51, %v831_v29  ;;  %v5688_v3 = vadd.f32 %v840_v35, %v832_v30  ;;  %v734_v4 = vmul.f32 %v5147_v61, %v5673_v28  ;;  %vm739_vm14 = vweird.f32 %v5147_v61 }
  0xfe   :  { %v553_v5 = vrot.slane %v552_v56, 1  ;;  %v625_v23 = vrot.slane %v624_v9, 1  ;;  %vm740_vm2 = vmor %vm738_vm13, %vm739_vm14  ;;  %v654_v29 = vsub.f32 %v5601_v10, %v5654_v31  ;;  %v861_v10 = vmul.f32 %v857_v63, %v5628_v58 }
  0xff   :  { %vm847_vm15 = vcmp.ge.f32.partialorder %v5686_v2, 0.5  ;;  %vm848_vm0 = vcmp.ge.f32.partialorder %v5688_v3, 0.5  ;;  %v735_v6 = vsub.f32 1.0, %v734_v4  ;;  %v862_v31 = vmul.f32 %v858_v45, %v5630_v60 }
 0x100   :  { %v476_v13 = vpop.f32.mrf.mxu2  ;;  %v245_v19 = vpop.f32.mrf.mxu0  ;;  %v5700_v22 = vmin.f32 %v552_v56, %v553_v5  ;;  %v5703_v24 = vsel %vm847_vm15, 1.0, %v7437_v1  ;;  %v5706_v54 = vsel %vm848_vm0, 1.0, %v7437_v1  ;;  %v626_v59 = vmax.f32 %v624_v9, %v625_v23 }
 0x101   :  { %v5696_v17 = vadd.f32 %v476_v13, %v359_v57  ;;  %4845 = vmatmul.msk.f32.gmra.mxu3 %vm990_vm10, %v958_v42  ;;  %v361_v21 = vpop.f32.mrf.mxu1  ;;  %v736_v25 = vmul.f32 %v5147_v61, %v735_v6  ;;  %927 = vst.msk [vmem:[#allocation2 + $0x49] sm:$0xff] %vm24_vm1, %v5703_v24 }
 0x102   :  { %4861 = vmatmul.msk.f32.gmra.mxu0 %vm990_vm10, %v942_v15  ;;  %928 = vst.msk [vmem:[#allocation2 + $0x51] sm:$0xff] %vm24_vm1, %v5706_v54  ;;  %v666_v53 = vsub.f32 %v626_v59, %v5700_v22  ;;  %v362_v39 = vadd.f32 %v361_v21, %v245_v19 }
 0x103   :  { %4879 = vmatmul.msk.f32.gmra.mxu1 %vm990_vm10, %v974_v7  ;;  %v556_v26 = vsel %vm24_vm1, %v5696_v17, inf  ;;  %v737_v50 = vadd.f32 %v5147_v61, %v736_v25  ;;  %v628_v30 = vsel %vm24_vm1, %v5696_v17, -inf }
 0x104   :  { %v557_v8 = vmin.f32 %v555_v11, %v556_v26  ;;  %v629_v32 = vmax.f32 %v627_v55, %v628_v30  ;;  %v5728_v12 = vadd.f32 1e-12, %v666_v53  ;;  %v860_v30 = vsub.f32 1.0, %v5706_v54 }
 0x105   :  { %v741_v28 = vsel %vm740_vm2, %v5147_v61, %v737_v50 }
 0x106   :  { %v558_v18 = vrot.slane %v557_v8, 4  ;;  %v746_v33 = vsel %vm743_vm3, %v745_v16, %v741_v28  ;;  %v630_v34 = vrot.slane %v629_v32, 4  ;;  %5148 = vrcp.f32 %v5728_v12 }
 0x107   :  { %v797_v37 = vmul.f32 %v746_v33, %v653_v27  ;;  %v798_v38 = vmul.f32 %v746_v33, %v654_v29  ;;  %vm752_vm4 = vweird.f32 %v5728_v12  ;;  %v756_v11 = vand.u32 2147483647, %v5728_v12 }
 0x108   :  { %v559_v20 = vmin.f32 %v557_v8, %v558_v18  ;;  %v479_v36 = vpop.f32.mrf.mxu2  ;;  %v959_v47 = vld [vmem:[#allocation2 + $0x49] sm:$0xff]  ;;  %v631_v46 = vmax.f32 %v629_v32, %v630_v34  ;;  %v248_v35 = vpop.f32.mrf.mxu0  ;;  %v758_v15 = vand.u32 2147483648, %v5728_v12  ;;  %v859_v16 = vsub.f32 1.0, %v5703_v24 }
 0x109   :  { %v943_v40 = vld [vmem:[#allocation2 + $0x48] sm:$0xff]  ;;  %v865_v48 = vsub.f32 %v797_v37, %v861_v10  ;;  %v866_v43 = vsub.f32 %v798_v38, %v862_v31  ;;  %4846 = vmatmul.msk.f32.gmra.mxu3 %vm990_vm10, %v959_v47  ;;  %v364_v56 = vpop.f32.mrf.mxu1  ;;  %v5736_v62 = vadd.f32 %v479_v36, %v362_v39  ;;  %v960_v23 = vld [vmem:[#allocation2 + $0x51] sm:$0xff]  ;;  %v655_v29 = vsub.f32 %v5626_v52, %v5700_v22 }
 0x10a   :  { %v560_v44 = vrot.slane %v559_v20, 2  ;;  %4862 = vmatmul.msk.f32.gmra.mxu0 %vm990_vm10, %v943_v40  ;;  %v975_v51 = vld [vmem:[#allocation2 + $0x4a] sm:$0xff]  ;;  %v632_v61 = vrot.slane %v631_v46, 2  ;;  %v365_v63 = vadd.f32 %v364_v56, %v248_v35  ;;  %v976_v27 = vld [vmem:[#allocation2 + $0x52] sm:$0xff]  ;;  %v759_v24 = vor.u32 1.1754944e-38, %v758_v15 }
 0x10b   :  { %4880 = vmatmul.msk.f32.gmra.mxu1 %vm990_vm10, %v975_v51  ;;  %v869_v58 = vmul.f32 0.5, %v865_v48  ;;  %v870_v60 = vmul.f32 0.5, %v866_v43  ;;  %v944_v25 = vld [vmem:[#allocation2 + $0x50] sm:$0xff]  ;;  %v564_v55 = vsel %vm24_vm1, %v5736_v62, inf  ;;  %v636_v8 = vsel %vm24_vm1, %v5736_v62, -inf }
 0x10c   :  { %v561_v57 = vmin.f32 %v559_v20, %v560_v44  ;;  %v633_v5 = vmax.f32 %v631_v46, %v632_v61  ;;  %v5149_v9 = vpop.eup %5148  ;;  %v656_v52 = vsub.f32 %v5651_v14, %v5700_v22  ;;  %vm757_vm9 = vcmp.eq.f32.partialorder %v756_v11, 8.507059e+37 }
 0x10d   :  { %v5738_v0 = vadd.f32 %v869_v58, %v861_v10  ;;  %v5740_v4 = vadd.f32 %v870_v60, %v862_v31  ;;  %v748_v42 = vmul.f32 %v5149_v9, %v5728_v12  ;;  %vm753_vm7 = vweird.f32 %v5149_v9 }
 0x10e   :  { %v562_v41 = vrot.slane %v561_v57, 1  ;;  %v634_v7 = vrot.slane %v633_v5, 1  ;;  %vm754_vm8 = vmor %vm752_vm4, %vm753_vm7  ;;  %v863_v12 = vmul.f32 %v859_v16, %v5686_v2  ;;  %v864_v10 = vmul.f32 %v860_v30, %v5688_v3 }
 0x10f   :  { %vm877_vm5 = vcmp.ge.f32.partialorder %v5738_v0, 0.5  ;;  %vm878_vm6 = vcmp.ge.f32.partialorder %v5740_v4, 0.5  ;;  %v749_v45 = vsub.f32 1.0, %v748_v42 }
 0x110   :  { %v482_v13 = vpop.f32.mrf.mxu2  ;;  %v5748_v6 = vmin.f32 %v561_v57, %v562_v41  ;;  %v5751_v19 = vsel %vm877_vm5, 1.0, %v7437_v1  ;;  %v5754_v21 = vsel %vm878_vm6, 1.0, %v7437_v1  ;;  %v635_v59 = vmax.f32 %v633_v5, %v634_v7 }
 0x111   :  { %929 = vst.msk [vmem:[#allocation2 + $0x61] sm:$0xff] %vm24_vm1, %v5751_v19  ;;  %v5760_v26 = vadd.f32 %v482_v13, %v365_v63  ;;  %4847 = vmatmul.msk.f32.gmra.mxu3 %vm990_vm10, %v960_v23  ;;  %v750_v50 = vmul.f32 %v5149_v9, %v749_v45  ;;  %v889_v16 = vsub.f32 1.0, %v5751_v19 }
 0x112   :  { %4863 = vmatmul.msk.f32.gmra.mxu0 %vm990_vm10, %v944_v25  ;;  %930 = vst.msk [vmem:[#allocation2 + $0x69] sm:$0xff] %vm24_vm1, %v5754_v21  ;;  %v667_v18 = vsub.f32 %v635_v59, %v5748_v6  ;;  %v890_v59 = vsub.f32 1.0, %v5754_v21 }
 0x113   :  { %4881 = vmatmul.msk.f32.gmra.mxu1 %vm990_vm10, %v976_v27  ;;  %v565_v53 = vsel %vm24_vm1, %v5760_v26, inf  ;;  %v637_v28 = vsel %vm24_vm1, %v5760_v26, -inf  ;;  %v751_v33 = vadd.f32 %v5149_v9, %v750_v50  ;;  %v658_v50 = vsub.f32 %v5696_v17, %v5748_v6 }
 0x114   :  { %v566_v32 = vmin.f32 %v564_v55, %v565_v53  ;;  %v638_v54 = vmax.f32 %v636_v8, %v637_v28  ;;  %v675_v20 = vadd.f32 1e-12, %v667_v18  ;;  %v893_v21 = vmul.f32 %v889_v16, %v5738_v0 }
 0x115   :  { %v755_v36 = vsel %vm754_vm8, %v5149_v9, %v751_v33  ;;  %v894_v28 = vmul.f32 %v890_v59, %v5740_v4 }
 0x116   :  { %v567_v34 = vrot.slane %v566_v32, 4  ;;  %v639_v37 = vrot.slane %v638_v54, 4  ;;  %v760_v38 = vsel %vm757_vm9, %v759_v24, %v755_v36  ;;  %5150 = vrcp.f32 %v675_v20 }
 0x117   :  { %v799_v47 = vmul.f32 %v760_v38, %v655_v29  ;;  %v800_v40 = vmul.f32 %v760_v38, %v656_v52  ;;  %v770_v63 = vand.u32 2147483647, %v675_v20  ;;  %vm766_vm11 = vweird.f32 %v675_v20 }
 0x118   :  { %v961_v31 = vld [vmem:[#allocation2 + $0x61] sm:$0xff]  ;;  %v568_v48 = vmin.f32 %v566_v32, %v567_v34  ;;  %v640_v22 = vmax.f32 %v638_v54, %v639_v37  ;;  %v772_v41 = vand.u32 2147483648, %v675_v20  ;;  %v657_v29 = vsub.f32 %v5681_v49, %v5748_v6 }
 0x119   :  { %v945_v39 = vld [vmem:[#allocation2 + $0x60] sm:$0xff]  ;;  %4848 = vmatmul.msk.f32.gmra.mxu3 %vm990_vm10, %v961_v31  ;;  %v867_v43 = vsub.f32 %v799_v47, %v863_v12  ;;  %v868_v44 = vsub.f32 %v800_v40, %v864_v10  ;;  %v962_v11 = vld [vmem:[#allocation2 + $0x69] sm:$0xff]  ;;  %vm771_vm0 = vcmp.eq.f32.partialorder %v770_v63, 8.507059e+37 }
 0x11a   :  { %4864 = vmatmul.msk.f32.gmra.mxu0 %vm990_vm10, %v945_v39  ;;  %v977_v14 = vld [vmem:[#allocation2 + $0x62] sm:$0xff]  ;;  %v569_v46 = vrot.slane %v568_v48, 2  ;;  %v641_v2 = vrot.slane %v640_v22, 2  ;;  %v978_v15 = vld [vmem:[#allocation2 + $0x6a] sm:$0xff]  ;;  %v773_v27 = vor.u32 1.1754944e-38, %v772_v41 }
 0x11b   :  { %4882 = vmatmul.msk.f32.gmra.mxu1 %vm990_vm10, %v977_v14  ;;  %v871_v51 = vmul.f32 0.5, %v867_v43  ;;  %v872_v3 = vmul.f32 0.5, %v868_v44  ;;  %v946_v13 = vld [vmem:[#allocation2 + $0x68] sm:$0xff] }
 0x11c   :  { %v570_v35 = vmin.f32 %v568_v48, %v569_v46  ;;  %v5151_v56 = vpop.eup %5150  ;;  %v642_v58 = vmax.f32 %v640_v22, %v641_v2 }
 0x11d   :  { %v5788_v60 = vadd.f32 %v871_v51, %v863_v12  ;;  %v5790_v57 = vadd.f32 %v872_v3, %v864_v10  ;;  %v762_v61 = vmul.f32 %v5151_v56, %v675_v20  ;;  %vm767_vm14 = vweird.f32 %v5151_v56 }
 0x11e   :  { %v571_v5 = vrot.slane %v570_v35, 1  ;;  %v643_v9 = vrot.slane %v642_v58, 1  ;;  %vm768_vm15 = vmor %vm766_vm11, %vm767_vm14 }
 0x11f   :  { %vm879_vm12 = vcmp.ge.f32.partialorder %v5788_v60, 0.5  ;;  %vm880_vm13 = vcmp.ge.f32.partialorder %v5790_v57, 0.5  ;;  %v763_v42 = vsub.f32 1.0, %v762_v61 }
 0x120   :  { %v5796_v7 = vmin.f32 %v570_v35, %v571_v5  ;;  %v644_v23 = vmax.f32 %v642_v58, %v643_v9  ;;  %v5799_v25 = vsel %vm879_vm12, 1.0, %v7437_v1  ;;  %v5802_v45 = vsel %vm880_vm13, 1.0, %v7437_v1 }
 0x121   :  { %4849 = vmatmul.msk.f32.gmra.mxu3 %vm990_vm10, %v962_v11  ;;  %v764_v55 = vmul.f32 %v5151_v56, %v763_v42  ;;  %931 = vst.msk [vmem:[#allocation2 + $0x79] sm:$0xff] %vm24_vm1, %v5799_v25  ;;  %v891_v22 = vsub.f32 1.0, %v5799_v25  ;;  %v892_v43 = vsub.f32 1.0, %v5802_v45 }
 0x122   :  { %4865 = vmatmul.msk.f32.gmra.mxu0 %vm990_vm10, %v946_v13  ;;  %v668_v8 = vsub.f32 %v644_v23, %v5796_v7  ;;  %932 = vst.msk [vmem:[#allocation2 + $0x81] sm:$0xff] %vm24_vm1, %v5802_v45  ;;  %v659_v44 = vsub.f32 %v5736_v62, %v5796_v7  ;;  %v660_v46 = vsub.f32 %v5760_v26, %v5796_v7 }
 0x123   :  { %4883 = vmatmul.msk.f32.gmra.mxu1 %vm990_vm10, %v978_v15  ;;  %v765_v30 = vadd.f32 %v5151_v56, %v764_v55  ;;  %v895_v58 = vmul.f32 %v891_v22, %v5788_v60  ;;  %v896_v61 = vmul.f32 %v892_v43, %v5790_v57 }
 0x124   :  { %v676_v53 = vadd.f32 1e-12, %v668_v8 }
 0x125   :  { %v769_v24 = vsel %vm768_vm15, %v5151_v56, %v765_v30 }
 0x126   :  { %v774_v18 = vsel %vm771_vm0, %v773_v27, %v769_v24  ;;  %5152 = vrcp.f32 %v676_v53  ;;  %vm780_vm2 = vweird.f32 %v676_v53  ;;  %v784_v0 = vand.u32 2147483647, %v676_v53 }
 0x127   :  { %v801_v19 = vmul.f32 %v774_v18, %v657_v29  ;;  %v802_v32 = vmul.f32 %v774_v18, %v658_v50  ;;  %v786_v4 = vand.u32 2147483648, %v676_v53 }
 0x128   :  { %v963_v52 = vld [vmem:[#allocation2 + $0x79] sm:$0xff]  ;;  %vm785_vm7 = vcmp.eq.f32.partialorder %v784_v0, 8.507059e+37 }
 0x129   :  { %v947_v33 = vld [vmem:[#allocation2 + $0x78] sm:$0xff]  ;;  %v897_v54 = vsub.f32 %v801_v19, %v893_v21  ;;  %v898_v20 = vsub.f32 %v802_v32, %v894_v28  ;;  %4850 = vmatmul.msk.f32.gmra.mxu3 %vm990_vm10, %v963_v52  ;;  %v964_v39 = vld [vmem:[#allocation2 + $0x81] sm:$0xff]  ;;  %v787_v14 = vor.u32 1.1754944e-38, %v786_v4 }
 0x12a   :  { %4866 = vmatmul.msk.f32.gmra.mxu0 %vm990_vm10, %v947_v33  ;;  %v979_v49 = vld [vmem:[#allocation2 + $0x7a] sm:$0xff]  ;;  %v980_v48 = vld [vmem:[#allocation2 + $0x82] sm:$0xff] }
 0x12b   :  { %4884 = vmatmul.msk.f32.gmra.mxu1 %vm990_vm10, %v979_v49  ;;  %v901_v17 = vmul.f32 0.5, %v897_v54  ;;  %v902_v6 = vmul.f32 0.5, %v898_v20  ;;  %v948_v47 = vld [vmem:[#allocation2 + $0x80] sm:$0xff] }
 0x12c   :  { %v5153_v34 = vpop.eup %5152 }
 0x12d   :  { %v905_v36 = vadd.f32 %v901_v17, %v893_v21  ;;  %v906_v37 = vadd.f32 %v902_v6, %v894_v28  ;;  %v776_v38 = vmul.f32 %v5153_v34, %v676_v53  ;;  %vm781_vm5 = vweird.f32 %v5153_v34 }
 0x12e   :  { %vm782_vm6 = vmor %vm780_vm2, %vm781_vm5 }
 0x12f   :  { %vm909_vm3 = vcmp.ge.f32.partialorder %v905_v36, 0.5  ;;  %vm910_vm4 = vcmp.ge.f32.partialorder %v906_v37, 0.5  ;;  %v777_v12 = vsub.f32 1.0, %v776_v38 }
 0x130   :  { %v4834_v10 = vsel %vm909_vm3, 1.0, %v7437_v1  ;;  %v4835_v31 = vsel %vm910_vm4, 1.0, %v7437_v1 }
 0x131   :  { %933 = vst.msk [vmem:[#allocation2 + $0x91] sm:$0xff] %vm24_vm1, %v4834_v10  ;;  %v778_v40 = vmul.f32 %v5153_v34, %v777_v12  ;;  %4851 = vmatmul.msk.f32.gmra.mxu3 %vm990_vm10, %v964_v39 }
 0x132   :  { %4867 = vmatmul.msk.f32.gmra.mxu0 %vm990_vm10, %v948_v47  ;;  %934 = vst.msk [vmem:[#allocation2 + $0x99] sm:$0xff] %vm24_vm1, %v4835_v31 }
 0x133   :  { %4885 = vmatmul.msk.f32.gmra.mxu1 %vm990_vm10, %v980_v48  ;;  %v779_v2 = vadd.f32 %v5153_v34, %v778_v40 }
 0x135   :  { %v783_v51 = vsel %vm782_vm6, %v5153_v34, %v779_v2 }
 0x136   :  { %v788_v3 = vsel %vm785_vm7, %v787_v14, %v783_v51 }
 0x137   :  { %v803_v35 = vmul.f32 %v788_v3, %v659_v44  ;;  %v804_v56 = vmul.f32 %v788_v3, %v660_v46 }
 0x138   :  { %v965_v63 = vld [vmem:[#allocation2 + $0x91] sm:$0xff] }
 0x139   :  { %v949_v41 = vld [vmem:[#allocation2 + $0x90] sm:$0xff]  ;;  %v899_v5 = vsub.f32 %v803_v35, %v895_v58  ;;  %v900_v9 = vsub.f32 %v804_v56, %v896_v61  ;;  %4852 = vmatmul.msk.f32.gmra.mxu3 %vm990_vm10, %v965_v63  ;;  %v966_v15 = vld [vmem:[#allocation2 + $0x99] sm:$0xff] }
 0x13a   :  { %4868 = vmatmul.msk.f32.gmra.mxu0 %vm990_vm10, %v949_v41  ;;  %v981_v62 = vld [vmem:[#allocation2 + $0x92] sm:$0xff]  ;;  %v982_v23 = vld [vmem:[#allocation2 + $0x9a] sm:$0xff] }
 0x13b   :  { %4886 = vmatmul.msk.f32.gmra.mxu1 %vm990_vm10, %v981_v62  ;;  %v903_v26 = vmul.f32 0.5, %v899_v5  ;;  %v904_v11 = vmul.f32 0.5, %v900_v9  ;;  %v950_v7 = vld [vmem:[#allocation2 + $0x98] sm:$0xff] }
 0x13d   :  { %v907_v13 = vadd.f32 %v903_v26, %v895_v58  ;;  %v908_v42 = vadd.f32 %v904_v11, %v896_v61 }
 0x13f   :  { %vm911_vm8 = vcmp.ge.f32.partialorder %v907_v13, 0.5  ;;  %vm912_vm9 = vcmp.ge.f32.partialorder %v908_v42, 0.5 }
 0x140   :  { %v4836_v60 = vsel %vm911_vm8, 1.0, %v7437_v1  ;;  %v4837_v57 = vsel %vm912_vm9, 1.0, %v7437_v1 }
 0x141   :  { %935 = vst.msk [vmem:[#allocation2 + $0xa9] sm:$0xff] %vm24_vm1, %v4836_v60  ;;  %4853 = vmatmul.msk.f32.gmra.mxu3 %vm990_vm10, %v966_v15 }
 0x142   :  { %4869 = vmatmul.msk.f32.gmra.mxu0 %vm990_vm10, %v950_v7  ;;  %936 = vst.msk [vmem:[#allocation2 + $0xb1] sm:$0xff] %vm24_vm1, %v4837_v57 }
 0x143   :  { %4887 = vmatmul.msk.f32.gmra.mxu1 %vm990_vm10, %v982_v23 }
 0x148   :  { %v967_v25 = vld [vmem:[#allocation2 + $0xa9] sm:$0xff] }
 0x149   :  { %v951_v45 = vld [vmem:[#allocation2 + $0xa8] sm:$0xff]  ;;  %4854 = vmatmul.msk.f32.gmra.mxu3 %vm990_vm10, %v967_v25  ;;  %v968_v8 = vld [vmem:[#allocation2 + $0xb1] sm:$0xff] }
 0x14a   :  { %4870 = vmatmul.msk.f32.gmra.mxu0 %vm990_vm10, %v951_v45  ;;  %v983_v55 = vld [vmem:[#allocation2 + $0xaa] sm:$0xff]  ;;  %v984_v50 = vld [vmem:[#allocation2 + $0xb2] sm:$0xff] }
 0x14b   :  { %4888 = vmatmul.msk.f32.gmra.mxu1 %vm990_vm10, %v983_v55  ;;  %v952_v29 = vld [vmem:[#allocation2 + $0xb0] sm:$0xff] }
 0x14c   :  { %v1169_v27 = vpop.f32.mrf.mxu0 }
 0x14d   :  { %v1285_v16 = vpop.f32.mrf.mxu1 }
 0x151   :  { %v1056_v59 = vpop.f32.mrf.mxu3  ;;  %4855 = vmatmul.msk.f32.gmra.mxu3 %vm990_vm10, %v968_v8 }
 0x152   :  { %4871 = vmatmul.msk.f32.gmra.mxu0 %vm990_vm10, %v952_v29  ;;  %v1170_v30 = vadd.f32 %v1169_v27, %v1056_v59 }
 0x153   :  { %4889 = vmatmul.msk.f32.gmra.mxu1 %vm990_vm10, %v984_v50 }
 0x154   :  { %v1172_v53 = vpop.f32.mrf.mxu0  ;;  %v5854_v18 = vadd.f32 %v1285_v16, %v1170_v30 }
 0x155   :  { %v1288_v32 = vpop.f32.mrf.mxu1 }
 0x156   :  { %v1349_v28 = vsel %vm990_vm10, %v5854_v18, inf  ;;  %v1421_v52 = vsel %vm990_vm10, %v5854_v18, -inf }
 0x159   :  { %v1059_v24 = vpop.f32.mrf.mxu3 }
 0x15a   :  { %v1173_v19 = vadd.f32 %v1172_v53, %v1059_v24 }
 0x15c   :  { %v5856_v21 = vadd.f32 %v1288_v32, %v1173_v19 }
 0x15e   :  { %v1350_v33 = vsel %vm990_vm10, %v5856_v21, inf  ;;  %v1422_v54 = vsel %vm990_vm10, %v5856_v21, -inf }
 0x15f   :  { %v1351_v20 = vmin.f32 %v1349_v28, %v1350_v33  ;;  %v1423_v49 = vmax.f32 %v1421_v52, %v1422_v54 }
 0x161   :  { %v1352_v17 = vrot.slane %v1351_v20, 4  ;;  %v1424_v6 = vrot.slane %v1423_v49, 4 }
 0x163   :  { %v1353_v34 = vmin.f32 %v1351_v20, %v1352_v17  ;;  %v1425_v36 = vmax.f32 %v1423_v49, %v1424_v6 }
 0x164   :  { %v1175_v37 = vpop.f32.mrf.mxu0 }
 0x165   :  { %v1291_v38 = vpop.f32.mrf.mxu1  ;;  %v1354_v0 = vrot.slane %v1353_v34, 2  ;;  %v1426_v4 = vrot.slane %v1425_v36, 2 }
 0x167   :  { %v1427_v12 = vmax.f32 %v1425_v36, %v1426_v4  ;;  %v1355_v10 = vmin.f32 %v1353_v34, %v1354_v0 }
 0x169   :  { %v1428_v31 = vrot.slane %v1427_v12, 1  ;;  %v1062_v39 = vpop.f32.mrf.mxu3  ;;  %v1356_v47 = vrot.slane %v1355_v10, 1 }
 0x16a   :  { %v1176_v43 = vadd.f32 %v1175_v37, %v1062_v39 }
 0x16b   :  { %v1429_v40 = vmax.f32 %v1427_v12, %v1428_v31  ;;  %v1357_v48 = vmin.f32 %v1355_v10, %v1356_v47 }
 0x16c   :  { %v1178_v44 = vpop.f32.mrf.mxu0  ;;  %v5866_v51 = vadd.f32 %v1291_v38, %v1176_v43 }
 0x16d   :  { %v1294_v14 = vpop.f32.mrf.mxu1  ;;  %v1509_v22 = vsub.f32 %v1429_v40, %v1357_v48  ;;  %v1493_v53 = vsub.f32 %v5854_v18, %v1357_v48  ;;  %v1494_v33 = vsub.f32 %v5856_v21, %v1357_v48 }
 0x16e   :  { %v1358_v56 = vsel %vm990_vm10, %v5866_v51, inf  ;;  %v1430_v58 = vsel %vm990_vm10, %v5866_v51, -inf }
 0x16f   :  { %v1517_v46 = vadd.f32 1e-12, %v1509_v22 }
 0x171   :  { %v1065_v2 = vpop.f32.mrf.mxu3  ;;  %5154 = vrcp.f32 %v1517_v46  ;;  %v1536_v7 = vand.u32 2147483648, %v1517_v46  ;;  %v1534_v45 = vand.u32 2147483647, %v1517_v46  ;;  %vm1530_vm12 = vweird.f32 %v1517_v46 }
 0x172   :  { %v1179_v3 = vadd.f32 %v1178_v44, %v1065_v2 }
 0x173   :  { %v1537_v50 = vor.u32 1.1754944e-38, %v1536_v7  ;;  %vm1535_vm14 = vcmp.eq.f32.partialorder %v1534_v45, 8.507059e+37 }
 0x174   :  { %v5868_v35 = vadd.f32 %v1294_v14, %v1179_v3 }
 0x176   :  { %v1359_v61 = vsel %vm990_vm10, %v5868_v35, inf  ;;  %v1431_v63 = vsel %vm990_vm10, %v5868_v35, -inf }
 0x177   :  { %v1181_v41 = vpop.f32.mrf.mxu0  ;;  %v5155_v5 = vpop.eup %5154  ;;  %v1360_v9 = vmin.f32 %v1358_v56, %v1359_v61  ;;  %v1432_v62 = vmax.f32 %v1430_v58, %v1431_v63 }
 0x178   :  { %v1297_v26 = vpop.f32.mrf.mxu1  ;;  %v1526_v11 = vmul.f32 %v5155_v5, %v1517_v46  ;;  %vm1531_vm11 = vweird.f32 %v5155_v5 }
 0x179   :  { %v1361_v13 = vrot.slane %v1360_v9, 4  ;;  %v1433_v42 = vrot.slane %v1432_v62, 4  ;;  %vm1532_vm13 = vmor %vm1530_vm12, %vm1531_vm11 }
 0x17a   :  { %v1527_v60 = vsub.f32 1.0, %v1526_v11 }
 0x17b   :  { %v1362_v57 = vmin.f32 %v1360_v9, %v1361_v13  ;;  %v1434_v15 = vmax.f32 %v1432_v62, %v1433_v42 }
 0x17c   :  { %v1068_v23 = vpop.f32.mrf.mxu3  ;;  %v1528_v25 = vmul.f32 %v5155_v5, %v1527_v60 }
 0x17d   :  { %v1363_v55 = vrot.slane %v1362_v57, 2  ;;  %v1435_v27 = vrot.slane %v1434_v15, 2  ;;  %v1182_v32 = vadd.f32 %v1181_v41, %v1068_v23 }
 0x17e   :  { %v1529_v59 = vadd.f32 %v5155_v5, %v1528_v25 }
 0x17f   :  { %v1184_v16 = vpop.f32.mrf.mxu0  ;;  %v1436_v8 = vmax.f32 %v1434_v15, %v1435_v27  ;;  %v1364_v30 = vmin.f32 %v1362_v57, %v1363_v55  ;;  %v5884_v36 = vadd.f32 %v1297_v26, %v1182_v32 }
 0x180   :  { %v1300_v29 = vpop.f32.mrf.mxu1  ;;  %v1533_v24 = vsel %vm1532_vm13, %v5155_v5, %v1529_v59 }
 0x181   :  { %v1437_v19 = vrot.slane %v1436_v8, 1  ;;  %v1538_v28 = vsel %vm1535_vm14, %v1537_v50, %v1533_v24  ;;  %v1365_v54 = vrot.slane %v1364_v30, 1  ;;  %v1367_v10 = vsel %vm990_vm10, %v5884_v36, inf }
 0x182   :  { %v1637_v52 = vmul.f32 %v1538_v28, %v1493_v53  ;;  %v1638_v6 = vmul.f32 %v1538_v28, %v1494_v33  ;;  %v1439_v31 = vsel %vm990_vm10, %v5884_v36, -inf }
 0x183   :  { %v1438_v20 = vmax.f32 %v1436_v8, %v1437_v19  ;;  %v5882_v34 = vmin.f32 %v1364_v30, %v1365_v54 }
 0x184   :  { %v1071_v49 = vpop.f32.mrf.mxu3  ;;  %v5880_v17 = vmul.f32 0.5, %v1637_v52  ;;  %v5895_v4 = vmul.f32 0.5, %v1638_v6 }
 0x185   :  { %v1185_v37 = vadd.f32 %v1184_v16, %v1071_v49  ;;  %v1510_v18 = vsub.f32 %v1438_v20, %v5882_v34  ;;  %v1495_v30 = vsub.f32 %v5866_v51, %v5882_v34  ;;  %v1496_v28 = vsub.f32 %v5868_v35, %v5882_v34 }
 0x186   :  { %vm1661_vm15 = vcmp.ge.f32.partialorder %v5880_v17, 0.5  ;;  %vm1662_vm0 = vcmp.ge.f32.partialorder %v5895_v4, 0.5 }
 0x187   :  { %v5888_v38 = vadd.f32 %v1300_v29, %v1185_v37  ;;  %v5891_v0 = vsel %vm1661_vm15, 1.0, %v7437_v1  ;;  %v1187_v21 = vpop.f32.mrf.mxu0  ;;  %v1518_v12 = vadd.f32 1e-12, %v1510_v18  ;;  %v5907_v3 = vsel %vm1662_vm0, 1.0, %v7437_v1 }
 0x188   :  { %1785 = vrot.lane.b32.xlu0 %v5891_v0, %s5259_s2  ;;  %v1303_v40 = vpop.f32.mrf.mxu1 }
 0x189   :  { %v1368_v39 = vsel %vm990_vm10, %v5888_v38, inf  ;;  %v1440_v47 = vsel %vm990_vm10, %v5888_v38, -inf  ;;  %5156 = vrcp.f32 %v1518_v12  ;;  %v1548_v60 = vand.u32 2147483647, %v1518_v12 }
 0x18a   :  { %v1369_v48 = vmin.f32 %v1367_v10, %v1368_v39  ;;  %v1441_v14 = vmax.f32 %v1439_v31, %v1440_v47  ;;  %v1550_v57 = vand.u32 2147483648, %v1518_v12  ;;  %vm1544_vm3 = vweird.f32 %v1518_v12 }
 0x18b   :  { %vm1549_vm5 = vcmp.eq.f32.partialorder %v1548_v60, 8.507059e+37 }
 0x18c   :  { %v1370_v22 = vrot.slane %v1369_v48, 4  ;;  %v1442_v43 = vrot.slane %v1441_v14, 4  ;;  %v1074_v2 = vpop.f32.mrf.mxu3  ;;  %v1551_v8 = vor.u32 1.1754944e-38, %v1550_v57 }
 0x18d   :  { %v1188_v13 = vadd.f32 %v1187_v21, %v1074_v2 }
 0x18e   :  { %v1371_v44 = vmin.f32 %v1369_v48, %v1370_v22  ;;  %v1443_v46 = vmax.f32 %v1441_v14, %v1442_v43 }
 0x18f   :  { %v1190_v61 = vpop.f32.mrf.mxu0  ;;  %v5157_v63 = vpop.eup %5156  ;;  %v5914_v27 = vadd.f32 %v1303_v40, %v1188_v13 }
 0x190   :  { %v1372_v56 = vrot.slane %v1371_v44, 2  ;;  %v1444_v58 = vrot.slane %v1443_v46, 2  ;;  %1787 = vrot.lane.b32.xlu0 %v5907_v3, %s5259_s2  ;;  %v1306_v9 = vpop.f32.mrf.mxu1  ;;  %v1540_v62 = vmul.f32 %v5157_v63, %v1518_v12  ;;  %vm1545_vm2 = vweird.f32 %v5157_v63 }
 0x191   :  { %vm1546_vm4 = vmor %vm1544_vm3, %vm1545_vm2  ;;  %v1376_v52 = vsel %vm990_vm10, %v5914_v27, inf  ;;  %v1448_v33 = vsel %vm990_vm10, %v5914_v27, -inf }
 0x192   :  { %v1373_v41 = vmin.f32 %v1371_v44, %v1372_v56  ;;  %v1445_v5 = vmax.f32 %v1443_v46, %v1444_v58  ;;  %v1541_v42 = vsub.f32 1.0, %v1540_v62  ;;  %v1673_v62 = vsub.f32 1.0, %v5891_v0 }
 0x194   :  { %v1374_v26 = vrot.slane %v1373_v41, 1  ;;  %v1446_v11 = vrot.slane %v1445_v5, 1  ;;  %v1077_v23 = vpop.f32.mrf.mxu3  ;;  %v1542_v25 = vmul.f32 %v5157_v63, %v1541_v42 }
 0x195   :  { %v1191_v45 = vadd.f32 %v1190_v61, %v1077_v23 }
 0x196   :  { %v5911_v15 = vmin.f32 %v1373_v41, %v1374_v26  ;;  %v1447_v7 = vmax.f32 %v1445_v5, %v1446_v11  ;;  %v1543_v16 = vadd.f32 %v5157_v63, %v1542_v25  ;;  %v1674_v26 = vsub.f32 1.0, %v5907_v3 }
 0x197   :  { %v5916_v59 = vadd.f32 %v1306_v9, %v1191_v45  ;;  %v5918_v50 = vpop.f32.mrf.mxu0 }
 0x198   :  { %v1511_v55 = vsub.f32 %v1447_v7, %v5911_v15  ;;  %v1547_v53 = vsel %vm1546_vm4, %v5157_v63, %v1543_v16  ;;  %v5932_v51 = vpop.f32.mrf.mxu1  ;;  %v1498_v57 = vsub.f32 %v5888_v38, %v5911_v15  ;;  %v1497_v7 = vsub.f32 %v5884_v36, %v5911_v15 }
 0x199   :  { %v1377_v24 = vsel %vm990_vm10, %v5916_v59, inf  ;;  %v1449_v19 = vsel %vm990_vm10, %v5916_v59, -inf  ;;  %v1552_v32 = vsel %vm1549_vm5, %v1551_v8, %v1547_v53 }
 0x19a   :  { %v1519_v29 = vadd.f32 1e-12, %v1511_v55  ;;  %v1378_v54 = vmin.f32 %v1376_v52, %v1377_v24  ;;  %v1450_v20 = vmax.f32 %v1448_v33, %v1449_v19  ;;  %v1639_v49 = vmul.f32 %v1552_v32, %v1495_v30 }
 0x19b   :  { %v1640_v6 = vmul.f32 %v1552_v32, %v1496_v28  ;;  %v1677_v55 = vmul.f32 %v1673_v62, %v5880_v17 }
 0x19c   :  { %5158 = vrcp.f32 %v1519_v29  ;;  %v1080_v37 = vpop.f32.mrf.mxu3  ;;  %v1379_v18 = vrot.slane %v1378_v54, 4  ;;  %v1451_v21 = vrot.slane %v1450_v20, 4  ;;  %v5934_v12 = vmul.f32 0.5, %v1639_v49 }
 0x19d   :  { %v1656_v10 = vmul.f32 0.5, %v1640_v6  ;;  %v1562_v56 = vand.u32 2147483647, %v1519_v29  ;;  %v1564_v58 = vand.u32 2147483648, %v1519_v29  ;;  %vm1558_vm9 = vweird.f32 %v1519_v29 }
 0x19e   :  { %v1380_v35 = vmin.f32 %v1378_v54, %v1379_v18  ;;  %v1452_v34 = vmax.f32 %v1450_v20, %v1451_v21  ;;  %vm1663_vm6 = vcmp.ge.f32.partialorder %v5934_v12, 0.5  ;;  %v1194_v15 = vadd.f32 %v5918_v50, %v1080_v37 }
 0x19f   :  { %v5938_v39 = vsel %vm1663_vm6, 1.0, %v7437_v1  ;;  %vm1664_vm7 = vcmp.ge.f32.partialorder %v1656_v10, 0.5  ;;  %v1196_v14 = vpop.f32.mrf.mxu0  ;;  %v1565_v23 = vor.u32 1.1754944e-38, %v1564_v58  ;;  %vm1563_vm12 = vcmp.eq.f32.partialorder %v1562_v56, 8.507059e+37 }
 0x1a0   :  { %v1381_v40 = vrot.slane %v1380_v35, 2  ;;  %v1453_v48 = vrot.slane %v1452_v34, 2  ;;  %1789 = vrot.lane.b32.xlu1 %v5938_v39, %s5259_s2  ;;  %v4893_v22 = vsel %vm1664_vm7, 1.0, %v7437_v1  ;;  %v1312_v61 = vpop.f32.mrf.mxu1  ;;  %v5963_v17 = vadd.f32 %v5932_v51, %v1194_v15 }
 0x1a1   :  { %v1676_v2 = vsub.f32 1.0, %v4893_v22 }
 0x1a2   :  { %v5159_v31 = vpop.eup %5158  ;;  %v1382_v44 = vmin.f32 %v1380_v35, %v1381_v40  ;;  %v1454_v46 = vmax.f32 %v1452_v34, %v1453_v48  ;;  %v1385_v37 = vsel %vm990_vm10, %v5963_v17, inf  ;;  %v1457_v18 = vsel %vm990_vm10, %v5963_v17, -inf }
 0x1a3   :  { %v1554_v47 = vmul.f32 %v5159_v31, %v1519_v29  ;;  %vm1559_vm8 = vweird.f32 %v5159_v31  ;;  %v5945_v11 = vmul.f32 %v1676_v2, %v1656_v10  ;;  %v1678_v29 = vmul.f32 %v1674_v26, %v5895_v4 }
 0x1a4   :  { %v1083_v63 = vpop.f32.mrf.mxu3  ;;  %v1383_v5 = vrot.slane %v1382_v44, 1  ;;  %v1455_v9 = vrot.slane %v1454_v46, 1  ;;  %vm1560_vm11 = vmor %vm1558_vm9, %vm1559_vm8 }
 0x1a5   :  { %v1555_v43 = vsub.f32 1.0, %v1554_v47  ;;  %v1197_v16 = vadd.f32 %v1196_v14, %v1083_v63 }
 0x1a6   :  { %v5947_v42 = vmin.f32 %v1382_v44, %v1383_v5  ;;  %v1456_v60 = vmax.f32 %v1454_v46, %v1455_v9 }
 0x1a7   :  { %v1556_v41 = vmul.f32 %v5159_v31, %v1555_v43  ;;  %v1199_v30 = vpop.f32.mrf.mxu0  ;;  %v5960_v19 = vadd.f32 %v1312_v61, %v1197_v16 }
 0x1a8   :  { %v1500_v0 = vsub.f32 %v5916_v59, %v5947_v42  ;;  %v1512_v3 = vsub.f32 %v1456_v60, %v5947_v42  ;;  %1791 = vrot.lane.b32.xlu1 %v4893_v22, %s5259_s2  ;;  %v1315_v32 = vpop.f32.mrf.mxu1  ;;  %v1675_v22 = vsub.f32 1.0, %v5938_v39  ;;  %v1499_v62 = vsub.f32 %v5914_v27, %v5947_v42 }
 0x1a9   :  { %v1557_v13 = vadd.f32 %v5159_v31, %v1556_v41  ;;  %v1386_v4 = vsel %vm990_vm10, %v5960_v19, inf  ;;  %v1458_v50 = vsel %vm990_vm10, %v5960_v19, -inf }
 0x1aa   :  { %v1520_v38 = vadd.f32 1e-12, %v1512_v3  ;;  %v1387_v21 = vmin.f32 %v1385_v37, %v1386_v4  ;;  %v1459_v10 = vmax.f32 %v1457_v18, %v1458_v50 }
 0x1ab   :  { %v1561_v25 = vsel %vm1560_vm11, %v5159_v31, %v1557_v13 }
 0x1ac   :  { %v1566_v45 = vsel %vm1563_vm12, %v1565_v23, %v1561_v25  ;;  %5160 = vrcp.f32 %v1520_v38  ;;  %v1086_v28 = vpop.f32.mrf.mxu3  ;;  %v1578_v47 = vand.u32 2147483648, %v1520_v38  ;;  %v1576_v56 = vand.u32 2147483647, %v1520_v38 }
 0x1ad   :  { %v1641_v8 = vmul.f32 %v1566_v45, %v1497_v7  ;;  %v1642_v36 = vmul.f32 %v1566_v45, %v1498_v57  ;;  %v1200_v6 = vadd.f32 %v1199_v30, %v1086_v28  ;;  %v1388_v63 = vrot.slane %v1387_v21, 4 }
 0x1ae   :  { %v1460_v41 = vrot.slane %v1459_v10, 4  ;;  %vm1572_vm0 = vweird.f32 %v1520_v38  ;;  %v1579_v26 = vor.u32 1.1754944e-38, %v1578_v47  ;;  %vm1577_vm3 = vcmp.eq.f32.partialorder %v1576_v56, 8.507059e+37 }
 0x1af   :  { %v1681_v53 = vsub.f32 %v1641_v8, %v1677_v55  ;;  %v1682_v24 = vsub.f32 %v1642_v36, %v1678_v29  ;;  %v1202_v40 = vpop.f32.mrf.mxu0  ;;  %v5977_v43 = vadd.f32 %v1315_v32, %v1200_v6  ;;  %v1389_v45 = vmin.f32 %v1387_v21, %v1388_v63 }
 0x1b0   :  { %v1318_v58 = vpop.f32.mrf.mxu1  ;;  %v1679_v8 = vmul.f32 %v1675_v22, %v5934_v12 }
 0x1b1   :  { %v1685_v52 = vmul.f32 0.5, %v1681_v53  ;;  %v1686_v33 = vmul.f32 0.5, %v1682_v24  ;;  %v1394_v13 = vsel %vm990_vm10, %v5977_v43, inf  ;;  %v1466_v60 = vsel %vm990_vm10, %v5977_v43, -inf }
 0x1b2   :  { %v5161_v49 = vpop.eup %5160  ;;  %v1390_v24 = vrot.slane %v1389_v45, 2 }
 0x1b3   :  { %v1689_v54 = vadd.f32 %v1685_v52, %v1677_v55  ;;  %v1690_v20 = vadd.f32 %v1686_v33, %v1678_v29  ;;  %v1568_v51 = vmul.f32 %v5161_v49, %v1520_v38  ;;  %vm1573_vm15 = vweird.f32 %v5161_v49 }
 0x1b4   :  { %v1089_v48 = vpop.f32.mrf.mxu3  ;;  %vm1574_vm2 = vmor %vm1572_vm0, %vm1573_vm15  ;;  %v1461_v55 = vmax.f32 %v1459_v10, %v1460_v41  ;;  %v1391_v42 = vmin.f32 %v1389_v45, %v1390_v24 }
 0x1b5   :  { %vm1693_vm13 = vcmp.ge.f32.partialorder %v1689_v54, 0.5  ;;  %vm1694_vm14 = vcmp.ge.f32.partialorder %v1690_v20, 0.5  ;;  %v1569_v31 = vsub.f32 1.0, %v1568_v51  ;;  %v1203_v44 = vadd.f32 %v1202_v40, %v1089_v48 }
 0x1b6   :  { %v4894_v35 = vsel %vm1693_vm13, 1.0, %v7437_v1  ;;  %v4895_v34 = vsel %vm1694_vm14, 1.0, %v7437_v1  ;;  %v1462_v32 = vrot.slane %v1461_v55, 2 }
 0x1b7   :  { %1793 = vrot.lane.b32.xlu2 %v4894_v35, %s5259_s2  ;;  %v1705_v14 = vsub.f32 1.0, %v4894_v35  ;;  %v1706_v46 = vsub.f32 1.0, %v4895_v34  ;;  %v1570_v2 = vmul.f32 %v5161_v49, %v1569_v31  ;;  %v5981_v5 = vadd.f32 %v1318_v58, %v1203_v44  ;;  %v1205_v4 = vpop.f32.mrf.mxu0 }
 0x1b8   :  { %v1321_v51 = vpop.f32.mrf.mxu1 }
 0x1b9   :  { %v5979_v61 = vmul.f32 %v1705_v14, %v1689_v54  ;;  %v5983_v9 = vmul.f32 %v1706_v46, %v1690_v20  ;;  %v1571_v39 = vadd.f32 %v5161_v49, %v1570_v2  ;;  %v1395_v57 = vsel %vm990_vm10, %v5981_v5, inf }
 0x1ba   :  { %v1467_v7 = vsel %vm990_vm10, %v5981_v5, -inf  ;;  %v1396_v25 = vmin.f32 %v1394_v13, %v1395_v57 }
 0x1bb   :  { %v1575_v23 = vsel %vm1574_vm2, %v5161_v49, %v1571_v39  ;;  %v1468_v27 = vmax.f32 %v1466_v60, %v1467_v7 }
 0x1bc   :  { %v1580_v3 = vsel %vm1577_vm3, %v1579_v26, %v1575_v23  ;;  %v1397_v29 = vrot.slane %v1396_v25, 4  ;;  %v1092_v52 = vpop.f32.mrf.mxu3 }
 0x1bd   :  { %v1643_v16 = vmul.f32 %v1580_v3, %v1499_v62  ;;  %v1644_v38 = vmul.f32 %v1580_v3, %v1500_v0  ;;  %v1469_v36 = vrot.slane %v1468_v27, 4  ;;  %v1463_v0 = vmax.f32 %v1461_v55, %v1462_v32 }
 0x1be   :  { %v1398_v53 = vmin.f32 %v1396_v25, %v1397_v29  ;;  %v1206_v56 = vadd.f32 %v1205_v4, %v1092_v52 }
 0x1bf   :  { %1795 = vrot.lane.b32.xlu2 %v4895_v34, %s5259_s2  ;;  %v1683_v15 = vsub.f32 %v1643_v16, %v1679_v8  ;;  %v1684_v30 = vsub.f32 %v1644_v38, %v5945_v11  ;;  %v1470_v28 = vmax.f32 %v1468_v27, %v1469_v36  ;;  %v1392_v34 = vrot.slane %v1391_v42, 1  ;;  %v1208_v46 = vpop.f32.mrf.mxu0 }
 0x1c0   :  { %v1399_v54 = vrot.slane %v1398_v53, 2  ;;  %v1464_v31 = vrot.slane %v1463_v0, 1  ;;  %v1324_v63 = vpop.f32.mrf.mxu1  ;;  %v6009_v62 = vadd.f32 %v1321_v51, %v1206_v56 }
 0x1c1   :  { %v1687_v33 = vmul.f32 0.5, %v1683_v15  ;;  %v1688_v20 = vmul.f32 0.5, %v1684_v30  ;;  %v1471_v12 = vrot.slane %v1470_v28, 2  ;;  %v6004_v22 = vmin.f32 %v1391_v42, %v1392_v34 }
 0x1c2   :  { %v1400_v50 = vmin.f32 %v1398_v53, %v1399_v54  ;;  %v1465_v44 = vmax.f32 %v1463_v0, %v1464_v31  ;;  %v1403_v7 = vsel %vm990_vm10, %v6009_v62, inf  ;;  %v1475_v23 = vsel %vm990_vm10, %v6009_v62, -inf }
 0x1c3   :  { %v1691_v59 = vadd.f32 %v1687_v33, %v1679_v8  ;;  %v1472_v49 = vmax.f32 %v1470_v28, %v1471_v12  ;;  %v1692_v6 = vadd.f32 %v1688_v20, %v5945_v11 }
 0x1c4   :  { %v1401_v37 = vrot.slane %v1400_v50, 1  ;;  %v1095_v14 = vpop.f32.mrf.mxu3  ;;  %v1513_v58 = vsub.f32 %v1465_v44, %v6004_v22 }
 0x1c5   :  { %vm1695_vm4 = vcmp.ge.f32.partialorder %v1691_v59, 0.5  ;;  %v1473_v18 = vrot.slane %v1472_v49, 1  ;;  %v1209_v2 = vadd.f32 %v1208_v46, %v1095_v14  ;;  %vm1696_vm5 = vcmp.ge.f32.partialorder %v1692_v6, 0.5 }
 0x1c6   :  { %v4896_v21 = vsel %vm1695_vm4, 1.0, %v7437_v1  ;;  %v1402_v10 = vmin.f32 %v1400_v50, %v1401_v37  ;;  %v6011_v26 = vadd.f32 1e-12, %v1513_v58  ;;  %v6022_v55 = vsel %vm1696_vm5, 1.0, %v7437_v1 }
 0x1c7   :  { %1797 = vrot.lane.b32.xlu1 %v4896_v21, %s5259_s2  ;;  %v1707_v35 = vsub.f32 1.0, %v4896_v21  ;;  %v1474_v47 = vmax.f32 %v1472_v49, %v1473_v18  ;;  %v6007_v41 = vadd.f32 %v1324_v63, %v1209_v2  ;;  %v1708_v29 = vsub.f32 1.0, %v6022_v55 }
 0x1c8   :  { %v1504_v53 = vsub.f32 %v5981_v5, %v1402_v10  ;;  %v1503_v24 = vsub.f32 %v5977_v43, %v1402_v10  ;;  %v1592_v46 = vand.u32 2147483648, %v6011_v26  ;;  %vm1586_vm14 = vweird.f32 %v6011_v26 }
 0x1c9   :  { %v1711_v40 = vmul.f32 %v1707_v35, %v1691_v59  ;;  %v1514_v48 = vsub.f32 %v1474_v47, %v1402_v10  ;;  %v1404_v13 = vsel %vm990_vm10, %v6007_v41, inf  ;;  %v1476_v60 = vsel %vm990_vm10, %v6007_v41, -inf }
 0x1ca   :  { %v1405_v27 = vmin.f32 %v1403_v7, %v1404_v13  ;;  %v1477_v3 = vmax.f32 %v1475_v23, %v1476_v60  ;;  %v1712_v20 = vmul.f32 %v1708_v29, %v1692_v6  ;;  %v1590_v2 = vand.u32 2147483647, %v6011_v26 }
 0x1cb   :  { %v1522_v11 = vadd.f32 1e-12, %v1514_v48 }
 0x1cc   :  { %v1406_v36 = vrot.slane %v1405_v27, 4  ;;  %v1478_v15 = vrot.slane %v1477_v3, 4  ;;  %vm1591_vm0 = vcmp.eq.f32.partialorder %v1590_v2, 8.507059e+37 }
 0x1cd   :  { %5162 = vrcp.f32 %v1522_v11  ;;  %v1606_v45 = vand.u32 2147483648, %v1522_v11  ;;  %v1604_v8 = vand.u32 2147483647, %v1522_v11  ;;  %vm1600_vm7 = vweird.f32 %v1522_v11 }
 0x1ce   :  { %5164 = vrcp.f32 %v6011_v26  ;;  %v1407_v12 = vmin.f32 %v1405_v27, %v1406_v36  ;;  %v1479_v4 = vmax.f32 %v1477_v3, %v1478_v15  ;;  %v5202_v27 = vld [vmem:[#allocation2 + $0x1] sm:$0xff] }
 0x1cf   :  { %v1607_v30 = vor.u32 1.1754944e-38, %v1606_v45  ;;  %vm1605_vm9 = vcmp.eq.f32.partialorder %v1604_v8, 8.507059e+37 }
 0x1d0   :  { %v1408_v37 = vrot.slane %v1407_v12, 2  ;;  %v1480_v18 = vrot.slane %v1479_v4, 2 }
 0x1d2   :  { %v1409_v21 = vmin.f32 %v1407_v12, %v1408_v37  ;;  %v1481_v10 = vmax.f32 %v1479_v4, %v1480_v18  ;;  %v5205_v18 = vld [vmem:[#allocation2 + $0x19] sm:$0xff] }
 0x1d3   :  { %v5163_v39 = vpop.eup %5162 }
 0x1d4   :  { %v1596_v57 = vmul.f32 %v5163_v39, %v1522_v11  ;;  %vm1601_vm6 = vweird.f32 %v5163_v39  ;;  %v5165_v52 = vpop.eup %5164  ;;  %v1410_v14 = vrot.slane %v1409_v21, 1  ;;  %v1482_v44 = vrot.slane %v1481_v10, 1 }
 0x1d5   :  { %vm1602_vm8 = vmor %vm1600_vm7, %vm1601_vm6  ;;  %v1582_v42 = vmul.f32 %v5165_v52, %v6011_v26  ;;  %vm1587_vm13 = vweird.f32 %v5165_v52 }
 0x1d6   :  { %v1597_v25 = vsub.f32 1.0, %v1596_v57  ;;  %v6044_v56 = vmin.f32 %v1409_v21, %v1410_v14  ;;  %v1483_v58 = vmax.f32 %v1481_v10, %v1482_v44  ;;  %vm1588_vm15 = vmor %vm1586_vm14, %vm1587_vm13  ;;  %v1501_v57 = vsub.f32 %v5963_v17, %v6004_v22 }
 0x1d7   :  { %v1583_v43 = vsub.f32 1.0, %v1582_v42 }
 0x1d8   :  { %v1598_v16 = vmul.f32 %v5163_v39, %v1597_v25  ;;  %v1515_v13 = vsub.f32 %v1483_v58, %v6044_v56 }
 0x1d9   :  { %v1584_v47 = vmul.f32 %v5165_v52, %v1583_v43 }
 0x1da   :  { %v1599_v38 = vadd.f32 %v5163_v39, %v1598_v16  ;;  %v1523_v25 = vadd.f32 1e-12, %v1515_v13 }
 0x1db   :  { %v1585_v11 = vadd.f32 %v5165_v52, %v1584_v47 }
 0x1dc   :  { %v1603_v32 = vsel %vm1602_vm8, %v5163_v39, %v1599_v38  ;;  %v1593_v39 = vor.u32 1.1754944e-38, %v1592_v46  ;;  %5166 = vrcp.f32 %v1523_v25  ;;  %v5203_v38 = vld [vmem:[#allocation2 + $0x9] sm:$0xff]  ;;  %v1620_v37 = vand.u32 2147483648, %v1523_v25 }
 0x1dd   :  { %v1608_v28 = vsel %vm1605_vm9, %v1607_v30, %v1603_v32  ;;  %v1589_v63 = vsel %vm1588_vm15, %v5165_v52, %v1585_v11  ;;  %v1098_v30 = vpop.f32.mrf.mxu3  ;;  %v1502_v32 = vsub.f32 %v5960_v19, %v6004_v22  ;;  %v1327_v52 = vpop.f32.mrf.mxu1  ;;  %vm1614_vm4 = vweird.f32 %v1523_v25 }
 0x1de   :  { %v1647_v33 = vmul.f32 %v1608_v28, %v1503_v24  ;;  %v1648_v54 = vmul.f32 %v1608_v28, %v1504_v53  ;;  %v1594_v60 = vsel %vm1591_vm0, %v1593_v39, %v1589_v63  ;;  %v1211_v24 = vpop.f32.mrf.mxu0  ;;  %v1618_v43 = vand.u32 2147483647, %v1523_v25 }
 0x1df   :  { %v1645_v23 = vmul.f32 %v1594_v60, %v1501_v57  ;;  %v1621_v14 = vor.u32 1.1754944e-38, %v1620_v37  ;;  %v1505_v63 = vsub.f32 %v6009_v62, %v6044_v56 }
 0x1e0   :  { %v1715_v50 = vsub.f32 %v1647_v33, %v1711_v40  ;;  %v1716_v59 = vsub.f32 %v1648_v54, %v1712_v20  ;;  %v1646_v33 = vmul.f32 %v1594_v60, %v1502_v32  ;;  %vm1619_vm6 = vcmp.eq.f32.partialorder %v1618_v43, 8.507059e+37  ;;  %v1994_v43 = vld [vmem:[%s7433_s3 + $0x8] sm:$0xff] }
 0x1e1   :  { %v1713_v26 = vsub.f32 %v1645_v23, %v5979_v61  ;;  %2173 = vmatpush.msrb.mxu3 %v1994_v43 }
 0x1e2   :  { %v1719_v0 = vmul.f32 0.5, %v1715_v50  ;;  %v1720_v49 = vmul.f32 0.5, %v1716_v59  ;;  %v5167_v36 = vpop.eup %5166 }
 0x1e3   :  { %v1717_v8 = vmul.f32 0.5, %v1713_v26  ;;  %v1610_v53 = vmul.f32 %v5167_v36, %v1523_v25  ;;  %vm1615_vm3 = vweird.f32 %v5167_v36 }
 0x1e4   :  { %v1723_v5 = vadd.f32 %v1719_v0, %v1711_v40  ;;  %v1724_v51 = vadd.f32 %v1720_v49, %v1712_v20  ;;  %v1212_v49 = vadd.f32 %v1211_v24, %v1098_v30  ;;  %vm1616_vm5 = vmor %vm1614_vm4, %vm1615_vm3 }
 0x1e5   :  { %v1721_v17 = vadd.f32 %v1717_v8, %v5979_v61  ;;  %v1611_v28 = vsub.f32 1.0, %v1610_v53  ;;  %v1101_v12 = vpop.f32.mrf.mxu3  ;;  %v5204_v61 = vld [vmem:[#allocation2 + $0x31] sm:$0xff]  ;;  %v1330_v21 = vpop.f32.mrf.mxu1 }
 0x1e6   :  { %vm1727_vm11 = vcmp.ge.f32.partialorder %v1723_v5, 0.5  ;;  %vm1728_vm12 = vcmp.ge.f32.partialorder %v1724_v51, 0.5  ;;  %v1214_v50 = vpop.f32.mrf.mxu0  ;;  %v6063_v47 = vadd.f32 %v1327_v52, %v1212_v49 }
 0x1e7   :  { %v6030_v35 = vsel %vm1727_vm11, 1.0, %v7437_v1  ;;  %v6033_v6 = vsel %vm1728_vm12, 1.0, %v7437_v1  ;;  %vm1725_vm2 = vcmp.ge.f32.partialorder %v1721_v17, 0.5  ;;  %v1612_v20 = vmul.f32 %v5167_v36, %v1611_v28 }
 0x1e8   :  { %v1739_v34 = vsub.f32 1.0, %v6030_v35  ;;  %v1740_v31 = vsub.f32 1.0, %v6033_v6  ;;  %v4898_v54 = vsel %vm1725_vm2, 1.0, %v7437_v1  ;;  %v1215_v42 = vadd.f32 %v1214_v50, %v1101_v12 }
 0x1e9   :  { %v1613_v0 = vadd.f32 %v5167_v36, %v1612_v20  ;;  %v1737_v58 = vsub.f32 1.0, %v4898_v54  ;;  %v1412_v39 = vsel %vm990_vm10, %v6063_v47, inf  ;;  %v1484_v60 = vsel %vm990_vm10, %v6063_v47, -inf }
 0x1ea   :  { %v6037_v48 = vmul.f32 %v1739_v34, %v1723_v5  ;;  %v6039_v40 = vmul.f32 %v1740_v31, %v1724_v51  ;;  %v6061_v10 = vadd.f32 %v1330_v21, %v1215_v42 }
 0x1eb   :  { %v1617_v31 = vsel %vm1616_vm5, %v5167_v36, %v1613_v0  ;;  %v5208_v0 = vld [vmem:[#allocation2 + $0x49] sm:$0xff] }
 0x1ec   :  { %v1622_v11 = vsel %vm1619_vm6, %v1621_v14, %v1617_v31  ;;  %v1413_v46 = vsel %vm990_vm10, %v6061_v10, inf  ;;  %v1485_v2 = vsel %vm990_vm10, %v6061_v10, -inf  ;;  %v4941_v31 = vld [vmem:[%s7433_s3 + $0x28] sm:$0xff]  ;;  %v4906_v14 = vld [vmem:[%s7433_s3 + $0x10] sm:$0xff] }
 0x1ed   :  { %v1414_v23 = vmin.f32 %v1412_v39, %v1413_v46  ;;  %v1486_v25 = vmax.f32 %v1484_v60, %v1485_v2  ;;  %2289 = vmatpush.msra.mxu0 %v4941_v31 }
 0x1ef   :  { %v1487_v8 = vrot.slane %v1486_v25, 4 }
 0x1f1   :  { %v1488_v30 = vmax.f32 %v1486_v25, %v1487_v8  ;;  %v5209_v25 = vld [vmem:[#allocation2 + $0x61] sm:$0xff] }
 0x1f3   :  { %v1489_v24 = vrot.slane %v1488_v30, 2 }
 0x1f5   :  { %v1490_v28 = vmax.f32 %v1488_v30, %v1489_v24 }
 0x1f7   :  { %v1491_v20 = vrot.slane %v1490_v28, 1 }
 0x1fa   :  { %v1786_v7 = vpop.permute.xlu0 %1785 }
 0x1fb   :  { %v1833_v3 = vadd.f32 %v5202_v27, %v1786_v7  ;;  %v1649_v7 = vmul.f32 %v1622_v11, %v1505_v63  ;;  %v1741_v27 = vmul.f32 %v1737_v58, %v1721_v17 }
 0x1fd   :  { %v1849_v45 = vmul.f32 0.5, %v1833_v3  ;;  %v1745_v26 = vsub.f32 %v1649_v7, %v1741_v27 }
 0x1ff   :  { %1881 = vrot.lane.b32.xlu0 %v1849_v45, %s5260_s20  ;;  %v1749_v36 = vmul.f32 0.5, %v1745_v26 }
 0x202   :  { %v1788_v16 = vpop.permute.xlu0 %1787 }
 0x203   :  { %v1834_v29 = vadd.f32 %v5203_v38, %v1788_v16  ;;  %v1415_v16 = vrot.slane %v1414_v23, 4  ;;  %v5207_v38 = vld [vmem:[#allocation2 + $0x39] sm:$0xff] }
 0x205   :  { %v1850_v15 = vmul.f32 0.5, %v1834_v29 }
 0x207   :  { %1799 = vrot.lane.b32.xlu0 %v6022_v55, %s5259_s2  ;;  %1883 = vrot.lane.b32.xlu2 %v1850_v15, %s5260_s20  ;;  %v1714_v55 = vsub.f32 %v1646_v33, %v5983_v9  ;;  %v1416_v15 = vmin.f32 %v1414_v23, %v1415_v16  ;;  %v1506_v33 = vsub.f32 %v6007_v41, %v6044_v56 }
 0x209   :  { %v1718_v51 = vmul.f32 0.5, %v1714_v55  ;;  %v1417_v17 = vrot.slane %v1416_v15, 2  ;;  %v1650_v55 = vmul.f32 %v1622_v11, %v1506_v33  ;;  %v4940_v11 = vld [vmem:[%s7433_s3 + $0x20] sm:$0xff] }
 0x20a   :  { %2290 = vmatpush.msra.mxu0 %v4940_v11 }
 0x20b   :  { %v1722_v44 = vadd.f32 %v1718_v51, %v5983_v9  ;;  %v5206_v9 = vld [vmem:[#allocation2 + $0x21] sm:$0xff]  ;;  %v1418_v32 = vmin.f32 %v1416_v15, %v1417_v17  ;;  %v4907_v51 = vld [vmem:[%s7433_s3 + $0x18] sm:$0xff] }
 0x20c   :  { %2060 = vmatpush.msrb.mxu2 %v4907_v51 }
 0x20d   :  { %vm1726_vm7 = vcmp.ge.f32.partialorder %v1722_v44, 0.5 }
 0x20e   :  { %v4899_v62 = vsel %vm1726_vm7, 1.0, %v7437_v1  ;;  %2061 = vmatpush.msrb.mxu2 %v4906_v14 }
 0x20f   :  { %1801 = vrot.lane.b32.xlu2 %v4898_v54, %s5259_s2  ;;  %v1419_v54 = vrot.slane %v1418_v32, 1  ;;  %v1738_v12 = vsub.f32 1.0, %v4899_v62 }
 0x211   :  { %v1794_v4 = vpop.permute.xlu2 %1793  ;;  %v1742_v50 = vmul.f32 %v1738_v12, %v1722_v44  ;;  %v1993_v44 = vld [vmem:[%s7433_s3] sm:$0xff] }
 0x212   :  { %v1837_v59 = vadd.f32 %v5204_v61, %v1794_v4  ;;  %v1790_v19 = vpop.permute.xlu1 %1789  ;;  %v1492_v4 = vmax.f32 %v1490_v28, %v1491_v20  ;;  %2174 = vmatpush.msrb.mxu3 %v1993_v44 }
 0x213   :  { %v1835_v5 = vadd.f32 %v5205_v18, %v1790_v19  ;;  %v1746_v61 = vsub.f32 %v1650_v55, %v1742_v50 }
 0x214   :  { %v1853_v22 = vmul.f32 0.5, %v1837_v59 }
 0x215   :  { %v1851_v34 = vmul.f32 0.5, %v1835_v5  ;;  %v1750_v19 = vmul.f32 0.5, %v1746_v61 }
 0x217   :  { %1889 = vrot.lane.b32.xlu2 %v1853_v22, %s5260_s20  ;;  %1885 = vrot.lane.b32.xlu1 %v1851_v34, %s5260_s20  ;;  %v1754_v18 = vadd.f32 %v1750_v19, %v1742_v50 }
 0x219   :  { %v1796_v45 = vpop.permute.xlu2 %1795  ;;  %vm1758_vm9 = vcmp.ge.f32.partialorder %v1754_v18, 0.5  ;;  %v5213_v18 = vld [vmem:[#allocation2 + $0x79] sm:$0xff] }
 0x21a   :  { %v1792_v13 = vpop.permute.xlu1 %1791  ;;  %v1838_v29 = vadd.f32 %v5207_v38, %v1796_v45  ;;  %v4903_v41 = vsel %vm1758_vm9, 1.0, %v7437_v1 }
 0x21b   :  { %v1836_v57 = vadd.f32 %v5206_v9, %v1792_v13 }
 0x21c   :  { %v1854_v53 = vmul.f32 0.5, %v1838_v29 }
 0x21d   :  { %v1852_v3 = vmul.f32 0.5, %v1836_v57 }
 0x21f   :  { %1807 = vrot.lane.b32.xlu2 %v6033_v6, %s5259_s2  ;;  %1887 = vrot.lane.b32.xlu0 %v1852_v3, %s5260_s20  ;;  %v1753_v6 = vadd.f32 %v1749_v36, %v1741_v27 }
 0x220   :  { %1803 = vrot.lane.b32.xlu1 %v4899_v62, %s5259_s2 }
 0x221   :  { %vm1757_vm8 = vcmp.ge.f32.partialorder %v1753_v6, 0.5 }
 0x222   :  { %v4902_v52 = vsel %vm1757_vm8, 1.0, %v7437_v1 }
 0x227   :  { %1805 = vrot.lane.b32.xlu0 %v6030_v35, %s5259_s2  ;;  %v1420_v35 = vmin.f32 %v1418_v32, %v1419_v54 }
 0x228   :  { %1891 = vrot.lane.b32.xlu1 %v1854_v53, %s5260_s20  ;;  %v5210_v53 = vld [vmem:[#allocation2 + $0x51] sm:$0xff] }
 0x229   :  { %v1516_v59 = vsub.f32 %v1492_v4, %v1420_v35  ;;  %v1508_v60 = vsub.f32 %v6061_v10, %v1420_v35  ;;  %v1507_v26 = vsub.f32 %v6063_v47, %v1420_v35  ;;  %v5211_v35 = vld [vmem:[#allocation2 + $0x69] sm:$0xff] }
 0x22b   :  { %v1524_v22 = vadd.f32 1e-12, %v1516_v59  ;;  %v5212_v59 = vld [vmem:[#allocation2 + $0x81] sm:$0xff] }
 0x22d   :  { %5168 = vrcp.f32 %v1524_v22  ;;  %v1634_v2 = vand.u32 2147483648, %v1524_v22  ;;  %vm1628_vm12 = vweird.f32 %v1524_v22  ;;  %v1632_v58 = vand.u32 2147483647, %v1524_v22 }
 0x22f   :  { %v1635_v39 = vor.u32 1.1754944e-38, %v1634_v2  ;;  %vm1633_vm14 = vcmp.eq.f32.partialorder %v1632_v58, 8.507059e+37 }
 0x230   :  { %1809 = vrot.lane.b32.xlu1 %v4902_v52, %s5259_s2 }
 0x233   :  { %v5169_v56 = vpop.eup %5168 }
 0x234   :  { %v1624_v5 = vmul.f32 %v5169_v56, %v1524_v22  ;;  %vm1629_vm11 = vweird.f32 %v5169_v56 }
 0x235   :  { %vm1630_vm13 = vmor %vm1628_vm12, %vm1629_vm11 }
 0x236   :  { %v1625_v21 = vsub.f32 1.0, %v1624_v5 }
 0x238   :  { %v1626_v34 = vmul.f32 %v5169_v56, %v1625_v21 }
 0x239   :  { %v1798_v42 = vpop.permute.xlu1 %1797 }
 0x23a   :  { %v1839_v49 = vadd.f32 %v5208_v0, %v1798_v42  ;;  %v1627_v46 = vadd.f32 %v5169_v56, %v1626_v34  ;;  %v5214_v34 = vld [vmem:[#allocation2 + $0x91] sm:$0xff] }
 0x23c   :  { %v1855_v37 = vmul.f32 0.5, %v1839_v49  ;;  %v1631_v63 = vsel %vm1630_vm13, %v5169_v56, %v1627_v46 }
 0x23d   :  { %v1636_v13 = vsel %vm1633_vm14, %v1635_v39, %v1631_v63 }
 0x23e   :  { %1893 = vrot.lane.b32.xlu0 %v1855_v37, %s5260_s20  ;;  %v1652_v57 = vmul.f32 %v1636_v13, %v1508_v60  ;;  %v1651_v10 = vmul.f32 %v1636_v13, %v1507_v26  ;;  %v5216_v26 = vld [vmem:[#allocation2 + $0xa9] sm:$0xff] }
 0x240   :  { %v1748_v7 = vsub.f32 %v1652_v57, %v6039_v40  ;;  %v1747_v29 = vsub.f32 %v1651_v10, %v6037_v48 }
 0x242   :  { %v1752_v3 = vmul.f32 0.5, %v1748_v7  ;;  %v1751_v6 = vmul.f32 0.5, %v1747_v29 }
 0x244   :  { %v1756_v62 = vadd.f32 %v1752_v3, %v6039_v40  ;;  %v1755_v24 = vadd.f32 %v1751_v6, %v6037_v48 }
 0x246   :  { %1811 = vrot.lane.b32.xlu0 %v4903_v41, %s5259_s2  ;;  %vm1760_vm15 = vcmp.ge.f32.partialorder %v1756_v62, 0.5  ;;  %vm1759_vm0 = vcmp.ge.f32.partialorder %v1755_v24, 0.5 }
 0x247   :  { %v4905_v38 = vsel %vm1760_vm15, 1.0, %v7437_v1  ;;  %v4904_v33 = vsel %vm1759_vm0, 1.0, %v7437_v1 }
 0x261   :  { %v1884_v9 = vpop.permute.xlu2 %1883 }
 0x262   :  { %1930 = vst.msk [vmem:[#allocation2 + $0x9] sm:$0xff] %vm990_vm10, %v1884_v9  ;;  %v5215_v9 = vld [vmem:[#allocation2 + $0x99] sm:$0xff] }
 0x269   :  { %v1802_v23 = vpop.permute.xlu2 %1801  ;;  %v1962_v32 = vld [vmem:[#allocation2 + $0x9] sm:$0xff] }
 0x26a   :  { %v1841_v27 = vadd.f32 %v5209_v25, %v1802_v23  ;;  %v1978_v52 = vld [vmem:[#allocation2 + $0xa] sm:$0xff] }
 0x26c   :  { %v1857_v45 = vmul.f32 0.5, %v1841_v27 }
 0x26e   :  { %1897 = vrot.lane.b32.xlu1 %v1857_v45, %s5260_s20 }
 0x271   :  { %v1882_v16 = vpop.permute.xlu0 %1881  ;;  %v1890_v8 = vpop.permute.xlu2 %1889 }
 0x272   :  { %1929 = vst.msk [vmem:[#allocation2 + $0x1] sm:$0xff] %vm990_vm10, %v1882_v16 }
 0x273   :  { %1933 = vst.msk [vmem:[#allocation2 + $0x31] sm:$0xff] %vm990_vm10, %v1890_v8 }
 0x276   :  { %1815 = vrot.lane.b32.xlu1 %v4905_v38, %s5259_s2 }
 0x279   :  { %v1800_v36 = vpop.permute.xlu0 %1799  ;;  %v1961_v15 = vld [vmem:[#allocation2 + $0x1] sm:$0xff]  ;;  %v1808_v61 = vpop.permute.xlu2 %1807 }
 0x27a   :  { %v1945_v30 = vld [vmem:[#allocation2] sm:$0xff]  ;;  %v1840_v47 = vadd.f32 %v5210_v53, %v1800_v36  ;;  %4908 = vmatmul.msk.f32.vlgmr.msrb.gmra.mxu2 %vm990_vm10, %v1961_v15  ;;  %v1946_v28 = vld [vmem:[#allocation2 + $0x8] sm:$0xff]  ;;  %v1844_v42 = vadd.f32 %v5212_v59, %v1808_v61  ;;  %v1965_v43 = vld [vmem:[#allocation2 + $0x31] sm:$0xff] }
 0x27b   :  { %v1977_v40 = vld [vmem:[#allocation2 + $0x2] sm:$0xff]  ;;  %4924 = vmatmul.msk.f32.vlgmr.msrb.gmra.mxu3 %vm990_vm10, %v1945_v30  ;;  %v1949_v21 = vld [vmem:[#allocation2 + $0x30] sm:$0xff] }
 0x27c   :  { %4942 = vmatmul.msk.f32.vlgmr.msra.gmra.mxu0 %vm990_vm10, %v1977_v40  ;;  %v1856_v17 = vmul.f32 0.5, %v1840_v47  ;;  %v1860_v56 = vmul.f32 0.5, %v1844_v42  ;;  %v5217_v36 = vld [vmem:[#allocation2 + $0xb1] sm:$0xff] }
 0x27e   :  { %1895 = vrot.lane.b32.xlu2 %v1856_v17, %s5260_s20 }
 0x282   :  { %4909 = vmatmul.msk.f32.gmra.mxu2 %vm990_vm10, %v1962_v32 }
 0x283   :  { %4925 = vmatmul.msk.f32.gmra.mxu3 %vm990_vm10, %v1946_v28 }
 0x284   :  { %4943 = vmatmul.msk.f32.gmra.mxu0 %vm990_vm10, %v1978_v52 }
 0x286   :  { %1813 = vrot.lane.b32.xlu2 %v4904_v33, %s5259_s2 }
 0x289   :  { %v1886_v54 = vpop.permute.xlu1 %1885 }
 0x28a   :  { %1931 = vst.msk [vmem:[#allocation2 + $0x19] sm:$0xff] %vm990_vm10, %v1886_v54 }
 0x291   :  { %v1888_v20 = vpop.permute.xlu0 %1887  ;;  %v1963_v48 = vld [vmem:[#allocation2 + $0x19] sm:$0xff] }
 0x292   :  { %v1804_v12 = vpop.permute.xlu1 %1803  ;;  %v1947_v55 = vld [vmem:[#allocation2 + $0x18] sm:$0xff]  ;;  %1932 = vst.msk [vmem:[#allocation2 + $0x21] sm:$0xff] %vm990_vm10, %v1888_v20  ;;  %4910 = vmatmul.msk.f32.gmra.mxu2 %vm990_vm10, %v1963_v48 }
 0x293   :  { %v1842_v4 = vadd.f32 %v5211_v35, %v1804_v12  ;;  %4926 = vmatmul.msk.f32.gmra.mxu3 %vm990_vm10, %v1947_v55 }
 0x295   :  { %v1858_v50 = vmul.f32 0.5, %v1842_v4 }
 0x297   :  { %1899 = vrot.lane.b32.xlu0 %v1858_v50, %s5260_s20 }
 0x299   :  { %v1806_v0 = vpop.permute.xlu0 %1805  ;;  %v1964_v19 = vld [vmem:[#allocation2 + $0x21] sm:$0xff] }
 0x29a   :  { %v1892_v49 = vpop.permute.xlu1 %1891  ;;  %v1948_v22 = vld [vmem:[#allocation2 + $0x20] sm:$0xff]  ;;  %v1843_v41 = vadd.f32 %v5213_v18, %v1806_v0  ;;  %4911 = vmatmul.msk.f32.gmra.mxu2 %vm990_vm10, %v1964_v19 }
 0x29b   :  { %v1979_v37 = vld [vmem:[#allocation2 + $0x1a] sm:$0xff]  ;;  %1934 = vst.msk [vmem:[#allocation2 + $0x39] sm:$0xff] %vm990_vm10, %v1892_v49  ;;  %4927 = vmatmul.msk.f32.gmra.mxu3 %vm990_vm10, %v1948_v22  ;;  %v1980_v14 = vld [vmem:[#allocation2 + $0x22] sm:$0xff] }
 0x29c   :  { %4944 = vmatmul.msk.f32.gmra.mxu0 %vm990_vm10, %v1979_v37  ;;  %v1859_v5 = vmul.f32 0.5, %v1843_v41 }
 0x29e   :  { %1901 = vrot.lane.b32.xlu2 %v1859_v5, %s5260_s20 }
 0x29f   :  { %1903 = vrot.lane.b32.xlu0 %v1860_v56, %s5260_s20 }
 0x2a2   :  { %v1810_v51 = vpop.permute.xlu1 %1809  ;;  %4912 = vmatmul.msk.f32.gmra.mxu2 %vm990_vm10, %v1965_v43  ;;  %v1966_v11 = vld [vmem:[#allocation2 + $0x39] sm:$0xff] }
 0x2a3   :  { %v1845_v31 = vadd.f32 %v5214_v34, %v1810_v51  ;;  %4928 = vmatmul.msk.f32.gmra.mxu3 %vm990_vm10, %v1949_v21  ;;  %v1950_v46 = vld [vmem:[#allocation2 + $0x38] sm:$0xff] }
 0x2a4   :  { %4945 = vmatmul.msk.f32.gmra.mxu0 %vm990_vm10, %v1980_v14  ;;  %v1981_v2 = vld [vmem:[#allocation2 + $0x32] sm:$0xff]  ;;  %v1982_v63 = vld [vmem:[#allocation2 + $0x3a] sm:$0xff] }
 0x2a5   :  { %v1861_v44 = vmul.f32 0.5, %v1845_v31 }
 0x2a7   :  { %1905 = vrot.lane.b32.xlu1 %v1861_v44, %s5260_s20 }
 0x2aa   :  { %4913 = vmatmul.msk.f32.gmra.mxu2 %vm990_vm10, %v1966_v11 }
 0x2ab   :  { %4929 = vmatmul.msk.f32.gmra.mxu3 %vm990_vm10, %v1950_v46 }
 0x2ac   :  { %4946 = vmatmul.msk.f32.gmra.mxu0 %vm990_vm10, %v1981_v2 }
 0x2b0   :  { %v1894_v58 = vpop.permute.xlu0 %1893 }
 0x2b1   :  { %1935 = vst.msk [vmem:[#allocation2 + $0x49] sm:$0xff] %vm990_vm10, %v1894_v58 }
 0x2b4   :  { %4947 = vmatmul.msk.f32.gmra.mxu0 %vm990_vm10, %v1982_v63 }
 0x2b8   :  { %v1812_v39 = vpop.permute.xlu0 %1811  ;;  %v1967_v13 = vld [vmem:[#allocation2 + $0x49] sm:$0xff] }
 0x2b9   :  { %v1951_v60 = vld [vmem:[#allocation2 + $0x48] sm:$0xff]  ;;  %v1846_v57 = vadd.f32 %v5215_v9, %v1812_v39  ;;  %4914 = vmatmul.msk.f32.gmra.mxu2 %vm990_vm10, %v1967_v13 }
 0x2ba   :  { %4930 = vmatmul.msk.f32.gmra.mxu3 %vm990_vm10, %v1951_v60 }
 0x2bb   :  { %v1862_v7 = vmul.f32 0.5, %v1846_v57 }
 0x2bd   :  { %1907 = vrot.lane.b32.xlu2 %v1862_v7, %s5260_s20 }
 0x2d8   :  { %v1896_v23 = vpop.permute.xlu2 %1895 }
 0x2d9   :  { %1936 = vst.msk [vmem:[#allocation2 + $0x51] sm:$0xff] %vm990_vm10, %v1896_v23 }
 0x2e0   :  { %v1814_v25 = vpop.permute.xlu2 %1813  ;;  %v1898_v27 = vpop.permute.xlu1 %1897  ;;  %v1968_v3 = vld [vmem:[#allocation2 + $0x51] sm:$0xff] }
 0x2e1   :  { %v1952_v45 = vld [vmem:[#allocation2 + $0x50] sm:$0xff]  ;;  %v1847_v16 = vadd.f32 %v5216_v26, %v1814_v25  ;;  %1937 = vst.msk [vmem:[#allocation2 + $0x61] sm:$0xff] %vm990_vm10, %v1898_v27  ;;  %4915 = vmatmul.msk.f32.gmra.mxu2 %vm990_vm10, %v1968_v3 }
 0x2e2   :  { %v1983_v62 = vld [vmem:[#allocation2 + $0x4a] sm:$0xff]  ;;  %4931 = vmatmul.msk.f32.gmra.mxu3 %vm990_vm10, %v1952_v45  ;;  %v1984_v30 = vld [vmem:[#allocation2 + $0x52] sm:$0xff] }
 0x2e3   :  { %4948 = vmatmul.msk.f32.gmra.mxu0 %vm990_vm10, %v1983_v62  ;;  %v1863_v8 = vmul.f32 0.5, %v1847_v16 }
 0x2e5   :  { %1909 = vrot.lane.b32.xlu0 %v1863_v8, %s5260_s20 }
 0x2e8   :  { %v1816_v10 = vpop.permute.xlu1 %1815  ;;  %v1969_v38 = vld [vmem:[#allocation2 + $0x61] sm:$0xff] }
 0x2e9   :  { %v1953_v29 = vld [vmem:[#allocation2 + $0x60] sm:$0xff]  ;;  %v1848_v15 = vadd.f32 %v5217_v36, %v1816_v10  ;;  %4916 = vmatmul.msk.f32.gmra.mxu2 %vm990_vm10, %v1969_v38 }
 0x2ea   :  { %4932 = vmatmul.msk.f32.gmra.mxu3 %vm990_vm10, %v1953_v29 }
 0x2eb   :  { %4949 = vmatmul.msk.f32.gmra.mxu0 %vm990_vm10, %v1984_v30  ;;  %v1864_v40 = vmul.f32 0.5, %v1848_v15  ;;  %v4975_v30 = vld [vmem:[%s7434_s4 + $0x18] sm:$0xff] }
 0x2ec   :  { %2907 = vmatpush.msra.mxu1 %v4975_v30 }
 0x2ed   :  { %1911 = vrot.lane.b32.xlu1 %v1864_v40, %s5260_s20 }
 0x2f8   :  { %v1902_v53 = vpop.permute.xlu2 %1901 }
 0x2f9   :  { %1939 = vst.msk [vmem:[#allocation2 + $0x79] sm:$0xff] %vm990_vm10, %v1902_v53  ;;  %v2292_v47 = vpop.f32.mrf.mxu0 }
 0x2fd   :  { %v2063_v6 = vpop.f32.mrf.mxu2 }
 0x2fe   :  { %v2176_v17 = vpop.f32.mrf.mxu3 }
 0x2ff   :  { %v2177_v24 = vadd.f32 %v2176_v17, %v2063_v6 }
 0x300   :  { %v1971_v39 = vld [vmem:[#allocation2 + $0x79] sm:$0xff] }
 0x301   :  { %v6165_v52 = vadd.f32 %v2292_v47, %v2177_v24  ;;  %v2295_v54 = vpop.f32.mrf.mxu0  ;;  %v1955_v13 = vld [vmem:[#allocation2 + $0x78] sm:$0xff] }
 0x303   :  { %v2356_v12 = vsel %vm24_vm1, %v6165_v52, inf  ;;  %v2428_v48 = vsel %vm24_vm1, %v6165_v52, -inf }
 0x305   :  { %v2066_v32 = vpop.f32.mrf.mxu2 }
 0x306   :  { %v2179_v28 = vpop.f32.mrf.mxu3 }
 0x307   :  { %v2180_v33 = vadd.f32 %v2179_v28, %v2066_v32  ;;  %v4974_v28 = vld [vmem:[%s7434_s4 + $0x10] sm:$0xff] }
 0x308   :  { %2908 = vmatpush.msra.mxu1 %v4974_v28 }
 0x309   :  { %v6167_v20 = vadd.f32 %v2295_v54, %v2180_v33  ;;  %v1900_v4 = vpop.permute.xlu0 %1899 }
 0x30a   :  { %1938 = vst.msk [vmem:[#allocation2 + $0x69] sm:$0xff] %vm990_vm10, %v1900_v4 }
 0x30b   :  { %v2357_v55 = vsel %vm24_vm1, %v6167_v20, inf  ;;  %v2429_v35 = vsel %vm24_vm1, %v6167_v20, -inf }
 0x30c   :  { %v2358_v50 = vmin.f32 %v2356_v12, %v2357_v55  ;;  %v2430_v61 = vmax.f32 %v2428_v48, %v2429_v35 }
 0x30e   :  { %v2359_v59 = vrot.slane %v2358_v50, 4  ;;  %v2431_v42 = vrot.slane %v2430_v61, 4 }
 0x310   :  { %v2360_v0 = vmin.f32 %v2358_v50, %v2359_v59  ;;  %v2432_v49 = vmax.f32 %v2430_v61, %v2431_v42 }
 0x311   :  { %v1904_v41 = vpop.permute.xlu0 %1903  ;;  %v1970_v56 = vld [vmem:[#allocation2 + $0x69] sm:$0xff] }
 0x312   :  { %v2361_v19 = vrot.slane %v2360_v0, 2  ;;  %v2433_v22 = vrot.slane %v2432_v49, 2  ;;  %v1954_v5 = vld [vmem:[#allocation2 + $0x68] sm:$0xff]  ;;  %1940 = vst.msk [vmem:[#allocation2 + $0x81] sm:$0xff] %vm990_vm10, %v1904_v41  ;;  %4917 = vmatmul.msk.f32.gmra.mxu2 %vm990_vm10, %v1970_v56 }
 0x313   :  { %v1985_v51 = vld [vmem:[#allocation2 + $0x62] sm:$0xff]  ;;  %4933 = vmatmul.msk.f32.gmra.mxu3 %vm990_vm10, %v1954_v5  ;;  %v1986_v60 = vld [vmem:[#allocation2 + $0x6a] sm:$0xff] }
 0x314   :  { %v2362_v37 = vmin.f32 %v2360_v0, %v2361_v19  ;;  %v2434_v18 = vmax.f32 %v2432_v49, %v2433_v22  ;;  %4950 = vmatmul.msk.f32.gmra.mxu0 %vm990_vm10, %v1985_v51 }
 0x315   :  { %v2069_v14 = vpop.f32.mrf.mxu2 }
 0x316   :  { %v2363_v43 = vrot.slane %v2362_v37, 1  ;;  %v2435_v21 = vrot.slane %v2434_v18, 1  ;;  %v2182_v44 = vpop.f32.mrf.mxu3 }
 0x317   :  { %v1908_v46 = vpop.permute.xlu2 %1907  ;;  %v2183_v9 = vadd.f32 %v2182_v44, %v2069_v14 }
 0x318   :  { %v6182_v34 = vmin.f32 %v2362_v37, %v2363_v43  ;;  %v2436_v31 = vmax.f32 %v2434_v18, %v2435_v21  ;;  %1942 = vst.msk [vmem:[#allocation2 + $0x99] sm:$0xff] %vm990_vm10, %v1908_v46 }
 0x319   :  { %v2298_v58 = vpop.f32.mrf.mxu0  ;;  %v1906_v63 = vpop.permute.xlu1 %1905  ;;  %v1972_v45 = vld [vmem:[#allocation2 + $0x81] sm:$0xff] }
 0x31a   :  { %v2516_v11 = vsub.f32 %v2436_v31, %v6182_v34  ;;  %1941 = vst.msk [vmem:[#allocation2 + $0x91] sm:$0xff] %vm990_vm10, %v1906_v63  ;;  %4918 = vmatmul.msk.f32.gmra.mxu2 %vm990_vm10, %v1971_v39  ;;  %v6190_v23 = vadd.f32 %v2298_v58, %v2183_v9  ;;  %v1956_v62 = vld [vmem:[#allocation2 + $0x80] sm:$0xff]  ;;  %v2500_v59 = vsub.f32 %v6165_v52, %v6182_v34 }
 0x31b   :  { %4934 = vmatmul.msk.f32.gmra.mxu3 %vm990_vm10, %v1955_v13  ;;  %v1987_v8 = vld [vmem:[#allocation2 + $0x7a] sm:$0xff]  ;;  %v2501_v42 = vsub.f32 %v6167_v20, %v6182_v34  ;;  %v1988_v49 = vld [vmem:[#allocation2 + $0x82] sm:$0xff] }
 0x31c   :  { %v2524_v2 = vadd.f32 1e-12, %v2516_v11  ;;  %4951 = vmatmul.msk.f32.gmra.mxu0 %vm990_vm10, %v1986_v60  ;;  %v2365_v10 = vsel %vm24_vm1, %v6190_v23, inf  ;;  %v2437_v29 = vsel %vm24_vm1, %v6190_v23, -inf }
 0x31d   :  { %v2072_v57 = vpop.f32.mrf.mxu2 }
 0x31e   :  { %5170 = vrcp.f32 %v2524_v2  ;;  %v2185_v7 = vpop.f32.mrf.mxu3  ;;  %v2543_v40 = vand.u32 2147483648, %v2524_v2  ;;  %v2541_v17 = vand.u32 2147483647, %v2524_v2  ;;  %vm2537_vm3 = vweird.f32 %v2524_v2 }
 0x31f   :  { %v2186_v25 = vadd.f32 %v2185_v7, %v2072_v57  ;;  %v1974_v39 = vld [vmem:[#allocation2 + $0x99] sm:$0xff] }
 0x320   :  { %v2544_v48 = vor.u32 1.1754944e-38, %v2543_v40  ;;  %vm2542_vm5 = vcmp.eq.f32.partialorder %v2541_v17, 8.507059e+37 }
 0x321   :  { %v2301_v3 = vpop.f32.mrf.mxu0  ;;  %v1973_v50 = vld [vmem:[#allocation2 + $0x91] sm:$0xff] }
 0x322   :  { %v6192_v16 = vadd.f32 %v2301_v3, %v2186_v25  ;;  %4919 = vmatmul.msk.f32.gmra.mxu2 %vm990_vm10, %v1972_v45  ;;  %v1957_v61 = vld [vmem:[#allocation2 + $0x90] sm:$0xff]  ;;  %v1958_v13 = vld [vmem:[#allocation2 + $0x98] sm:$0xff] }
 0x323   :  { %4935 = vmatmul.msk.f32.gmra.mxu3 %vm990_vm10, %v1956_v62  ;;  %v1989_v9 = vld [vmem:[#allocation2 + $0x92] sm:$0xff] }
 0x324   :  { %v5171_v27 = vpop.eup %5170  ;;  %4952 = vmatmul.msk.f32.gmra.mxu0 %vm990_vm10, %v1987_v8  ;;  %v2366_v36 = vsel %vm24_vm1, %v6192_v16, inf  ;;  %v2438_v15 = vsel %vm24_vm1, %v6192_v16, -inf }
 0x325   :  { %v2533_v26 = vmul.f32 %v5171_v27, %v2524_v2  ;;  %v2367_v53 = vmin.f32 %v2365_v10, %v2366_v36  ;;  %v2439_v47 = vmax.f32 %v2437_v29, %v2438_v15  ;;  %vm2538_vm2 = vweird.f32 %v5171_v27  ;;  %v2075_v24 = vpop.f32.mrf.mxu2  ;;  %v1990_v15 = vld [vmem:[#allocation2 + $0x9a] sm:$0xff] }
 0x326   :  { %v2188_v32 = vpop.f32.mrf.mxu3  ;;  %vm2539_vm4 = vmor %vm2537_vm3, %vm2538_vm2 }
 0x327   :  { %v2534_v38 = vsub.f32 1.0, %v2533_v26  ;;  %v2368_v33 = vrot.slane %v2367_v53, 4  ;;  %v2440_v54 = vrot.slane %v2439_v47, 4  ;;  %v2189_v56 = vadd.f32 %v2188_v32, %v2075_v24 }
 0x329   :  { %v2535_v6 = vmul.f32 %v5171_v27, %v2534_v38  ;;  %v2369_v55 = vmin.f32 %v2367_v53, %v2368_v33  ;;  %v2441_v35 = vmax.f32 %v2439_v47, %v2440_v54  ;;  %v2304_v4 = vpop.f32.mrf.mxu0 }
 0x32a   :  { %4920 = vmatmul.msk.f32.gmra.mxu2 %vm990_vm10, %v1973_v50  ;;  %v6224_v44 = vadd.f32 %v2304_v4, %v2189_v56 }
 0x32b   :  { %v2536_v12 = vadd.f32 %v5171_v27, %v2535_v6  ;;  %4936 = vmatmul.msk.f32.gmra.mxu3 %vm990_vm10, %v1957_v61  ;;  %v2370_v22 = vrot.slane %v2369_v55, 2  ;;  %v2442_v37 = vrot.slane %v2441_v35, 2  ;;  %v2841_v61 = vld [vmem:[%s7434_s4 + $0x8] sm:$0xff] }
 0x32c   :  { %4953 = vmatmul.msk.f32.gmra.mxu0 %vm990_vm10, %v1988_v49  ;;  %v2374_v7 = vsel %vm24_vm1, %v6224_v44, inf  ;;  %v2446_v25 = vsel %vm24_vm1, %v6224_v44, -inf  ;;  %3020 = vmatpush.msra.mxu2 %v2841_v61 }
 0x32d   :  { %v2540_v0 = vsel %vm2539_vm4, %v5171_v27, %v2536_v12  ;;  %v2371_v5 = vmin.f32 %v2369_v55, %v2370_v22  ;;  %v2443_v52 = vmax.f32 %v2441_v35, %v2442_v37  ;;  %v2078_v43 = vpop.f32.mrf.mxu2 }
 0x32e   :  { %v2545_v19 = vsel %vm2542_vm5, %v2544_v48, %v2540_v0  ;;  %v2191_v21 = vpop.f32.mrf.mxu3 }
 0x32f   :  { %v2644_v18 = vmul.f32 %v2545_v19, %v2500_v59  ;;  %v2645_v41 = vmul.f32 %v2545_v19, %v2501_v42  ;;  %v2372_v34 = vrot.slane %v2371_v5, 1  ;;  %v2444_v31 = vrot.slane %v2443_v52, 1  ;;  %v5009_v59 = vld [vmem:[%s7434_s4 + $0x28] sm:$0xff] }
 0x330   :  { %v2192_v14 = vadd.f32 %v2191_v21, %v2078_v43  ;;  %3136 = vmatpush.msra.mxu3 %v5009_v59 }
 0x331   :  { %v6218_v51 = vmul.f32 0.5, %v2644_v18  ;;  %v6220_v20 = vmul.f32 0.5, %v2645_v41  ;;  %v6232_v2 = vmin.f32 %v2371_v5, %v2372_v34  ;;  %v2445_v58 = vmax.f32 %v2443_v52, %v2444_v31  ;;  %v2307_v63 = vpop.f32.mrf.mxu0 }
 0x332   :  { %v6236_v60 = vadd.f32 %v2307_v63, %v2192_v14  ;;  %4921 = vmatmul.msk.f32.gmra.mxu2 %vm990_vm10, %v1974_v39 }
 0x333   :  { %vm2668_vm6 = vcmp.ge.f32.partialorder %v6218_v51, 0.5  ;;  %vm2669_vm7 = vcmp.ge.f32.partialorder %v6220_v20, 0.5  ;;  %4937 = vmatmul.msk.f32.gmra.mxu3 %vm990_vm10, %v1958_v13  ;;  %v2517_v57 = vsub.f32 %v2445_v58, %v6232_v2  ;;  %v2502_v42 = vsub.f32 %v6190_v23, %v6232_v2 }
 0x334   :  { %v6227_v11 = vsel %vm2668_vm6, 1.0, %v7437_v1  ;;  %v6230_v46 = vsel %vm2669_vm7, 1.0, %v7437_v1  ;;  %4954 = vmatmul.msk.f32.gmra.mxu0 %vm990_vm10, %v1989_v9  ;;  %v2375_v27 = vsel %vm24_vm1, %v6236_v60, inf  ;;  %v2447_v3 = vsel %vm24_vm1, %v6236_v60, -inf }
 0x335   :  { %2776 = vst.msk [vmem:[#allocation2 + $0x1] sm:$0xff] %vm24_vm1, %v6227_v11  ;;  %v2525_v45 = vadd.f32 1e-12, %v2517_v57  ;;  %v2376_v62 = vmin.f32 %v2374_v7, %v2375_v27  ;;  %v2448_v26 = vmax.f32 %v2446_v25, %v2447_v3  ;;  %v2503_v49 = vsub.f32 %v6192_v16, %v6232_v2 }
 0x336   :  { %2777 = vst.msk [vmem:[#allocation2 + $0x9] sm:$0xff] %vm24_vm1, %v6230_v46  ;;  %v2680_v58 = vsub.f32 1.0, %v6227_v11  ;;  %v2681_v63 = vsub.f32 1.0, %v6230_v46 }
 0x337   :  { %5172 = vrcp.f32 %v2525_v45  ;;  %v2377_v8 = vrot.slane %v2376_v62, 4  ;;  %v2449_v10 = vrot.slane %v2448_v26, 4  ;;  %v2555_v33 = vand.u32 2147483647, %v2525_v45 }
 0x338   :  { %v2557_v54 = vand.u32 2147483648, %v2525_v45  ;;  %vm2551_vm9 = vweird.f32 %v2525_v45  ;;  %v2684_v11 = vmul.f32 %v2680_v58, %v6218_v51  ;;  %v2685_v46 = vmul.f32 %v2681_v63, %v6220_v20 }
 0x339   :  { %v2378_v29 = vmin.f32 %v2376_v62, %v2377_v8  ;;  %v2450_v36 = vmax.f32 %v2448_v26, %v2449_v10  ;;  %vm2556_vm12 = vcmp.eq.f32.partialorder %v2555_v33, 8.507059e+37  ;;  %v2840_v8 = vld [vmem:[%s7434_s4] sm:$0xff] }
 0x33a   :  { %v2558_v0 = vor.u32 1.1754944e-38, %v2557_v54  ;;  %3021 = vmatpush.msra.mxu2 %v2840_v8 }
 0x33b   :  { %v2379_v30 = vrot.slane %v2378_v29, 2  ;;  %v2451_v40 = vrot.slane %v2450_v36, 2 }
 0x33c   :  { %v2808_v38 = vld [vmem:[#allocation2 + $0x1] sm:$0xff]  ;;  %4955 = vmatmul.msk.f32.gmra.mxu0 %vm990_vm10, %v1990_v15  ;;  %v2081_v62 = vpop.f32.mrf.mxu2 }
 0x33d   :  { %4976 = vmatmul.msk.f32.vlgmr.msra.gmra.mxu1 %vm990_vm10, %v2808_v38  ;;  %v5173_v53 = vpop.eup %5172  ;;  %v2380_v6 = vmin.f32 %v2378_v29, %v2379_v30  ;;  %v2452_v17 = vmax.f32 %v2450_v36, %v2451_v40  ;;  %v2809_v12 = vld [vmem:[#allocation2 + $0x9] sm:$0xff]  ;;  %v2194_v26 = vpop.f32.mrf.mxu3 }
 0x33e   :  { %v2547_v47 = vmul.f32 %v5173_v53, %v2525_v45  ;;  %vm2552_vm8 = vweird.f32 %v5173_v53 }
 0x33f   :  { %v2381_v32 = vrot.slane %v2380_v6, 1  ;;  %v2453_v28 = vrot.slane %v2452_v17, 1  ;;  %vm2553_vm11 = vmor %vm2551_vm9, %vm2552_vm8 }
 0x340   :  { %v2548_v24 = vsub.f32 1.0, %v2547_v47 }
 0x341   :  { %v2382_v55 = vmin.f32 %v2380_v6, %v2381_v32  ;;  %v2454_v35 = vmax.f32 %v2452_v17, %v2453_v28  ;;  %v2195_v17 = vadd.f32 %v2194_v26, %v2081_v62 }
 0x342   :  { %v2549_v48 = vmul.f32 %v5173_v53, %v2548_v24 }
 0x343   :  { %v2518_v50 = vsub.f32 %v2454_v35, %v2382_v55  ;;  %v2504_v57 = vsub.f32 %v6224_v44, %v2382_v55  ;;  %v2505_v7 = vsub.f32 %v6236_v60, %v2382_v55  ;;  %v5008_v44 = vld [vmem:[%s7434_s4 + $0x20] sm:$0xff] }
 0x344   :  { %v2550_v4 = vadd.f32 %v5173_v53, %v2549_v48  ;;  %3137 = vmatpush.msra.mxu3 %v5008_v44 }
 0x345   :  { %4977 = vmatmul.msk.f32.gmra.mxu1 %vm990_vm10, %v2809_v12  ;;  %v2526_v22 = vadd.f32 1e-12, %v2518_v50 }
 0x346   :  { %v2554_v19 = vsel %vm2553_vm11, %v5173_v53, %v2550_v4 }
 0x347   :  { %v2559_v37 = vsel %vm2556_vm12, %v2558_v0, %v2554_v19  ;;  %5174 = vrcp.f32 %v2526_v22  ;;  %v2571_v34 = vand.u32 2147483648, %v2526_v22  ;;  %v2569_v14 = vand.u32 2147483647, %v2526_v22 }
 0x348   :  { %v2646_v18 = vmul.f32 %v2559_v37, %v2502_v42  ;;  %v2647_v41 = vmul.f32 %v2559_v37, %v2503_v49  ;;  %vm2565_vm0 = vweird.f32 %v2526_v22 }
 0x349   :  { %v2572_v9 = vor.u32 1.1754944e-38, %v2571_v34  ;;  %vm2570_vm3 = vcmp.eq.f32.partialorder %v2569_v14, 8.507059e+37  ;;  %v2824_v14 = vld [vmem:[#allocation2 + $0x2] sm:$0xff] }
 0x34a   :  { %v6265_v56 = vmul.f32 0.5, %v2646_v18  ;;  %v6267_v5 = vmul.f32 0.5, %v2647_v41 }
 0x34c   :  { %vm2670_vm13 = vcmp.ge.f32.partialorder %v6265_v56, 0.5  ;;  %vm2671_vm14 = vcmp.ge.f32.partialorder %v6267_v5, 0.5 }
 0x34d   :  { %v6272_v23 = vsel %vm2670_vm13, 1.0, %v7437_v1  ;;  %v6275_v16 = vsel %vm2671_vm14, 1.0, %v7437_v1  ;;  %v5175_v52 = vpop.eup %5174 }
 0x34e   :  { %2778 = vst.msk [vmem:[#allocation2 + $0x19] sm:$0xff] %vm24_vm1, %v6272_v23  ;;  %v2561_v43 = vmul.f32 %v5175_v52, %v2526_v22  ;;  %vm2566_vm15 = vweird.f32 %v5175_v52 }
 0x34f   :  { %2779 = vst.msk [vmem:[#allocation2 + $0x21] sm:$0xff] %vm24_vm1, %v6275_v16  ;;  %vm2567_vm2 = vmor %vm2565_vm0, %vm2566_vm15 }
 0x350   :  { %v2562_v21 = vsub.f32 1.0, %v2561_v43 }
 0x352   :  { %v2563_v31 = vmul.f32 %v5175_v52, %v2562_v21 }
 0x354   :  { %v2564_v2 = vadd.f32 %v5175_v52, %v2563_v31  ;;  %v2792_v31 = vld [vmem:[#allocation2] sm:$0xff] }
 0x355   :  { %v2810_v39 = vld [vmem:[#allocation2 + $0x19] sm:$0xff] }
 0x356   :  { %4978 = vmatmul.msk.f32.gmra.mxu1 %vm990_vm10, %v2810_v39  ;;  %v2568_v25 = vsel %vm2567_vm2, %v5175_v52, %v2564_v2  ;;  %v2811_v36 = vld [vmem:[#allocation2 + $0x21] sm:$0xff] }
 0x357   :  { %v1910_v13 = vpop.permute.xlu0 %1909  ;;  %v2573_v27 = vsel %vm2570_vm3, %v2572_v9, %v2568_v25  ;;  %v2826_v62 = vld [vmem:[#allocation2 + $0x1a] sm:$0xff] }
 0x358   :  { %1943 = vst.msk [vmem:[#allocation2 + $0xa9] sm:$0xff] %vm990_vm10, %v1910_v13  ;;  %v2648_v3 = vmul.f32 %v2573_v27, %v2504_v57  ;;  %v2649_v45 = vmul.f32 %v2573_v27, %v2505_v7  ;;  %v2793_v27 = vld [vmem:[#allocation2 + $0x8] sm:$0xff] }
 0x35a   :  { %v2688_v60 = vsub.f32 %v2648_v3, %v2684_v11  ;;  %v2689_v10 = vsub.f32 %v2649_v45, %v2685_v46  ;;  %v2825_v3 = vld [vmem:[#allocation2 + $0xa] sm:$0xff] }
 0x35c   :  { %v2692_v38 = vmul.f32 0.5, %v2688_v60  ;;  %v2693_v29 = vmul.f32 0.5, %v2689_v10  ;;  %v2795_v10 = vld [vmem:[#allocation2 + $0x20] sm:$0xff] }
 0x35e   :  { %4979 = vmatmul.msk.f32.gmra.mxu1 %vm990_vm10, %v2811_v36  ;;  %v2696_v40 = vadd.f32 %v2692_v38, %v2684_v11  ;;  %v2697_v53 = vadd.f32 %v2693_v29, %v2685_v46  ;;  %v2794_v46 = vld [vmem:[#allocation2 + $0x18] sm:$0xff]  ;;  %v2827_v36 = vld [vmem:[#allocation2 + $0x22] sm:$0xff] }
 0x35f   :  { %v1912_v15 = vpop.permute.xlu1 %1911  ;;  %v1975_v20 = vld [vmem:[#allocation2 + $0xa9] sm:$0xff] }
 0x360   :  { %v2310_v51 = vpop.f32.mrf.mxu0  ;;  %v1959_v30 = vld [vmem:[#allocation2 + $0xa8] sm:$0xff]  ;;  %1944 = vst.msk [vmem:[#allocation2 + $0xb1] sm:$0xff] %vm990_vm10, %v1912_v15  ;;  %4922 = vmatmul.msk.f32.gmra.mxu2 %vm990_vm10, %v1975_v20  ;;  %vm2700_vm4 = vcmp.ge.f32.partialorder %v2696_v40, 0.5  ;;  %vm2701_vm5 = vcmp.ge.f32.partialorder %v2697_v53, 0.5  ;;  %v2683_v15 = vsub.f32 1.0, %v6275_v16 }
 0x361   :  { %4938 = vmatmul.msk.f32.gmra.mxu3 %vm990_vm10, %v1959_v30  ;;  %v4962_v47 = vsel %vm2700_vm4, 1.0, %v7437_v1  ;;  %v4963_v6 = vsel %vm2701_vm5, 1.0, %v7437_v1  ;;  %v6303_v12 = vadd.f32 %v2310_v51, %v2195_v17  ;;  %v2682_v51 = vsub.f32 1.0, %v6272_v23 }
 0x362   :  { %2780 = vst.msk [vmem:[#allocation2 + $0x31] sm:$0xff] %vm24_vm1, %v4962_v47  ;;  %v2712_v33 = vsub.f32 1.0, %v4962_v47  ;;  %v2713_v54 = vsub.f32 1.0, %v4963_v6 }
 0x363   :  { %2781 = vst.msk [vmem:[#allocation2 + $0x39] sm:$0xff] %vm24_vm1, %v4963_v6  ;;  %v2383_v42 = vsel %vm24_vm1, %v6303_v12, inf  ;;  %v2455_v0 = vsel %vm24_vm1, %v6303_v12, -inf  ;;  %v2686_v17 = vmul.f32 %v2682_v51, %v6265_v56 }
 0x364   :  { %v2084_v24 = vpop.f32.mrf.mxu2  ;;  %v6305_v50 = vmul.f32 %v2712_v33, %v2696_v40  ;;  %v6307_v61 = vmul.f32 %v2713_v54, %v2697_v53 }
 0x365   :  { %v2197_v32 = vpop.f32.mrf.mxu3 }
 0x366   :  { %v2198_v28 = vadd.f32 %v2197_v32, %v2084_v24  ;;  %v2687_v24 = vmul.f32 %v2683_v15, %v6267_v5 }
 0x367   :  { %v1976_v55 = vld [vmem:[#allocation2 + $0xb1] sm:$0xff] }
 0x368   :  { %v2313_v48 = vpop.f32.mrf.mxu0  ;;  %v1960_v35 = vld [vmem:[#allocation2 + $0xb0] sm:$0xff]  ;;  %4923 = vmatmul.msk.f32.gmra.mxu2 %vm990_vm10, %v1976_v55 }
 0x369   :  { %v1991_v4 = vld [vmem:[#allocation2 + $0xaa] sm:$0xff]  ;;  %v6309_v59 = vadd.f32 %v2313_v48, %v2198_v28  ;;  %4939 = vmatmul.msk.f32.gmra.mxu3 %vm990_vm10, %v1960_v35  ;;  %v1992_v34 = vld [vmem:[#allocation2 + $0xb2] sm:$0xff] }
 0x36a   :  { %4956 = vmatmul.msk.f32.gmra.mxu0 %vm990_vm10, %v1991_v4  ;;  %v2812_v18 = vld [vmem:[#allocation2 + $0x31] sm:$0xff]  ;;  %v2813_v13 = vld [vmem:[#allocation2 + $0x39] sm:$0xff] }
 0x36b   :  { %v2384_v49 = vsel %vm24_vm1, %v6309_v59, inf  ;;  %v2456_v19 = vsel %vm24_vm1, %v6309_v59, -inf  ;;  %4980 = vmatmul.msk.f32.gmra.mxu1 %vm990_vm10, %v2812_v18  ;;  %v2796_v16 = vld [vmem:[#allocation2 + $0x30] sm:$0xff]  ;;  %v2829_v18 = vld [vmem:[#allocation2 + $0x3a] sm:$0xff] }
 0x36c   :  { %v2385_v22 = vmin.f32 %v2383_v42, %v2384_v49  ;;  %v2457_v37 = vmax.f32 %v2455_v0, %v2456_v19  ;;  %v2087_v23 = vpop.f32.mrf.mxu2  ;;  %v2828_v55 = vld [vmem:[#allocation2 + $0x32] sm:$0xff] }
 0x36d   :  { %v2200_v33 = vpop.f32.mrf.mxu3  ;;  %v2797_v49 = vld [vmem:[#allocation2 + $0x38] sm:$0xff] }
 0x36e   :  { %v2386_v41 = vrot.slane %v2385_v22, 4  ;;  %v2458_v52 = vrot.slane %v2457_v37, 4  ;;  %v2201_v5 = vadd.f32 %v2200_v33, %v2087_v23 }
 0x370   :  { %v2387_v43 = vmin.f32 %v2385_v22, %v2386_v41  ;;  %v2459_v21 = vmax.f32 %v2457_v37, %v2458_v52  ;;  %4992 = vmatmul.msk.f32.vlgmr.msra.gmra.mxu2 %vm990_vm10, %v2792_v31 }
 0x371   :  { %5010 = vmatmul.msk.f32.vlgmr.msra.gmra.mxu3 %vm990_vm10, %v2824_v14 }
 0x372   :  { %4957 = vmatmul.msk.f32.gmra.mxu0 %vm990_vm10, %v1992_v34  ;;  %v2388_v2 = vrot.slane %v2387_v43, 2  ;;  %v2460_v58 = vrot.slane %v2459_v21, 2 }
 0x373   :  { %4981 = vmatmul.msk.f32.gmra.mxu1 %vm990_vm10, %v2813_v13 }
 0x374   :  { %v2389_v63 = vmin.f32 %v2387_v43, %v2388_v2  ;;  %v2461_v39 = vmax.f32 %v2459_v21, %v2460_v58 }
 0x376   :  { %v2390_v9 = vrot.slane %v2389_v63, 1  ;;  %v2462_v57 = vrot.slane %v2461_v39, 1 }
 0x378   :  { %v2391_v7 = vmin.f32 %v2389_v63, %v2390_v9  ;;  %v2463_v25 = vmax.f32 %v2461_v39, %v2462_v57  ;;  %4993 = vmatmul.msk.f32.gmra.mxu2 %vm990_vm10, %v2793_v27 }
 0x379   :  { %5011 = vmatmul.msk.f32.gmra.mxu3 %vm990_vm10, %v2825_v3 }
 0x37a   :  { %v2519_v45 = vsub.f32 %v2463_v25, %v2391_v7  ;;  %v2506_v40 = vsub.f32 %v6303_v12, %v2391_v7  ;;  %v2507_v53 = vsub.f32 %v6309_v59, %v2391_v7 }
 0x37c   :  { %v2527_v11 = vadd.f32 1e-12, %v2519_v45 }
 0x37e   :  { %5176 = vrcp.f32 %v2527_v11  ;;  %v2585_v60 = vand.u32 2147483648, %v2527_v11  ;;  %v2583_v29 = vand.u32 2147483647, %v2527_v11  ;;  %vm2579_vm7 = vweird.f32 %v2527_v11 }
 0x380   :  { %4994 = vmatmul.msk.f32.gmra.mxu2 %vm990_vm10, %v2794_v46  ;;  %v2586_v30 = vor.u32 1.1754944e-38, %v2585_v60  ;;  %vm2584_vm9 = vcmp.eq.f32.partialorder %v2583_v29, 8.507059e+37 }
 0x381   :  { %5012 = vmatmul.msk.f32.gmra.mxu3 %vm990_vm10, %v2826_v62 }
 0x384   :  { %v5177_v26 = vpop.eup %5176 }
 0x385   :  { %v2575_v8 = vmul.f32 %v5177_v26, %v2527_v11  ;;  %vm2580_vm6 = vweird.f32 %v5177_v26 }
 0x386   :  { %vm2581_vm8 = vmor %vm2579_vm7, %vm2580_vm6 }
 0x387   :  { %v2576_v44 = vsub.f32 1.0, %v2575_v8 }
 0x388   :  { %4995 = vmatmul.msk.f32.gmra.mxu2 %vm990_vm10, %v2795_v10 }
 0x389   :  { %v2577_v38 = vmul.f32 %v5177_v26, %v2576_v44  ;;  %5013 = vmatmul.msk.f32.gmra.mxu3 %vm990_vm10, %v2827_v36 }
 0x38b   :  { %v2578_v20 = vadd.f32 %v5177_v26, %v2577_v38 }
 0x38d   :  { %v2582_v47 = vsel %vm2581_vm8, %v5177_v26, %v2578_v20 }
 0x38e   :  { %v2587_v6 = vsel %vm2584_vm9, %v2586_v30, %v2582_v47 }
 0x38f   :  { %v2650_v32 = vmul.f32 %v2587_v6, %v2506_v40  ;;  %v2651_v28 = vmul.f32 %v2587_v6, %v2507_v53 }
 0x390   :  { %4996 = vmatmul.msk.f32.gmra.mxu2 %vm990_vm10, %v2796_v16 }
 0x391   :  { %v2690_v54 = vsub.f32 %v2650_v32, %v2686_v17  ;;  %v2691_v48 = vsub.f32 %v2651_v28, %v2687_v24  ;;  %5014 = vmatmul.msk.f32.gmra.mxu3 %vm990_vm10, %v2828_v55  ;;  %v2316_v4 = vpop.f32.mrf.mxu0 }
 0x392   :  { %v6356_v41 = vadd.f32 %v2316_v4, %v2201_v5 }
 0x393   :  { %v2694_v12 = vmul.f32 0.5, %v2690_v54  ;;  %v2695_v35 = vmul.f32 0.5, %v2691_v48 }
 0x394   :  { %v2392_v21 = vsel %vm24_vm1, %v6356_v41, inf  ;;  %v2464_v34 = vsel %vm24_vm1, %v6356_v41, -inf }
 0x395   :  { %v6341_v59 = vadd.f32 %v2694_v12, %v2686_v17  ;;  %v6343_v56 = vadd.f32 %v2695_v35, %v2687_v24  ;;  %v2090_v42 = vpop.f32.mrf.mxu2 }
 0x396   :  { %v2203_v0 = vpop.f32.mrf.mxu3 }
 0x397   :  { %vm2702_vm11 = vcmp.ge.f32.partialorder %v6341_v59, 0.5  ;;  %vm2703_vm12 = vcmp.ge.f32.partialorder %v6343_v56, 0.5  ;;  %v2204_v37 = vadd.f32 %v2203_v0, %v2090_v42 }
 0x398   :  { %v6348_v19 = vsel %vm2702_vm11, 1.0, %v7437_v1  ;;  %v6351_v22 = vsel %vm2703_vm12, 1.0, %v7437_v1  ;;  %4997 = vmatmul.msk.f32.gmra.mxu2 %vm990_vm10, %v2797_v49 }
 0x399   :  { %2782 = vst.msk [vmem:[#allocation2 + $0x49] sm:$0xff] %vm24_vm1, %v6348_v19  ;;  %5015 = vmatmul.msk.f32.gmra.mxu3 %vm990_vm10, %v2829_v18  ;;  %v2319_v52 = vpop.f32.mrf.mxu0 }
 0x39a   :  { %2783 = vst.msk [vmem:[#allocation2 + $0x51] sm:$0xff] %vm24_vm1, %v6351_v22  ;;  %v6361_v43 = vadd.f32 %v2319_v52, %v2204_v37 }
 0x39c   :  { %v2393_v31 = vsel %vm24_vm1, %v6361_v43, inf  ;;  %v2465_v14 = vsel %vm24_vm1, %v6361_v43, -inf }
 0x39d   :  { %v2394_v2 = vmin.f32 %v2392_v21, %v2393_v31  ;;  %v2466_v58 = vmax.f32 %v2464_v34, %v2465_v14  ;;  %v2093_v63 = vpop.f32.mrf.mxu2 }
 0x39e   :  { %v2206_v39 = vpop.f32.mrf.mxu3 }
 0x39f   :  { %v2395_v57 = vrot.slane %v2394_v2, 4  ;;  %v2467_v7 = vrot.slane %v2466_v58, 4  ;;  %v2207_v62 = vadd.f32 %v2206_v39, %v2093_v63 }
 0x3a0   :  { %v2814_v13 = vld [vmem:[#allocation2 + $0x49] sm:$0xff] }
 0x3a1   :  { %v2798_v9 = vld [vmem:[#allocation2 + $0x48] sm:$0xff]  ;;  %4982 = vmatmul.msk.f32.gmra.mxu1 %vm990_vm10, %v2814_v13  ;;  %v2396_v27 = vmin.f32 %v2394_v2, %v2395_v57  ;;  %v2468_v3 = vmax.f32 %v2466_v58, %v2467_v7  ;;  %v2322_v45 = vpop.f32.mrf.mxu0  ;;  %v2815_v10 = vld [vmem:[#allocation2 + $0x51] sm:$0xff] }
 0x3a2   :  { %4998 = vmatmul.msk.f32.gmra.mxu2 %vm990_vm10, %v2798_v9  ;;  %v2830_v25 = vld [vmem:[#allocation2 + $0x4a] sm:$0xff]  ;;  %v2831_v15 = vld [vmem:[#allocation2 + $0x52] sm:$0xff]  ;;  %v6376_v20 = vadd.f32 %v2322_v45, %v2207_v62 }
 0x3a3   :  { %5016 = vmatmul.msk.f32.gmra.mxu3 %vm990_vm10, %v2830_v25  ;;  %v2397_v11 = vrot.slane %v2396_v27, 2  ;;  %v2469_v46 = vrot.slane %v2468_v3, 2  ;;  %v2799_v38 = vld [vmem:[#allocation2 + $0x50] sm:$0xff] }
 0x3a4   :  { %v2401_v17 = vsel %vm24_vm1, %v6376_v20, inf  ;;  %v2473_v24 = vsel %vm24_vm1, %v6376_v20, -inf }
 0x3a5   :  { %v2398_v26 = vmin.f32 %v2396_v27, %v2397_v11  ;;  %v2470_v8 = vmax.f32 %v2468_v3, %v2469_v46  ;;  %v2096_v44 = vpop.f32.mrf.mxu2 }
 0x3a6   :  { %v2209_v60 = vpop.f32.mrf.mxu3 }
 0x3a7   :  { %v2399_v29 = vrot.slane %v2398_v26, 1  ;;  %v2471_v36 = vrot.slane %v2470_v8, 1  ;;  %v2210_v51 = vadd.f32 %v2209_v60, %v2096_v44 }
 0x3a9   :  { %4983 = vmatmul.msk.f32.gmra.mxu1 %vm990_vm10, %v2815_v10  ;;  %v2400_v30 = vmin.f32 %v2398_v26, %v2399_v29  ;;  %v2472_v40 = vmax.f32 %v2470_v8, %v2471_v36  ;;  %v2325_v53 = vpop.f32.mrf.mxu0 }
 0x3aa   :  { %4999 = vmatmul.msk.f32.gmra.mxu2 %vm990_vm10, %v2799_v38  ;;  %v6379_v47 = vadd.f32 %v2325_v53, %v2210_v51 }
 0x3ab   :  { %5017 = vmatmul.msk.f32.gmra.mxu3 %vm990_vm10, %v2831_v15  ;;  %v2520_v6 = vsub.f32 %v2472_v40, %v2400_v30  ;;  %v2508_v45 = vsub.f32 %v6356_v41, %v2400_v30  ;;  %v2509_v11 = vsub.f32 %v6361_v43, %v2400_v30 }
 0x3ac   :  { %v2402_v32 = vsel %vm24_vm1, %v6379_v47, inf  ;;  %v2474_v28 = vsel %vm24_vm1, %v6379_v47, -inf }
 0x3ad   :  { %v2528_v23 = vadd.f32 1e-12, %v2520_v6  ;;  %v2403_v33 = vmin.f32 %v2401_v17, %v2402_v32  ;;  %v2475_v16 = vmax.f32 %v2473_v24, %v2474_v28  ;;  %v2099_v54 = vpop.f32.mrf.mxu2 }
 0x3ae   :  { %v2212_v48 = vpop.f32.mrf.mxu3 }
 0x3af   :  { %5178 = vrcp.f32 %v2528_v23  ;;  %v2404_v55 = vrot.slane %v2403_v33, 4  ;;  %v2476_v12 = vrot.slane %v2475_v16, 4  ;;  %v2213_v37 = vadd.f32 %v2212_v48, %v2099_v54 }
 0x3b0   :  { %v2597_v14 = vand.u32 2147483647, %v2528_v23  ;;  %v2599_v63 = vand.u32 2147483648, %v2528_v23  ;;  %vm2593_vm14 = vweird.f32 %v2528_v23 }
 0x3b1   :  { %v2328_v35 = vpop.f32.mrf.mxu0  ;;  %v2405_v4 = vmin.f32 %v2403_v33, %v2404_v55  ;;  %v2477_v5 = vmax.f32 %v2475_v16, %v2476_v12 }
 0x3b2   :  { %v6389_v9 = vadd.f32 %v2328_v35, %v2213_v37  ;;  %vm2598_vm15 = vcmp.eq.f32.partialorder %v2597_v14, 8.507059e+37  ;;  %v2600_v62 = vor.u32 1.1754944e-38, %v2599_v63 }
 0x3b3   :  { %v2406_v42 = vrot.slane %v2405_v4, 2  ;;  %v2478_v0 = vrot.slane %v2477_v5, 2 }
 0x3b4   :  { %v2410_v8 = vsel %vm24_vm1, %v6389_v9, inf  ;;  %v2482_v44 = vsel %vm24_vm1, %v6389_v9, -inf }
 0x3b5   :  { %v5179_v49 = vpop.eup %5178  ;;  %v2407_v52 = vmin.f32 %v2405_v4, %v2406_v42  ;;  %v2479_v21 = vmax.f32 %v2477_v5, %v2478_v0  ;;  %v2102_v34 = vpop.f32.mrf.mxu2 }
 0x3b6   :  { %v2589_v18 = vmul.f32 %v5179_v49, %v2528_v23  ;;  %v2215_v31 = vpop.f32.mrf.mxu3  ;;  %vm2594_vm13 = vweird.f32 %v5179_v49 }
 0x3b7   :  { %v2216_v2 = vadd.f32 %v2215_v31, %v2102_v34  ;;  %v2408_v39 = vrot.slane %v2407_v52, 1  ;;  %v2480_v13 = vrot.slane %v2479_v21, 1  ;;  %vm2595_vm0 = vmor %vm2593_vm14, %vm2594_vm13  ;;  %v2715_v31 = vsub.f32 1.0, %v6351_v22 }
 0x3b8   :  { %v2590_v58 = vsub.f32 1.0, %v2589_v18 }
 0x3b9   :  { %v2331_v57 = vpop.f32.mrf.mxu0  ;;  %v6391_v25 = vmin.f32 %v2407_v52, %v2408_v39  ;;  %v2481_v27 = vmax.f32 %v2479_v21, %v2480_v13  ;;  %v2714_v21 = vsub.f32 1.0, %v6348_v19  ;;  %v2719_v22 = vmul.f32 %v2715_v31, %v6343_v56 }
 0x3ba   :  { %v2591_v7 = vmul.f32 %v5179_v49, %v2590_v58  ;;  %v6393_v3 = vadd.f32 %v2331_v57, %v2216_v2 }
 0x3bb   :  { %v2521_v26 = vsub.f32 %v2481_v27, %v6391_v25  ;;  %v2510_v2 = vsub.f32 %v6376_v20, %v6391_v25  ;;  %v2511_v63 = vsub.f32 %v6379_v47, %v6391_v25  ;;  %v2718_v19 = vmul.f32 %v2714_v21, %v6341_v59 }
 0x3bc   :  { %v2592_v46 = vadd.f32 %v5179_v49, %v2591_v7  ;;  %v2411_v60 = vsel %vm24_vm1, %v6393_v3, inf  ;;  %v2483_v41 = vsel %vm24_vm1, %v6393_v3, -inf }
 0x3bd   :  { %v2529_v10 = vadd.f32 1e-12, %v2521_v26  ;;  %v2412_v38 = vmin.f32 %v2410_v8, %v2411_v60  ;;  %v2484_v29 = vmax.f32 %v2482_v44, %v2483_v41 }
 0x3be   :  { %v2596_v43 = vsel %vm2595_vm0, %v5179_v49, %v2592_v46 }
 0x3bf   :  { %v2601_v36 = vsel %vm2598_vm15, %v2600_v62, %v2596_v43  ;;  %5180 = vrcp.f32 %v2529_v10  ;;  %v2413_v30 = vrot.slane %v2412_v38, 4  ;;  %v2485_v40 = vrot.slane %v2484_v29, 4 }
 0x3c0   :  { %v2652_v51 = vmul.f32 %v2601_v36, %v2508_v45  ;;  %v2653_v15 = vmul.f32 %v2601_v36, %v2509_v11  ;;  %v2611_v49 = vand.u32 2147483647, %v2529_v10  ;;  %v2613_v37 = vand.u32 2147483648, %v2529_v10 }
 0x3c1   :  { %v2414_v17 = vmin.f32 %v2412_v38, %v2413_v30  ;;  %v2486_v24 = vmax.f32 %v2484_v29, %v2485_v40  ;;  %vm2607_vm5 = vweird.f32 %v2529_v10 }
 0x3c2   :  { %v2720_v53 = vsub.f32 %v2652_v51, %v6305_v50  ;;  %v2721_v6 = vsub.f32 %v2653_v15, %v6307_v61  ;;  %v2614_v58 = vor.u32 1.1754944e-38, %v2613_v37  ;;  %vm2612_vm7 = vcmp.eq.f32.partialorder %v2611_v49, 8.507059e+37 }
 0x3c3   :  { %v2415_v23 = vrot.slane %v2414_v17, 2  ;;  %v2487_v33 = vrot.slane %v2486_v24, 2 }
 0x3c4   :  { %v2724_v32 = vmul.f32 0.5, %v2720_v53  ;;  %v2725_v28 = vmul.f32 0.5, %v2721_v6 }
 0x3c5   :  { %v5181_v16 = vpop.eup %5180  ;;  %v2416_v12 = vmin.f32 %v2414_v17, %v2415_v23  ;;  %v2488_v35 = vmax.f32 %v2486_v24, %v2487_v33 }
 0x3c6   :  { %v6409_v54 = vadd.f32 %v2724_v32, %v6305_v50  ;;  %v6412_v48 = vadd.f32 %v2725_v28, %v6307_v61  ;;  %v2603_v55 = vmul.f32 %v5181_v16, %v2529_v10  ;;  %vm2608_vm4 = vweird.f32 %v5181_v16 }
 0x3c7   :  { %v2417_v5 = vrot.slane %v2416_v12, 1  ;;  %v2489_v42 = vrot.slane %v2488_v35, 1  ;;  %vm2609_vm6 = vmor %vm2607_vm5, %vm2608_vm4 }
 0x3c8   :  { %vm2732_vm2 = vcmp.ge.f32.partialorder %v6409_v54, 0.5  ;;  %vm2733_vm3 = vcmp.ge.f32.partialorder %v6412_v48, 0.5  ;;  %v2604_v4 = vsub.f32 1.0, %v2603_v55 }
 0x3c9   :  { %v6417_v0 = vsel %vm2732_vm2, 1.0, %v7437_v1  ;;  %v6420_v50 = vsel %vm2733_vm3, 1.0, %v7437_v1  ;;  %v6424_v18 = vmin.f32 %v2416_v12, %v2417_v5  ;;  %v2490_v52 = vmax.f32 %v2488_v35, %v2489_v42 }
 0x3ca   :  { %2784 = vst.msk [vmem:[#allocation2 + $0x61] sm:$0xff] %vm24_vm1, %v6417_v0  ;;  %v2605_v61 = vmul.f32 %v5181_v16, %v2604_v4  ;;  %v2744_v30 = vsub.f32 1.0, %v6417_v0  ;;  %v2745_v40 = vsub.f32 1.0, %v6420_v50 }
 0x3cb   :  { %2785 = vst.msk [vmem:[#allocation2 + $0x69] sm:$0xff] %vm24_vm1, %v6420_v50  ;;  %v2522_v14 = vsub.f32 %v2490_v52, %v6424_v18  ;;  %v2512_v6 = vsub.f32 %v6389_v9, %v6424_v18  ;;  %v2513_v17 = vsub.f32 %v6393_v3, %v6424_v18 }
 0x3cc   :  { %v2606_v34 = vadd.f32 %v5181_v16, %v2605_v61  ;;  %v2748_v33 = vmul.f32 %v2744_v30, %v6409_v54 }
 0x3cd   :  { %v2530_v13 = vadd.f32 1e-12, %v2522_v14 }
 0x3ce   :  { %v2610_v39 = vsel %vm2609_vm6, %v5181_v16, %v2606_v34  ;;  %v2749_v16 = vmul.f32 %v2745_v40, %v6412_v48  ;;  %v2910_v48 = vpop.f32.mrf.mxu1 }
 0x3cf   :  { %v2615_v57 = vsel %vm2612_vm7, %v2614_v58, %v2610_v39  ;;  %5182 = vrcp.f32 %v2530_v13  ;;  %v2627_v29 = vand.u32 2147483648, %v2530_v13  ;;  %v2625_v51 = vand.u32 2147483647, %v2530_v13 }
 0x3d0   :  { %v2654_v7 = vmul.f32 %v2615_v57, %v2510_v2  ;;  %v2655_v27 = vmul.f32 %v2615_v57, %v2511_v63  ;;  %vm2621_vm12 = vweird.f32 %v2530_v13 }
 0x3d1   :  { %v2816_v45 = vld [vmem:[#allocation2 + $0x61] sm:$0xff]  ;;  %v2628_v53 = vor.u32 1.1754944e-38, %v2627_v29  ;;  %vm2626_vm14 = vcmp.eq.f32.partialorder %v2625_v51, 8.507059e+37 }
 0x3d2   :  { %v2800_v11 = vld [vmem:[#allocation2 + $0x60] sm:$0xff]  ;;  %4984 = vmatmul.msk.f32.gmra.mxu1 %vm990_vm10, %v2816_v45  ;;  %v2722_v46 = vsub.f32 %v2654_v7, %v2718_v19  ;;  %v2723_v47 = vsub.f32 %v2655_v27, %v2719_v22  ;;  %v2817_v44 = vld [vmem:[#allocation2 + $0x69] sm:$0xff] }
 0x3d3   :  { %5000 = vmatmul.msk.f32.gmra.mxu2 %vm990_vm10, %v2800_v11  ;;  %v2832_v20 = vld [vmem:[#allocation2 + $0x62] sm:$0xff]  ;;  %v2833_v38 = vld [vmem:[#allocation2 + $0x6a] sm:$0xff] }
 0x3d4   :  { %5018 = vmatmul.msk.f32.gmra.mxu3 %vm990_vm10, %v2832_v20  ;;  %v2726_v25 = vmul.f32 0.5, %v2722_v46  ;;  %v2727_v62 = vmul.f32 0.5, %v2723_v47  ;;  %v2801_v60 = vld [vmem:[#allocation2 + $0x68] sm:$0xff] }
 0x3d5   :  { %v5183_v26 = vpop.eup %5182 }
 0x3d6   :  { %v6440_v59 = vadd.f32 %v2726_v25, %v2718_v19  ;;  %v6442_v8 = vadd.f32 %v2727_v62, %v2719_v22  ;;  %v2617_v56 = vmul.f32 %v5183_v26, %v2530_v13  ;;  %vm2622_vm11 = vweird.f32 %v5183_v26  ;;  %v2913_v11 = vpop.f32.mrf.mxu1 }
 0x3d7   :  { %vm2623_vm13 = vmor %vm2621_vm12, %vm2622_vm11 }
 0x3d8   :  { %vm2734_vm8 = vcmp.ge.f32.partialorder %v6440_v59, 0.5  ;;  %vm2735_vm9 = vcmp.ge.f32.partialorder %v6442_v8, 0.5  ;;  %v2618_v10 = vsub.f32 1.0, %v2617_v56 }
 0x3d9   :  { %v6447_v41 = vsel %vm2734_vm8, 1.0, %v7437_v1  ;;  %v6450_v43 = vsel %vm2735_vm9, 1.0, %v7437_v1 }
 0x3da   :  { %4985 = vmatmul.msk.f32.gmra.mxu1 %vm990_vm10, %v2817_v44  ;;  %2786 = vst.msk [vmem:[#allocation2 + $0x79] sm:$0xff] %vm24_vm1, %v6447_v41  ;;  %v2619_v36 = vmul.f32 %v5183_v26, %v2618_v10 }
 0x3db   :  { %5001 = vmatmul.msk.f32.gmra.mxu2 %vm990_vm10, %v2801_v60  ;;  %2787 = vst.msk [vmem:[#allocation2 + $0x81] sm:$0xff] %vm24_vm1, %v6450_v43 }
 0x3dc   :  { %5019 = vmatmul.msk.f32.gmra.mxu3 %vm990_vm10, %v2833_v38  ;;  %v2620_v15 = vadd.f32 %v5183_v26, %v2619_v36 }
 0x3de   :  { %v2624_v24 = vsel %vm2623_vm13, %v5183_v26, %v2620_v15 }
 0x3df   :  { %v2629_v32 = vsel %vm2626_vm14, %v2628_v53, %v2624_v24 }
 0x3e0   :  { %v2656_v28 = vmul.f32 %v2629_v32, %v2512_v6  ;;  %v2657_v23 = vmul.f32 %v2629_v32, %v2513_v17 }
 0x3e1   :  { %v2818_v55 = vld [vmem:[#allocation2 + $0x79] sm:$0xff] }
 0x3e2   :  { %v2802_v12 = vld [vmem:[#allocation2 + $0x78] sm:$0xff]  ;;  %4986 = vmatmul.msk.f32.gmra.mxu1 %vm990_vm10, %v2818_v55  ;;  %v2752_v5 = vsub.f32 %v2656_v28, %v2748_v33  ;;  %v2753_v3 = vsub.f32 %v2657_v23, %v2749_v16  ;;  %v2819_v61 = vld [vmem:[#allocation2 + $0x81] sm:$0xff]  ;;  %v2916_v28 = vpop.f32.mrf.mxu1 }
 0x3e3   :  { %v2105_v35 = vpop.f32.mrf.mxu2  ;;  %5002 = vmatmul.msk.f32.gmra.mxu2 %vm990_vm10, %v2802_v12  ;;  %v2834_v9 = vld [vmem:[#allocation2 + $0x7a] sm:$0xff]  ;;  %v2835_v31 = vld [vmem:[#allocation2 + $0x82] sm:$0xff] }
 0x3e4   :  { %v2218_v4 = vpop.f32.mrf.mxu3  ;;  %5020 = vmatmul.msk.f32.gmra.mxu3 %vm990_vm10, %v2834_v9  ;;  %v2756_v0 = vmul.f32 0.5, %v2752_v5  ;;  %v2757_v49 = vmul.f32 0.5, %v2753_v3  ;;  %v2803_v18 = vld [vmem:[#allocation2 + $0x80] sm:$0xff] }
 0x3e5   :  { %v2219_v50 = vadd.f32 %v2218_v4, %v2105_v35 }
 0x3e6   :  { %v2760_v37 = vadd.f32 %v2756_v0, %v2748_v33  ;;  %v2761_v54 = vadd.f32 %v2757_v49, %v2749_v16 }
 0x3e7   :  { %v2334_v42 = vpop.f32.mrf.mxu0 }
 0x3e8   :  { %vm2764_vm15 = vcmp.ge.f32.partialorder %v2760_v37, 0.5  ;;  %vm2765_vm0 = vcmp.ge.f32.partialorder %v2761_v54, 0.5  ;;  %v6476_v2 = vadd.f32 %v2334_v42, %v2219_v50 }
 0x3e9   :  { %v4970_v21 = vsel %vm2764_vm15, 1.0, %v7437_v1  ;;  %v4971_v34 = vsel %vm2765_vm0, 1.0, %v7437_v1 }
 0x3ea   :  { %4987 = vmatmul.msk.f32.gmra.mxu1 %vm990_vm10, %v2819_v61  ;;  %2788 = vst.msk [vmem:[#allocation2 + $0x91] sm:$0xff] %vm24_vm1, %v4970_v21  ;;  %v2419_v13 = vsel %vm24_vm1, %v6476_v2, inf  ;;  %v2491_v57 = vsel %vm24_vm1, %v6476_v2, -inf }
 0x3eb   :  { %v2108_v52 = vpop.f32.mrf.mxu2  ;;  %5003 = vmatmul.msk.f32.gmra.mxu2 %vm990_vm10, %v2803_v18  ;;  %2789 = vst.msk [vmem:[#allocation2 + $0x99] sm:$0xff] %vm24_vm1, %v4971_v34  ;;  %v2919_v18 = vpop.f32.mrf.mxu1 }
 0x3ec   :  { %v2221_v14 = vpop.f32.mrf.mxu3  ;;  %5021 = vmatmul.msk.f32.gmra.mxu3 %vm990_vm10, %v2835_v31 }
 0x3ed   :  { %v2222_v58 = vadd.f32 %v2221_v14, %v2108_v52 }
 0x3ef   :  { %v2337_v63 = vpop.f32.mrf.mxu0 }
 0x3f0   :  { %v6479_v39 = vadd.f32 %v2337_v63, %v2222_v58 }
 0x3f1   :  { %v2820_v20 = vld [vmem:[#allocation2 + $0x91] sm:$0xff] }
 0x3f2   :  { %v2420_v19 = vsel %vm24_vm1, %v6479_v39, inf  ;;  %v2492_v7 = vsel %vm24_vm1, %v6479_v39, -inf  ;;  %v2804_v46 = vld [vmem:[#allocation2 + $0x90] sm:$0xff]  ;;  %4988 = vmatmul.msk.f32.gmra.mxu1 %vm990_vm10, %v2820_v20  ;;  %v2821_v40 = vld [vmem:[#allocation2 + $0x99] sm:$0xff] }
 0x3f3   :  { %v2421_v27 = vmin.f32 %v2419_v13, %v2420_v19  ;;  %v2493_v22 = vmax.f32 %v2491_v57, %v2492_v7  ;;  %v3023_v45 = vpop.f32.mrf.mxu2  ;;  %5004 = vmatmul.msk.f32.gmra.mxu2 %vm990_vm10, %v2804_v46  ;;  %v2836_v26 = vld [vmem:[#allocation2 + $0x92] sm:$0xff]  ;;  %v2837_v32 = vld [vmem:[#allocation2 + $0x9a] sm:$0xff] }
 0x3f4   :  { %v3139_v62 = vpop.f32.mrf.mxu3  ;;  %5022 = vmatmul.msk.f32.gmra.mxu3 %vm990_vm10, %v2836_v26  ;;  %v3024_v38 = vadd.f32 %v3023_v45, %v2910_v48  ;;  %v2805_v53 = vld [vmem:[#allocation2 + $0x98] sm:$0xff] }
 0x3f5   :  { %v2422_v47 = vrot.slane %v2421_v27, 4  ;;  %v2494_v25 = vrot.slane %v2493_v22, 4 }
 0x3f6   :  { %v6492_v6 = vadd.f32 %v3139_v62, %v3024_v38 }
 0x3f7   :  { %v2423_v56 = vmin.f32 %v2421_v27, %v2422_v47  ;;  %v2495_v44 = vmax.f32 %v2493_v22, %v2494_v25  ;;  %v2746_v22 = vsub.f32 1.0, %v6447_v41  ;;  %v2747_v47 = vsub.f32 1.0, %v6450_v43 }
 0x3f8   :  { %v3203_v12 = vsel %vm990_vm10, %v6492_v6, inf  ;;  %v3275_v9 = vsel %vm990_vm10, %v6492_v6, -inf }
 0x3f9   :  { %v2424_v60 = vrot.slane %v2423_v56, 2  ;;  %v2496_v10 = vrot.slane %v2495_v44, 2 }
 0x3fa   :  { %4989 = vmatmul.msk.f32.gmra.mxu1 %vm990_vm10, %v2821_v40 }
 0x3fb   :  { %v2425_v29 = vmin.f32 %v2423_v56, %v2424_v60  ;;  %v2497_v36 = vmax.f32 %v2495_v44, %v2496_v10  ;;  %v3026_v51 = vpop.f32.mrf.mxu2  ;;  %5005 = vmatmul.msk.f32.gmra.mxu2 %vm990_vm10, %v2805_v53  ;;  %v2922_v56 = vpop.f32.mrf.mxu1 }
 0x3fc   :  { %v3027_v17 = vadd.f32 %v3026_v51, %v2913_v11  ;;  %v3142_v24 = vpop.f32.mrf.mxu3  ;;  %5023 = vmatmul.msk.f32.gmra.mxu3 %vm990_vm10, %v2837_v32 }
 0x3fd   :  { %v2426_v15 = vrot.slane %v2425_v29, 1  ;;  %v2498_v30 = vrot.slane %v2497_v36, 1 }
 0x3fe   :  { %v6499_v16 = vadd.f32 %v3142_v24, %v3027_v17 }
 0x3ff   :  { %v6496_v23 = vmin.f32 %v2425_v29, %v2426_v15  ;;  %v2499_v33 = vmax.f32 %v2497_v36, %v2498_v30 }
 0x400   :  { %v3204_v35 = vsel %vm990_vm10, %v6499_v16, inf  ;;  %v3276_v5 = vsel %vm990_vm10, %v6499_v16, -inf }
 0x401   :  { %v2523_v55 = vsub.f32 %v2499_v33, %v6496_v23  ;;  %v3205_v4 = vmin.f32 %v3203_v12, %v3204_v35  ;;  %v3277_v42 = vmax.f32 %v3275_v9, %v3276_v5  ;;  %v2514_v51 = vsub.f32 %v6476_v2, %v6496_v23 }
 0x402   :  { %v2515_v15 = vsub.f32 %v6479_v39, %v6496_v23  ;;  %v2750_v33 = vmul.f32 %v2746_v22, %v6440_v59  ;;  %v2751_v2 = vmul.f32 %v2747_v47, %v6442_v8 }
 0x403   :  { %v2531_v3 = vadd.f32 1e-12, %v2523_v55  ;;  %v3206_v0 = vrot.slane %v3205_v4, 4  ;;  %v3029_v49 = vpop.f32.mrf.mxu2  ;;  %v3278_v50 = vrot.slane %v3277_v42, 4 }
 0x404   :  { %v3145_v37 = vpop.f32.mrf.mxu3  ;;  %v3030_v52 = vadd.f32 %v3029_v49, %v2916_v28 }
 0x405   :  { %5184 = vrcp.f32 %v2531_v3  ;;  %v3207_v54 = vmin.f32 %v3205_v4, %v3206_v0  ;;  %v3279_v61 = vmax.f32 %v3277_v42, %v3278_v50  ;;  %v2639_v20 = vand.u32 2147483647, %v2531_v3 }
 0x406   :  { %v6510_v57 = vadd.f32 %v3145_v37, %v3030_v52  ;;  %v2641_v46 = vand.u32 2147483648, %v2531_v3  ;;  %vm2635_vm2 = vweird.f32 %v2531_v3  ;;  %v2925_v37 = vpop.f32.mrf.mxu1 }
 0x407   :  { %v3208_v48 = vrot.slane %v3207_v54, 2  ;;  %v3280_v34 = vrot.slane %v3279_v61, 2  ;;  %vm2640_vm5 = vcmp.eq.f32.partialorder %v2639_v20, 8.507059e+37 }
 0x408   :  { %v3212_v44 = vsel %vm990_vm10, %v6510_v57, inf  ;;  %v3284_v41 = vsel %vm990_vm10, %v6510_v57, -inf  ;;  %v2642_v30 = vor.u32 1.1754944e-38, %v2641_v46 }
 0x409   :  { %v3209_v21 = vmin.f32 %v3207_v54, %v3208_v48  ;;  %v3281_v63 = vmax.f32 %v3279_v61, %v3280_v34 }
 0x40b   :  { %v5185_v31 = vpop.eup %5184  ;;  %v3210_v58 = vrot.slane %v3209_v21, 1  ;;  %v3032_v13 = vpop.f32.mrf.mxu2  ;;  %v3282_v11 = vrot.slane %v3281_v63, 1 }
 0x40c   :  { %v2631_v14 = vmul.f32 %v5185_v31, %v2531_v3  ;;  %v3033_v19 = vadd.f32 %v3032_v13, %v2919_v18  ;;  %v3148_v7 = vpop.f32.mrf.mxu3  ;;  %vm2636_vm3 = vweird.f32 %v5185_v31 }
 0x40d   :  { %v6513_v45 = vmin.f32 %v3209_v21, %v3210_v58  ;;  %v3283_v26 = vmax.f32 %v3281_v63, %v3282_v11  ;;  %vm2637_vm4 = vmor %vm2635_vm2, %vm2636_vm3 }
 0x40e   :  { %v2632_v27 = vsub.f32 1.0, %v2631_v14  ;;  %v6516_v25 = vadd.f32 %v3148_v7, %v3033_v19 }
 0x40f   :  { %v3363_v38 = vsub.f32 %v3283_v26, %v6513_v45 }
 0x410   :  { %v2633_v62 = vmul.f32 %v5185_v31, %v2632_v27  ;;  %v3213_v60 = vsel %vm990_vm10, %v6516_v25, inf  ;;  %v3285_v10 = vsel %vm990_vm10, %v6516_v25, -inf }
 0x411   :  { %v3214_v29 = vmin.f32 %v3212_v44, %v3213_v60  ;;  %v3286_v36 = vmax.f32 %v3284_v41, %v3285_v10  ;;  %v6531_v53 = vadd.f32 1e-12, %v3363_v38 }
 0x412   :  { %v2634_v43 = vadd.f32 %v5185_v31, %v2633_v62 }
 0x413   :  { %v3215_v17 = vrot.slane %v3214_v29, 4  ;;  %v3287_v24 = vrot.slane %v3286_v36, 4  ;;  %v3035_v32 = vpop.f32.mrf.mxu2  ;;  %5186 = vrcp.f32 %v6531_v53  ;;  %vm3384_vm8 = vweird.f32 %v6531_v53 }
 0x414   :  { %v2638_v40 = vsel %vm2637_vm4, %v5185_v31, %v2634_v43  ;;  %v3151_v55 = vpop.f32.mrf.mxu3  ;;  %v3036_v42 = vadd.f32 %v3035_v32, %v2922_v56  ;;  %v3390_v32 = vand.u32 2147483648, %v6531_v53 }
 0x415   :  { %v2643_v28 = vsel %vm2640_vm5, %v2642_v30, %v2638_v40  ;;  %v3216_v39 = vmin.f32 %v3214_v29, %v3215_v17  ;;  %v3288_v23 = vmax.f32 %v3286_v36, %v3287_v24 }
 0x416   :  { %v2658_v12 = vmul.f32 %v2643_v28, %v2514_v51  ;;  %v2659_v35 = vmul.f32 %v2643_v28, %v2515_v15  ;;  %v6540_v34 = vadd.f32 %v3151_v55, %v3036_v42 }
 0x417   :  { %v3217_v5 = vrot.slane %v3216_v39, 2  ;;  %v3289_v3 = vrot.slane %v3288_v23, 2 }
 0x418   :  { %v2754_v9 = vsub.f32 %v2658_v12, %v2750_v33  ;;  %v2755_v4 = vsub.f32 %v2659_v35, %v2751_v2  ;;  %v3221_v22 = vsel %vm990_vm10, %v6540_v34, inf  ;;  %v3293_v20 = vsel %vm990_vm10, %v6540_v34, -inf }
 0x419   :  { %v3218_v54 = vmin.f32 %v3216_v39, %v3217_v5  ;;  %v3290_v50 = vmax.f32 %v3288_v23, %v3289_v3  ;;  %v6536_v59 = vpop.eup %5186  ;;  %v3391_v3 = vor.u32 1.1754944e-38, %v3390_v32 }
 0x41a   :  { %v2758_v0 = vmul.f32 0.5, %v2754_v9  ;;  %v2759_v49 = vmul.f32 0.5, %v2755_v4  ;;  %v3380_v8 = vmul.f32 %v6536_v59, %v6531_v53 }
 0x41b   :  { %v3038_v18 = vpop.f32.mrf.mxu2  ;;  %v3219_v52 = vrot.slane %v3218_v54, 1  ;;  %v3291_v21 = vrot.slane %v3290_v50, 1 }
 0x41c   :  { %v2762_v48 = vadd.f32 %v2758_v0, %v2750_v33  ;;  %v2763_v61 = vadd.f32 %v2759_v49, %v2751_v2  ;;  %v3154_v31 = vpop.f32.mrf.mxu3  ;;  %v3039_v14 = vadd.f32 %v3038_v18, %v2925_v37  ;;  %v3381_v27 = vsub.f32 1.0, %v3380_v8 }
 0x41d   :  { %v6544_v13 = vmin.f32 %v3218_v54, %v3219_v52  ;;  %v3292_v19 = vmax.f32 %v3290_v50, %v3291_v21  ;;  %v3388_v33 = vand.u32 2147483647, %v6531_v53  ;;  %v3347_v8 = vsub.f32 %v6492_v6, %v6513_v45 }
 0x41e   :  { %vm2766_vm6 = vcmp.ge.f32.partialorder %v2762_v48, 0.5  ;;  %vm2767_vm7 = vcmp.ge.f32.partialorder %v2763_v61, 0.5  ;;  %v6547_v7 = vadd.f32 %v3154_v31, %v3039_v14  ;;  %v2928_v56 = vpop.f32.mrf.mxu1  ;;  %v3382_v60 = vmul.f32 %v6536_v59, %v3381_v27 }
 0x41f   :  { %v4972_v58 = vsel %vm2766_vm6, 1.0, %v7437_v1  ;;  %v4973_v63 = vsel %vm2767_vm7, 1.0, %v7437_v1  ;;  %v3364_v11 = vsub.f32 %v3292_v19, %v6544_v13  ;;  %vm3389_vm11 = vcmp.eq.f32.partialorder %v3388_v33, 8.507059e+37 }
 0x420   :  { %2790 = vst.msk [vmem:[#allocation2 + $0xa9] sm:$0xff] %vm24_vm1, %v4972_v58  ;;  %v3222_v46 = vsel %vm990_vm10, %v6547_v7, inf  ;;  %v3294_v47 = vsel %vm990_vm10, %v6547_v7, -inf  ;;  %v3383_v40 = vadd.f32 %v6536_v59, %v3382_v60  ;;  %v3348_v52 = vsub.f32 %v6499_v16, %v6513_v45 }
 0x421   :  { %2791 = vst.msk [vmem:[#allocation2 + $0xb1] sm:$0xff] %vm24_vm1, %v4973_v63  ;;  %v3223_v62 = vmin.f32 %v3221_v22, %v3222_v46  ;;  %v3295_v26 = vmax.f32 %v3293_v20, %v3294_v47  ;;  %v6559_v44 = vadd.f32 1e-12, %v3364_v11  ;;  %vm3385_vm1 = vweird.f32 %v6536_v59 }
 0x422   :  { %vm6576_vm9 = vmor %vm3384_vm8, %vm3385_vm1 }
 0x423   :  { %v3224_v10 = vrot.slane %v3223_v62, 4  ;;  %v3296_v43 = vrot.slane %v3295_v26, 4  ;;  %5188 = vrcp.f32 %v6559_v44  ;;  %v3387_v23 = vsel %vm6576_vm9, %v6536_v59, %v3383_v40 }
 0x424   :  { %v3392_v48 = vsel %vm3389_vm11, %v3391_v3, %v3387_v23  ;;  %vm3398_vm14 = vweird.f32 %v6559_v44 }
 0x425   :  { %v3041_v41 = vpop.f32.mrf.mxu2  ;;  %v3225_v29 = vmin.f32 %v3223_v62, %v3224_v10  ;;  %v3297_v15 = vmax.f32 %v3295_v26, %v3296_v43  ;;  %v3491_v19 = vmul.f32 %v3392_v48, %v3347_v8  ;;  %v3492_v45 = vmul.f32 %v3392_v48, %v3348_v52 }
 0x426   :  { %v3157_v38 = vpop.f32.mrf.mxu3  ;;  %v3042_v24 = vadd.f32 %v3041_v41, %v2928_v56  ;;  %v2931_v53 = vpop.f32.mrf.mxu1  ;;  %v3402_v43 = vand.u32 2147483647, %v6559_v44 }
 0x427   :  { %v6563_v36 = vld [vmem:[#allocation2 + $0xa9] sm:$0xff]  ;;  %v3226_v17 = vrot.slane %v3225_v29, 2  ;;  %v3298_v28 = vrot.slane %v3297_v15, 2  ;;  %v3507_v47 = vmul.f32 0.5, %v3491_v19  ;;  %v3508_v56 = vmul.f32 0.5, %v3492_v45 }
 0x428   :  { %v2806_v51 = vld [vmem:[#allocation2 + $0xa8] sm:$0xff]  ;;  %4990 = vmatmul.msk.f32.gmra.mxu1 %vm990_vm10, %v6563_v36  ;;  %v6585_v5 = vadd.f32 %v3157_v38, %v3042_v24  ;;  %v6589_v54 = vld [vmem:[#allocation2 + $0xb1] sm:$0xff]  ;;  %v3404_v38 = vand.u32 2147483648, %v6559_v44  ;;  %vm3403_vm2 = vcmp.eq.f32.partialorder %v3402_v43, 8.507059e+37 }
 0x429   :  { %5006 = vmatmul.msk.f32.gmra.mxu2 %vm990_vm10, %v2806_v51  ;;  %v2838_v30 = vld [vmem:[#allocation2 + $0xaa] sm:$0xff]  ;;  %v3227_v55 = vmin.f32 %v3225_v29, %v3226_v17  ;;  %v6574_v12 = vpop.eup %5188  ;;  %v3299_v2 = vmax.f32 %v3297_v15, %v3298_v28  ;;  %v2839_v18 = vld [vmem:[#allocation2 + $0xb2] sm:$0xff]  ;;  %vm3515_vm13 = vcmp.ge.f32.partialorder %v3507_v47, 0.5  ;;  %vm3516_vm15 = vcmp.ge.f32.partialorder %v3508_v56, 0.5 }
 0x42a   :  { %5024 = vmatmul.msk.f32.gmra.mxu3 %vm990_vm10, %v2838_v30  ;;  %v3394_v9 = vmul.f32 %v6574_v12, %v6559_v44  ;;  %v2807_v50 = vld [vmem:[#allocation2 + $0xb0] sm:$0xff]  ;;  %v3230_v31 = vsel %vm990_vm10, %v6585_v5, inf  ;;  %v3302_v58 = vsel %vm990_vm10, %v6585_v5, -inf  ;;  %vm3399_vm12 = vweird.f32 %v6574_v12 }
 0x42b   :  { %v3228_v4 = vrot.slane %v3227_v55, 1  ;;  %v3300_v42 = vrot.slane %v3299_v2, 1  ;;  %vm3400_vm0 = vmor %vm3398_vm14, %vm3399_vm12  ;;  %v6618_v32 = vsel %vm3515_vm13, 1.0, %v7437_v1  ;;  %v3350_v28 = vsub.f32 %v6516_v25, %v6544_v13 }
 0x42c   :  { %v3395_v21 = vsub.f32 1.0, %v3394_v9  ;;  %v3405_v33 = vor.u32 1.1754944e-38, %v3404_v38  ;;  %v6623_v44 = vsel %vm3516_vm15, 1.0, %v7437_v1  ;;  %v3349_v9 = vsub.f32 %v6510_v57, %v6544_v13 }
 0x42d   :  { %v3044_v39 = vpop.f32.mrf.mxu2  ;;  %v6587_v49 = vmin.f32 %v3227_v55, %v3228_v4  ;;  %v3301_v61 = vmax.f32 %v3299_v2, %v3300_v42  ;;  %v3528_v3 = vsub.f32 1.0, %v6623_v44  ;;  %v3527_v42 = vsub.f32 1.0, %v6618_v32 }
 0x42e   :  { %v3045_v0 = vadd.f32 %v3044_v39, %v2931_v53  ;;  %v3160_v37 = vpop.f32.mrf.mxu3  ;;  %v3396_v11 = vmul.f32 %v6574_v12, %v3395_v21 }
 0x42f   :  { %v3365_v14 = vsub.f32 %v3301_v61, %v6587_v49  ;;  %v3351_v61 = vsub.f32 %v6540_v34, %v6587_v49  ;;  %v3352_v13 = vsub.f32 %v6547_v7, %v6587_v49  ;;  %v3531_v52 = vmul.f32 %v3527_v42, %v3507_v47 }
 0x430   :  { %v6591_v59 = vadd.f32 %v3160_v37, %v3045_v0  ;;  %4991 = vmatmul.msk.f32.gmra.mxu1 %vm990_vm10, %v6589_v54  ;;  %v3397_v41 = vadd.f32 %v6574_v12, %v3396_v11 }
 0x431   :  { %5007 = vmatmul.msk.f32.gmra.mxu2 %vm990_vm10, %v2807_v50  ;;  %v3373_v22 = vadd.f32 1e-12, %v3365_v14 }
 0x432   :  { %5025 = vmatmul.msk.f32.gmra.mxu3 %vm990_vm10, %v2839_v18  ;;  %v3231_v63 = vsel %vm990_vm10, %v6591_v59, inf  ;;  %v3303_v6 = vsel %vm990_vm10, %v6591_v59, -inf  ;;  %v3401_v30 = vsel %vm3400_vm0, %v6574_v12, %v3397_v41  ;;  %v3532_v18 = vmul.f32 %v3528_v3, %v3508_v56 }
 0x433   :  { %v3232_v27 = vmin.f32 %v3230_v31, %v3231_v63  ;;  %v3304_v16 = vmax.f32 %v3302_v58, %v3303_v6  ;;  %5190 = vrcp.f32 %v3373_v22  ;;  %v3406_v39 = vsel %vm3403_vm2, %v3405_v33, %v3401_v30 }
 0x434   :  { %v3416_v12 = vand.u32 2147483647, %v3373_v22  ;;  %v3418_v23 = vand.u32 2147483648, %v3373_v22  ;;  %vm3412_vm4 = vweird.f32 %v3373_v22  ;;  %v3494_v0 = vmul.f32 %v3406_v39, %v3350_v28 }
 0x435   :  { %v3233_v20 = vrot.slane %v3232_v27, 4  ;;  %v3305_v46 = vrot.slane %v3304_v16, 4  ;;  %v3493_v48 = vmul.f32 %v3406_v39, %v3349_v9 }
 0x436   :  { %v3419_v57 = vor.u32 1.1754944e-38, %v3418_v23  ;;  %vm3417_vm6 = vcmp.eq.f32.partialorder %v3416_v12, 8.507059e+37  ;;  %v3510_v21 = vmul.f32 0.5, %v3494_v0 }
 0x437   :  { %v3234_v62 = vmin.f32 %v3232_v27, %v3233_v20  ;;  %v3306_v26 = vmax.f32 %v3304_v16, %v3305_v46  ;;  %v3509_v58 = vmul.f32 0.5, %v3493_v48 }
 0x438   :  { %vm3518_vm1 = vcmp.ge.f32.partialorder %v3510_v21, 0.5 }
 0x439   :  { %v3235_v60 = vrot.slane %v3234_v62, 2  ;;  %v3307_v10 = vrot.slane %v3306_v26, 2  ;;  %v5191_v15 = vpop.eup %5190  ;;  %vm3517_vm7 = vcmp.ge.f32.partialorder %v3509_v58, 0.5  ;;  %v6640_v11 = vsel %vm3518_vm1, 1.0, %v7437_v1 }
 0x43a   :  { %v3408_v40 = vmul.f32 %v5191_v15, %v3373_v22  ;;  %vm3413_vm3 = vweird.f32 %v5191_v15  ;;  %v5028_v22 = vsel %vm3517_vm7, 1.0, %v7437_v1 }
 0x43b   :  { %v3236_v29 = vmin.f32 %v3234_v62, %v3235_v60  ;;  %v3308_v51 = vmax.f32 %v3306_v26, %v3307_v10  ;;  %vm3414_vm5 = vmor %vm3412_vm4, %vm3413_vm3  ;;  %v3529_v38 = vsub.f32 1.0, %v5028_v22 }
 0x43c   :  { %v3409_v55 = vsub.f32 1.0, %v3408_v40 }
 0x43d   :  { %v3237_v17 = vrot.slane %v3236_v29, 1  ;;  %v3309_v24 = vrot.slane %v3308_v51, 1 }
 0x43e   :  { %v3410_v4 = vmul.f32 %v5191_v15, %v3409_v55  ;;  %v3533_v55 = vmul.f32 %v3529_v38, %v3509_v58 }
 0x43f   :  { %v6625_v35 = vmin.f32 %v3236_v29, %v3237_v17  ;;  %v3310_v2 = vmax.f32 %v3308_v51, %v3309_v24  ;;  %v3530_v29 = vsub.f32 1.0, %v6640_v11 }
 0x440   :  { %v3411_v37 = vadd.f32 %v5191_v15, %v3410_v4 }
 0x441   :  { %v3354_v25 = vsub.f32 %v6591_v59, %v6625_v35  ;;  %v3366_v53 = vsub.f32 %v3310_v2, %v6625_v35  ;;  %v3353_v40 = vsub.f32 %v6585_v5, %v6625_v35  ;;  %v3534_v2 = vmul.f32 %v3530_v29, %v3510_v21 }
 0x442   :  { %v3415_v59 = vsel %vm3414_vm5, %v5191_v15, %v3411_v37 }
 0x443   :  { %v3374_v50 = vadd.f32 1e-12, %v3366_v53  ;;  %v3420_v8 = vsel %vm3417_vm6, %v3419_v57, %v3415_v59 }
 0x444   :  { %v3495_v31 = vmul.f32 %v3420_v8, %v3351_v61  ;;  %v3496_v14 = vmul.f32 %v3420_v8, %v3352_v13 }
 0x445   :  { %5192 = vrcp.f32 %v3374_v50  ;;  %v3430_v20 = vand.u32 2147483647, %v3374_v50  ;;  %v3432_v46 = vand.u32 2147483648, %v3374_v50  ;;  %vm3426_vm12 = vweird.f32 %v3374_v50 }
 0x446   :  { %v3536_v63 = vsub.f32 %v3496_v14, %v3532_v18  ;;  %v3535_v6 = vsub.f32 %v3495_v31, %v3531_v52 }
 0x447   :  { %v3433_v51 = vor.u32 1.1754944e-38, %v3432_v46  ;;  %vm3431_vm14 = vcmp.eq.f32.partialorder %v3430_v20, 8.507059e+37 }
 0x448   :  { %v3540_v27 = vmul.f32 0.5, %v3536_v63  ;;  %v3539_v34 = vmul.f32 0.5, %v3535_v6 }
 0x44a   :  { %v3543_v45 = vadd.f32 %v3539_v34, %v3531_v52  ;;  %v3544_v7 = vadd.f32 %v3540_v27, %v3532_v18 }
 0x44b   :  { %v5193_v19 = vpop.eup %5192 }
 0x44c   :  { %v3422_v16 = vmul.f32 %v5193_v19, %v3374_v50  ;;  %vm3547_vm8 = vcmp.ge.f32.partialorder %v3543_v45, 0.5  ;;  %vm3548_vm9 = vcmp.ge.f32.partialorder %v3544_v7, 0.5  ;;  %vm3427_vm11 = vweird.f32 %v5193_v19 }
 0x44d   :  { %v5030_v62 = vsel %vm3547_vm8, 1.0, %v7437_v1  ;;  %v5031_v26 = vsel %vm3548_vm9, 1.0, %v7437_v1  ;;  %vm3428_vm13 = vmor %vm3426_vm12, %vm3427_vm11 }
 0x44e   :  { %v3423_v49 = vsub.f32 1.0, %v3422_v16  ;;  %v5098_v41 = vpack.i.bf16 %v5030_v62, %v5028_v22  ;;  %v3559_v60 = vsub.f32 1.0, %v5030_v62  ;;  %v3560_v10 = vsub.f32 1.0, %v5031_v26 }
 0x44f   :  { %v2934_v56 = vpop.f32.mrf.mxu1 }
 0x450   :  { %v3424_v47 = vmul.f32 %v5193_v19, %v3423_v49  ;;  %5099 = vrot.lane.b32.xlu2 %v5098_v41, %s5259_s2  ;;  %v6646_v15 = vmul.f32 %v3559_v60, %v3543_v45  ;;  %v6648_v30 = vmul.f32 %v3560_v10, %v3544_v7 }
 0x452   :  { %v3425_v43 = vadd.f32 %v5193_v19, %v3424_v47 }
 0x454   :  { %v3429_v17 = vsel %vm3428_vm13, %v5193_v19, %v3425_v43  ;;  %v5118_v19 = vpack.i.bf16 %v5031_v26, %v6640_v11 }
 0x455   :  { %v3434_v24 = vsel %vm3431_vm14, %v3433_v51, %v3429_v17 }
 0x456   :  { %v3497_v28 = vmul.f32 %v3434_v24, %v3353_v40  ;;  %v3498_v33 = vmul.f32 %v3434_v24, %v3354_v25  ;;  %v3047_v39 = vpop.f32.mrf.mxu2 }
 0x457   :  { %v3163_v12 = vpop.f32.mrf.mxu3  ;;  %v2937_v4 = vpop.f32.mrf.mxu1  ;;  %v3048_v42 = vadd.f32 %v3047_v39, %v2934_v56 }
 0x458   :  { %v3537_v23 = vsub.f32 %v3497_v28, %v3533_v55  ;;  %v3538_v9 = vsub.f32 %v3498_v33, %v3534_v2 }
 0x459   :  { %v6664_v50 = vadd.f32 %v3163_v12, %v3048_v42 }
 0x45a   :  { %v3541_v53 = vmul.f32 0.5, %v3537_v23  ;;  %v3542_v3 = vmul.f32 0.5, %v3538_v9 }
 0x45b   :  { %v3239_v18 = vsel %vm990_vm10, %v6664_v50, inf  ;;  %v3311_v8 = vsel %vm990_vm10, %v6664_v50, -inf }
 0x45c   :  { %v6652_v0 = vadd.f32 %v3541_v53, %v3533_v55  ;;  %v6654_v37 = vadd.f32 %v3542_v3, %v3534_v2 }
 0x45e   :  { %vm3549_vm15 = vcmp.ge.f32.partialorder %v6652_v0, 0.5  ;;  %vm3550_vm0 = vcmp.ge.f32.partialorder %v6654_v37, 0.5  ;;  %v3050_v5 = vpop.f32.mrf.mxu2 }
 0x45f   :  { %v6659_v35 = vsel %vm3549_vm15, 1.0, %v7437_v1  ;;  %v6662_v25 = vsel %vm3550_vm0, 1.0, %v7437_v1  ;;  %v3051_v48 = vadd.f32 %v3050_v5, %v2937_v4  ;;  %v3166_v61 = vpop.f32.mrf.mxu3 }
 0x460   :  { %v5103_v57 = vpack.i.bf16 %v6659_v35, %v6618_v32  ;;  %v5123_v13 = vpack.i.bf16 %v6662_v25, %v6623_v44  ;;  %v2940_v32 = vpop.f32.mrf.mxu1 }
 0x461   :  { %v6670_v59 = vadd.f32 %v3166_v61, %v3051_v48 }
 0x462   :  { %5104 = vrot.lane.b32.xlu0 %v5103_v57, %s5259_s2 }
 0x463   :  { %v3240_v52 = vsel %vm990_vm10, %v6670_v59, inf  ;;  %v3312_v21 = vsel %vm990_vm10, %v6670_v59, -inf }
 0x464   :  { %v3241_v31 = vmin.f32 %v3239_v18, %v3240_v52  ;;  %v3313_v14 = vmax.f32 %v3311_v8, %v3312_v21 }
 0x466   :  { %v3242_v58 = vrot.slane %v3241_v31, 4  ;;  %v3314_v63 = vrot.slane %v3313_v14, 4  ;;  %v3053_v6 = vpop.f32.mrf.mxu2 }
 0x467   :  { %v3169_v16 = vpop.f32.mrf.mxu3  ;;  %v3054_v49 = vadd.f32 %v3053_v6, %v2940_v32 }
 0x468   :  { %v3243_v27 = vmin.f32 %v3241_v31, %v3242_v58  ;;  %v3315_v34 = vmax.f32 %v3313_v14, %v3314_v63  ;;  %v2943_v46 = vpop.f32.mrf.mxu1 }
 0x469   :  { %v6683_v56 = vadd.f32 %v3169_v16, %v3054_v49 }
 0x46a   :  { %5119 = vrot.lane.b32.xlu0 %v5118_v19, %s5259_s2  ;;  %v3244_v45 = vrot.slane %v3243_v27, 2  ;;  %v3316_v7 = vrot.slane %v3315_v34, 2 }
 0x46b   :  { %v3248_v51 = vsel %vm990_vm10, %v6683_v56, inf  ;;  %v3320_v17 = vsel %vm990_vm10, %v6683_v56, -inf }
 0x46c   :  { %v3245_v22 = vmin.f32 %v3243_v27, %v3244_v45  ;;  %v3317_v20 = vmax.f32 %v3315_v34, %v3316_v7 }
 0x46e   :  { %v3246_v47 = vrot.slane %v3245_v22, 1  ;;  %v3318_v62 = vrot.slane %v3317_v20, 1  ;;  %v3056_v41 = vpop.f32.mrf.mxu2 }
 0x46f   :  { %v3057_v11 = vadd.f32 %v3056_v41, %v2943_v46  ;;  %v3172_v26 = vpop.f32.mrf.mxu3 }
 0x470   :  { %v6685_v60 = vmin.f32 %v3245_v22, %v3246_v47  ;;  %v3319_v10 = vmax.f32 %v3317_v20, %v3318_v62  ;;  %v2946_v12 = vpop.f32.mrf.mxu1 }
 0x471   :  { %v6690_v29 = vadd.f32 %v3172_v26, %v3057_v11 }
 0x472   :  { %v3356_v43 = vsub.f32 %v6670_v59, %v6685_v60  ;;  %v3367_v38 = vsub.f32 %v3319_v10, %v6685_v60 }
 0x473   :  { %v3249_v24 = vsel %vm990_vm10, %v6690_v29, inf  ;;  %v3321_v28 = vsel %vm990_vm10, %v6690_v29, -inf }
 0x474   :  { %v3375_v40 = vadd.f32 1e-12, %v3367_v38  ;;  %v3250_v33 = vmin.f32 %v3248_v51, %v3249_v24  ;;  %v3322_v55 = vmax.f32 %v3320_v17, %v3321_v28 }
 0x476   :  { %5194 = vrcp.f32 %v3375_v40  ;;  %v3251_v2 = vrot.slane %v3250_v33, 4  ;;  %v3323_v39 = vrot.slane %v3322_v55, 4  ;;  %v3059_v23 = vpop.f32.mrf.mxu2  ;;  %v3444_v52 = vand.u32 2147483647, %v3375_v40 }
 0x477   :  { %v3175_v42 = vpop.f32.mrf.mxu3  ;;  %v3446_v21 = vand.u32 2147483648, %v3375_v40  ;;  %vm3440_vm3 = vweird.f32 %v3375_v40  ;;  %v3060_v45 = vadd.f32 %v3059_v23, %v2946_v12 }
 0x478   :  { %v3252_v9 = vmin.f32 %v3250_v33, %v3251_v2  ;;  %v3324_v4 = vmax.f32 %v3322_v55, %v3323_v39  ;;  %v2949_v63 = vpop.f32.mrf.mxu1  ;;  %vm3445_vm5 = vcmp.eq.f32.partialorder %v3444_v52, 8.507059e+37 }
 0x479   :  { %v3447_v16 = vor.u32 1.1754944e-38, %v3446_v21  ;;  %v6703_v62 = vadd.f32 %v3175_v42, %v3060_v45  ;;  %v3562_v42 = vsub.f32 1.0, %v6662_v25 }
 0x47a   :  { %v3253_v53 = vrot.slane %v3252_v9, 2  ;;  %v3325_v3 = vrot.slane %v3324_v4, 2 }
 0x47b   :  { %v3257_v38 = vsel %vm990_vm10, %v6703_v62, inf  ;;  %v3566_v21 = vmul.f32 %v3562_v42, %v6654_v37 }
 0x47c   :  { %v5195_v5 = vpop.eup %5194  ;;  %v3254_v61 = vmin.f32 %v3252_v9, %v3253_v53  ;;  %v3326_v57 = vmax.f32 %v3324_v4, %v3325_v3  ;;  %v3561_v53 = vsub.f32 1.0, %v6659_v35 }
 0x47d   :  { %v3436_v48 = vmul.f32 %v5195_v5, %v3375_v40  ;;  %vm3441_vm2 = vweird.f32 %v5195_v5 }
 0x47e   :  { %v3255_v18 = vrot.slane %v3254_v61, 1  ;;  %v3327_v8 = vrot.slane %v3326_v57, 1  ;;  %v3062_v32 = vpop.f32.mrf.mxu2  ;;  %vm3442_vm4 = vmor %vm3440_vm3, %vm3441_vm2 }
 0x47f   :  { %v3437_v59 = vsub.f32 1.0, %v3436_v48  ;;  %v3063_v6 = vadd.f32 %v3062_v32, %v2949_v63  ;;  %v3178_v22 = vpop.f32.mrf.mxu3 }
 0x480   :  { %v3256_v14 = vmin.f32 %v3254_v61, %v3255_v18  ;;  %v3328_v58 = vmax.f32 %v3326_v57, %v3327_v8  ;;  %v3565_v8 = vmul.f32 %v3561_v53, %v6652_v0 }
 0x481   :  { %v3438_v31 = vmul.f32 %v5195_v5, %v3437_v59  ;;  %v6701_v46 = vadd.f32 %v3178_v22, %v3063_v6 }
 0x482   :  { %v3358_v27 = vsub.f32 %v6690_v29, %v3256_v14  ;;  %v3368_v34 = vsub.f32 %v3328_v58, %v3256_v14  ;;  %v3329_v29 = vsel %vm990_vm10, %v6703_v62, -inf }
 0x483   :  { %v3439_v19 = vadd.f32 %v5195_v5, %v3438_v31  ;;  %v3258_v10 = vsel %vm990_vm10, %v6701_v46, inf  ;;  %v3330_v11 = vsel %vm990_vm10, %v6701_v46, -inf }
 0x484   :  { %v3376_v49 = vadd.f32 1e-12, %v3368_v34  ;;  %v3259_v17 = vmin.f32 %v3257_v38, %v3258_v10  ;;  %v3331_v24 = vmax.f32 %v3329_v29, %v3330_v11 }
 0x485   :  { %v3443_v7 = vsel %vm3442_vm4, %v5195_v5, %v3439_v19  ;;  %v3357_v5 = vsub.f32 %v6683_v56, %v3256_v14 }
 0x486   :  { %v3448_v20 = vsel %vm3445_vm5, %v3447_v16, %v3443_v7  ;;  %5196 = vrcp.f32 %v3376_v49  ;;  %v3460_v2 = vand.u32 2147483648, %v3376_v49  ;;  %v3260_v39 = vrot.slane %v3259_v17, 4 }
 0x487   :  { %v3500_v47 = vmul.f32 %v3448_v20, %v3356_v43  ;;  %v3355_v43 = vsub.f32 %v6664_v50, %v6685_v60  ;;  %v3332_v12 = vrot.slane %v3331_v24, 4  ;;  %v3458_v9 = vand.u32 2147483647, %v3376_v49 }
 0x488   :  { %vm3454_vm7 = vweird.f32 %v3376_v49  ;;  %v3261_v50 = vmin.f32 %v3259_v17, %v3260_v39 }
 0x489   :  { %v3568_v41 = vsub.f32 %v3500_v47, %v6648_v30  ;;  %v3499_v33 = vmul.f32 %v3448_v20, %v3355_v43  ;;  %v3333_v60 = vmax.f32 %v3331_v24, %v3332_v12  ;;  %vm3459_vm8 = vcmp.eq.f32.partialorder %v3458_v9, 8.507059e+37  ;;  %v5218_v43 = vld [vmem:[#allocation2 + $0x19] sm:$0xff] }
 0x48a   :  { %v3262_v52 = vrot.slane %v3261_v50, 2 }
 0x48b   :  { %v3572_v26 = vmul.f32 0.5, %v3568_v41  ;;  %v3567_v4 = vsub.f32 %v3499_v33, %v6646_v15  ;;  %v3334_v35 = vrot.slane %v3333_v60, 2 }
 0x48c   :  { %v5197_v51 = vpop.eup %5196  ;;  %v3263_v63 = vmin.f32 %v3261_v50, %v3262_v52 }
 0x48d   :  { %v6717_v40 = vadd.f32 %v3572_v26, %v6648_v30  ;;  %v3450_v28 = vmul.f32 %v5197_v51, %v3376_v49  ;;  %vm3455_vm6 = vweird.f32 %v5197_v51  ;;  %v3461_v30 = vor.u32 1.1754944e-38, %v3460_v2 }
 0x48e   :  { %vm3456_vm1 = vmor %vm3454_vm7, %vm3455_vm6  ;;  %v3571_v57 = vmul.f32 0.5, %v3567_v4  ;;  %v3335_v6 = vmax.f32 %v3333_v60, %v3334_v35  ;;  %v3264_v0 = vrot.slane %v3263_v63, 1 }
 0x48f   :  { %v3451_v55 = vsub.f32 1.0, %v3450_v28  ;;  %vm3580_vm11 = vcmp.ge.f32.partialorder %v6717_v40, 0.5 }
 0x490   :  { %v6726_v31 = vadd.f32 %v3571_v57, %v6646_v15  ;;  %v3336_v34 = vrot.slane %v3335_v6, 1  ;;  %v6748_v7 = vsel %vm3580_vm11, 1.0, %v7437_v1  ;;  %v6752_v22 = vmin.f32 %v3263_v63, %v3264_v0 }
 0x491   :  { %v3452_v23 = vmul.f32 %v5197_v51, %v3451_v55  ;;  %vm3829_vm11 = vcmask 1041409  }
 0x492   :  { %vm3579_vm9 = vcmp.ge.f32.partialorder %v6726_v31, 0.5  ;;  %v3337_v20 = vmax.f32 %v3335_v6, %v3336_v34 }
 0x493   :  { %v3453_v3 = vadd.f32 %v5197_v51, %v3452_v23  ;;  %v6737_v15 = vsel %vm3579_vm9, 1.0, %v7437_v1 }
 0x494   :  { %v3369_v41 = vsub.f32 %v3337_v20, %v6752_v22  ;;  %v3360_v20 = vsub.f32 %v6701_v46, %v6752_v22 }
 0x495   :  { %v3457_v48 = vsel %vm3456_vm1, %v5197_v51, %v3453_v3 }
 0x496   :  { %v3462_v61 = vsel %vm3459_vm8, %v3461_v30, %v3457_v48  ;;  %v3377_v38 = vadd.f32 1e-12, %v3369_v41  ;;  %v3592_v41 = vsub.f32 1.0, %v6748_v7 }
 0x497   :  { %v3501_v59 = vmul.f32 %v3462_v61, %v3357_v5  ;;  %v3502_v18 = vmul.f32 %v3462_v61, %v3358_v27 }
 0x498   :  { %5198 = vrcp.f32 %v3377_v38  ;;  %v3474_v63 = vand.u32 2147483648, %v3377_v38  ;;  %vm3468_vm15 = vweird.f32 %v3377_v38  ;;  %v3472_v6 = vand.u32 2147483647, %v3377_v38 }
 0x499   :  { %v3569_v32 = vsub.f32 %v3501_v59, %v3565_v8  ;;  %v3570_v58 = vsub.f32 %v3502_v18, %v3566_v21 }
 0x49a   :  { %v3475_v0 = vor.u32 1.1754944e-38, %v3474_v63  ;;  %vm3473_vm2 = vcmp.eq.f32.partialorder %v3472_v6, 8.507059e+37 }
 0x49b   :  { %v3573_v56 = vmul.f32 0.5, %v3569_v32  ;;  %v3574_v14 = vmul.f32 0.5, %v3570_v58 }
 0x49d   :  { %v6728_v19 = vadd.f32 %v3573_v56, %v3565_v8  ;;  %v6731_v27 = vadd.f32 %v3574_v14, %v3566_v21 }
 0x49e   :  { %v5199_v23 = vpop.eup %5198 }
 0x49f   :  { %vm3581_vm12 = vcmp.ge.f32.partialorder %v6728_v19, 0.5  ;;  %vm3582_vm13 = vcmp.ge.f32.partialorder %v6731_v27, 0.5  ;;  %v3464_v3 = vmul.f32 %v5199_v23, %v3377_v38  ;;  %vm3469_vm14 = vweird.f32 %v5199_v23 }
 0x4a0   :  { %v6740_v37 = vsel %vm3581_vm12, 1.0, %v7437_v1  ;;  %v6743_v16 = vsel %vm3582_vm13, 1.0, %v7437_v1  ;;  %vm3470_vm0 = vmor %vm3468_vm15, %vm3469_vm14  ;;  %vm3832_vm12 = vcmask 1042434   ;;  %vm3835_vm13 = vcmask 1043459  }
 0x4a1   :  { %v5108_v45 = vpack.i.bf16 %v6740_v37, %v6737_v15  ;;  %v5128_v49 = vpack.i.bf16 %v6743_v16, %v6748_v7  ;;  %v3465_v5 = vsub.f32 1.0, %v3464_v3  ;;  %v5224_v7 = vld [vmem:[#allocation2 + $0x21] sm:$0xff]  ;;  %vm3838_vm14 = vcmask 1044484  }
 0x4a2   :  { %vm3841_vm15 = vcmask 1045509  }
 0x4a3   :  { %5109 = vrot.lane.b32.xlu1 %v5108_v45, %s5259_s2  ;;  %v3466_v18 = vmul.f32 %v5199_v23, %v3465_v5  ;;  %v3359_v45 = vsub.f32 %v6703_v62, %v6752_v22 }
 0x4a5   :  { %v2952_v47 = vpop.f32.mrf.mxu1  ;;  %v3467_v32 = vadd.f32 %v5199_v23, %v3466_v18 }
 0x4a7   :  { %v3471_v14 = vsel %vm3470_vm0, %v5199_v23, %v3467_v32  ;;  %v3593_v23 = vsub.f32 1.0, %v6740_v37  ;;  %vm3844_vm0 = vcmask 1046534  }
 0x4a8   :  { %v3476_v34 = vsel %vm3473_vm2, %v3475_v0, %v3471_v14  ;;  %v5221_v14 = vld [vmem:[#allocation2 + $0x31] sm:$0xff]  ;;  %vm3847_vm2 = vcmask 1047559  }
 0x4a9   :  { %v3504_v38 = vmul.f32 %v3476_v34, %v3360_v20  ;;  %v3597_v37 = vmul.f32 %v3593_v23, %v6728_v19 }
 0x4aa   :  { %v6756_v26 = vpop.permute.xlu2 %5099 }
 0x4ab   :  { %5124 = vrot.lane.b32.xlu1 %v5123_v13, %s5259_s2  ;;  %v5101_v29 = vunpack.i.l.bf16 %v6756_v26  ;;  %v5102_v6 = vunpack.i.h.bf16 %v6756_v26  ;;  %v5223_v26 = vld [vmem:[#allocation2 + $0x61] sm:$0xff] }
 0x4ac   :  { %v3065_v10 = vpop.f32.mrf.mxu2 }
 0x4ad   :  { %v3181_v11 = vpop.f32.mrf.mxu3  ;;  %v3066_v51 = vadd.f32 %v3065_v10, %v2952_v47  ;;  %v3689_v17 = vadd.f32 %v5218_v43, %v5101_v29  ;;  %v2955_v28 = vpop.f32.mrf.mxu1  ;;  %v3591_v47 = vsub.f32 1.0, %v6737_v15  ;;  %v3596_v43 = vmul.f32 %v3592_v41, %v6717_v40  ;;  %v5219_v15 = vld [vmem:[#allocation2 + $0x49] sm:$0xff] }
 0x4ae   :  { %v3691_v0 = vadd.f32 %v5221_v14, %v5102_v6 }
 0x4af   :  { %v3705_v24 = vmul.f32 0.5, %v3689_v17  ;;  %v6763_v55 = vadd.f32 %v3181_v11, %v3066_v51  ;;  %v3503_v11 = vmul.f32 %v3476_v34, %v3359_v45  ;;  %v3595_v51 = vmul.f32 %v3591_v47, %v6726_v31 }
 0x4b0   :  { %v3600_v62 = vsub.f32 %v3504_v38, %v3596_v43  ;;  %v3707_v34 = vmul.f32 0.5, %v3691_v0 }
 0x4b1   :  { %v3266_v44 = vsel %vm990_vm10, %v6763_v55, inf  ;;  %v3338_v25 = vsel %vm990_vm10, %v6763_v55, -inf }
 0x4b3   :  { %3739 = vrot.lane.b32.xlu1 %v3705_v24, %s5260_s20 }
 0x4b4   :  { %v3068_v33 = vpop.f32.mrf.mxu2 }
 0x4b5   :  { %v3069_v2 = vadd.f32 %v3068_v33, %v2955_v28  ;;  %v3184_v39 = vpop.f32.mrf.mxu3 }
 0x4b7   :  { %v6766_v12 = vadd.f32 %v3184_v39, %v3069_v2  ;;  %v3599_v2 = vsub.f32 %v3503_v11, %v3595_v51 }
 0x4b9   :  { %v3267_v13 = vsel %vm990_vm10, %v6766_v12, inf  ;;  %v3339_v9 = vsel %vm990_vm10, %v6766_v12, -inf }
 0x4ba   :  { %v3268_v4 = vmin.f32 %v3266_v44, %v3267_v13  ;;  %v3340_v53 = vmax.f32 %v3338_v25, %v3339_v9  ;;  %v3594_v25 = vsub.f32 1.0, %v6743_v16  ;;  %v3604_v13 = vmul.f32 0.5, %v3600_v62 }
 0x4bb   :  { %v3603_v9 = vmul.f32 0.5, %v3599_v2 }
 0x4bc   :  { %v3269_v30 = vrot.slane %v3268_v4, 4  ;;  %v3341_v50 = vrot.slane %v3340_v53, 4 }
 0x4be   :  { %v3270_v60 = vmin.f32 %v3268_v4, %v3269_v30  ;;  %v3342_v42 = vmax.f32 %v3340_v53, %v3341_v50 }
 0x4c0   :  { %v3271_v48 = vrot.slane %v3270_v60, 2  ;;  %v3343_v61 = vrot.slane %v3342_v42, 2 }
 0x4c2   :  { %v3272_v57 = vmin.f32 %v3270_v60, %v3271_v48  ;;  %v3344_v59 = vmax.f32 %v3342_v42, %v3343_v61  ;;  %v3598_v42 = vmul.f32 %v3594_v25, %v6731_v27  ;;  %v3608_v48 = vadd.f32 %v3604_v13, %v3596_v43 }
 0x4c4   :  { %v3273_v8 = vrot.slane %v3272_v57, 1  ;;  %v3345_v52 = vrot.slane %v3344_v59, 1  ;;  %vm3612_vm7 = vcmp.ge.f32.partialorder %v3608_v48, 0.5 }
 0x4c6   :  { %v3274_v35 = vmin.f32 %v3272_v57, %v3273_v8  ;;  %v3346_v21 = vmax.f32 %v3344_v59, %v3345_v52  ;;  %v3607_v57 = vadd.f32 %v3603_v9, %v3595_v51  ;;  %v5039_v8 = vsel %vm3612_vm7, 1.0, %v7437_v1 }
 0x4c8   :  { %v3370_v58 = vsub.f32 %v3346_v21, %v3274_v35  ;;  %v3361_v4 = vsub.f32 %v6763_v55, %v3274_v35  ;;  %v3362_v53 = vsub.f32 %v6766_v12, %v3274_v35  ;;  %vm3611_vm1 = vcmp.ge.f32.partialorder %v3607_v57, 0.5 }
 0x4c9   :  { %v5038_v52 = vsel %vm3611_vm1, 1.0, %v7437_v1 }
 0x4ca   :  { %v3378_v56 = vadd.f32 1e-12, %v3370_v58  ;;  %v5220_v58 = vld [vmem:[#allocation2 + $0x1] sm:$0xff] }
 0x4cc   :  { %5200 = vrcp.f32 %v3378_v56  ;;  %v3488_v28 = vand.u32 2147483648, %v3378_v56  ;;  %v3486_v46 = vand.u32 2147483647, %v3378_v56  ;;  %vm3482_vm4 = vweird.f32 %v3378_v56 }
 0x4ce   :  { %v3489_v31 = vor.u32 1.1754944e-38, %v3488_v28  ;;  %vm3487_vm6 = vcmp.eq.f32.partialorder %v3486_v46, 8.507059e+37  ;;  %v5043_v46 = vld [vmem:[%s7435_s5 + $0x18] sm:$0xff] }
 0x4cf   :  { %3865 = vmatpush.msrb.mxu0 %v5043_v46 }
 0x4d2   :  { %v5201_v10 = vpop.eup %5200 }
 0x4d3   :  { %v3478_v29 = vmul.f32 %v5201_v10, %v3378_v56  ;;  %vm3483_vm3 = vweird.f32 %v5201_v10 }
 0x4d4   :  { %v5105_v24 = vpop.permute.xlu0 %5104  ;;  %vm3484_vm5 = vmor %vm3482_vm4, %vm3483_vm3 }
 0x4d5   :  { %v3479_v17 = vsub.f32 1.0, %v3478_v29  ;;  %v5107_v33 = vunpack.i.h.bf16 %v5105_v24  ;;  %v5106_v35 = vunpack.i.l.bf16 %v5105_v24 }
 0x4d7   :  { %v3480_v39 = vmul.f32 %v5201_v10, %v3479_v17  ;;  %v3693_v22 = vadd.f32 %v5219_v15, %v5107_v33  ;;  %v3687_v63 = vadd.f32 %v5220_v58, %v5106_v35  ;;  %v5225_v33 = vld [vmem:[#allocation2 + $0x51] sm:$0xff]  ;;  %v5231_v58 = vld [vmem:[#allocation2 + $0x99] sm:$0xff] }
 0x4d8   :  { %v5050_v15 = vld [vmem:[%s7435_s5 + $0x38] sm:$0xff] }
 0x4d9   :  { %v3481_v44 = vadd.f32 %v5201_v10, %v3480_v39  ;;  %v3709_v40 = vmul.f32 0.5, %v3693_v22  ;;  %v3703_v56 = vmul.f32 0.5, %v3687_v63  ;;  %v5047_v39 = vld [vmem:[%s7435_s5 + $0x28] sm:$0xff]  ;;  %4020 = vmatpush.msrb.mxu3 %v5050_v15 }
 0x4da   :  { %3964 = vmatpush.msrb.mxu2 %v5047_v39  ;;  %v3808_v22 = vld [vmem:[%s7435_s5 + $0x8] sm:$0xff] }
 0x4db   :  { %v3485_v3 = vsel %vm3484_vm5, %v5201_v10, %v3481_v44  ;;  %3747 = vrot.lane.b32.xlu1 %v3709_v40, %s5260_s20  ;;  %v5222_v10 = vld [vmem:[#allocation2 + $0x79] sm:$0xff]  ;;  %3909 = vmatpush.msrb.mxu1 %v3808_v22  ;;  %v5226_v40 = vld [vmem:[#allocation2 + $0x91] sm:$0xff] }
 0x4dc   :  { %v3490_v30 = vsel %vm3487_vm6, %v3489_v31, %v3485_v3  ;;  %v5120_v41 = vpop.permute.xlu0 %5119 }
 0x4dd   :  { %v3505_v50 = vmul.f32 %v3490_v30, %v3361_v4  ;;  %v3506_v60 = vmul.f32 %v3490_v30, %v3362_v53  ;;  %v5121_v29 = vunpack.i.l.bf16 %v5120_v41  ;;  %v5122_v9 = vunpack.i.h.bf16 %v5120_v41 }
 0x4df   :  { %v3602_v5 = vsub.f32 %v3506_v60, %v3598_v42  ;;  %v3601_v61 = vsub.f32 %v3505_v50, %v3597_v37  ;;  %v5228_v60 = vld [vmem:[#allocation2 + $0x9] sm:$0xff] }
 0x4e1   :  { %v3606_v59 = vmul.f32 0.5, %v3602_v5  ;;  %v3605_v18 = vmul.f32 0.5, %v3601_v61 }
 0x4e3   :  { %v3610_v55 = vadd.f32 %v3606_v59, %v3598_v42  ;;  %v3609_v12 = vadd.f32 %v3605_v18, %v3597_v37  ;;  %v5227_v37 = vld [vmem:[#allocation2 + $0x39] sm:$0xff]  ;;  %v5229_v18 = vld [vmem:[#allocation2 + $0x81] sm:$0xff] }
 0x4e4   :  { %v3692_v50 = vadd.f32 %v5227_v37, %v5122_v9 }
 0x4e5   :  { %vm3614_vm8 = vcmp.ge.f32.partialorder %v3610_v55, 0.5  ;;  %vm3613_vm9 = vcmp.ge.f32.partialorder %v3609_v12, 0.5  ;;  %v5230_v12 = vld [vmem:[#allocation2 + $0x69] sm:$0xff] }
 0x4e6   :  { %v5041_v19 = vsel %vm3614_vm8, 1.0, %v7437_v1  ;;  %v5040_v27 = vsel %vm3613_vm9, 1.0, %v7437_v1  ;;  %v3708_v57 = vmul.f32 0.5, %v3692_v50 }
 0x4e7   :  { %v5133_v21 = vpack.i.bf16 %v5041_v19, %v5039_v8  ;;  %v5113_v32 = vpack.i.bf16 %v5040_v27, %v5038_v52 }
 0x4e9   :  { %5134 = vrot.lane.b32.xlu0 %v5133_v21, %s5259_s2  ;;  %5114 = vrot.lane.b32.xlu2 %v5113_v32, %s5259_s2 }
 0x4f1   :  { %3735 = vrot.lane.b32.xlu0 %v3703_v56, %s5260_s20  ;;  %5129 = vrot.lane.b32.xlu2 %v5128_v49, %s5259_s2  ;;  %v3690_v49 = vadd.f32 %v5224_v7, %v5121_v29 }
 0x4f3   :  { %v3706_v24 = vmul.f32 0.5, %v3690_v49 }
 0x4f9   :  { %3743 = vrot.lane.b32.xlu2 %v3707_v34, %s5260_s20  ;;  %v5046_v34 = vld [vmem:[%s7435_s5 + $0x20] sm:$0xff] }
 0x4fa   :  { %3965 = vmatpush.msrb.mxu2 %v5046_v34  ;;  %v5052_v34 = vld [vmem:[%s7435_s5 + $0x40] sm:$0xff] }
 0x515   :  { %v5110_v45 = vpop.permute.xlu1 %5109 }
 0x516   :  { %v5112_v20 = vunpack.i.h.bf16 %v5110_v45  ;;  %v5111_v47 = vunpack.i.l.bf16 %v5110_v45  ;;  %v5049_v45 = vld [vmem:[%s7435_s5 + $0x30] sm:$0xff] }
 0x517   :  { %4021 = vmatpush.msrb.mxu3 %v5049_v45 }
 0x518   :  { %v3697_v11 = vadd.f32 %v5222_v10, %v5112_v20  ;;  %v3695_v38 = vadd.f32 %v5223_v26, %v5111_v47  ;;  %v3807_v20 = vld [vmem:[%s7435_s5] sm:$0xff] }
 0x519   :  { %3910 = vmatpush.msrb.mxu1 %v3807_v20 }
 0x51a   :  { %v3713_v51 = vmul.f32 0.5, %v3697_v11  ;;  %v3711_v43 = vmul.f32 0.5, %v3695_v38 }
 0x51c   :  { %3755 = vrot.lane.b32.xlu0 %v3713_v51, %s5260_s20  ;;  %3751 = vrot.lane.b32.xlu2 %v3711_v43, %s5260_s20 }
 0x51d   :  { %v5125_v16 = vpop.permute.xlu1 %5124 }
 0x51e   :  { %v5127_v17 = vunpack.i.h.bf16 %v5125_v16  ;;  %v5126_v4 = vunpack.i.l.bf16 %v5125_v16 }
 0x520   :  { %v3694_v62 = vadd.f32 %v5225_v33, %v5127_v17  ;;  %v3688_v42 = vadd.f32 %v5228_v60, %v5126_v4 }
 0x522   :  { %v3710_v2 = vmul.f32 0.5, %v3694_v62  ;;  %v3704_v61 = vmul.f32 0.5, %v3688_v42 }
 0x524   :  { %3741 = vrot.lane.b32.xlu0 %v3706_v24, %s5260_s20 }
 0x525   :  { %v3740_v28 = vpop.permute.xlu1 %3739 }
 0x526   :  { %3785 = vst.msk [vmem:[#allocation2 + $0x19] sm:$0xff] %vm990_vm10, %v3740_v28 }
 0x52c   :  { %3749 = vrot.lane.b32.xlu0 %v3710_v2, %s5260_s20 }
 0x52d   :  { %v6849_v10 = vld [vmem:[#allocation2 + $0x1a] sm:$0x1]  ;;  %v6851_v11 = vld [vmem:[#allocation2 + $0x19] sm:$0x1]  ;;  %v6853_v26 = vld [vmem:[#allocation2 + $0x1b] sm:$0x1] }
 0x52e   :  { %v6855_v38 = vld [vmem:[#allocation2 + $0x1c] sm:$0x1]  ;;  %v6857_v51 = vld [vmem:[#allocation2 + $0x1d] sm:$0x1]  ;;  %v3828_v43 = vrot.slane %v6849_v10, 7  ;;  %v3879_v16 = vrot.slane %v6851_v11, 7 }
 0x52f   :  { %v6862_v7 = vld [vmem:[#allocation2 + $0x1e] sm:$0x1]  ;;  %v3934_v17 = vrot.slane %v6853_v26, 7  ;;  %v3990_v24 = vrot.slane %v6855_v38, 7  ;;  %v6866_v28 = vld [vmem:[#allocation2 + $0x1f] sm:$0x1] }
 0x530   :  { %v6868_v33 = vld [vmem:[#allocation2 + $0x20] sm:$0x1]  ;;  %v4046_v39 = vrot.slane %v6857_v51, 7 }
 0x531   :  { %v4214_v9 = vrot.slane %v6868_v33, 7 }
 0x543   :  { %v5115_v23 = vpop.permute.xlu2 %5114 }
 0x544   :  { %v5117_v44 = vunpack.i.h.bf16 %v5115_v23  ;;  %v5116_v25 = vunpack.i.l.bf16 %v5115_v23 }
 0x546   :  { %v3701_v31 = vadd.f32 %v5117_v44, %v6563_v36  ;;  %v3699_v13 = vadd.f32 %v5226_v40, %v5116_v25  ;;  %v4102_v40 = vrot.slane %v6862_v7, 7 }
 0x548   :  { %v3717_v53 = vmul.f32 0.5, %v3701_v31  ;;  %v3715_v3 = vmul.f32 0.5, %v3699_v13  ;;  %v4158_v13 = vrot.slane %v6866_v28, 7 }
 0x54a   :  { %3763 = vrot.lane.b32.xlu2 %v3717_v53, %s5260_s20  ;;  %3759 = vrot.lane.b32.xlu1 %v3715_v3, %s5260_s20 }
 0x54b   :  { %v5130_v30 = vpop.permute.xlu2 %5129 }
 0x54c   :  { %v5132_v48 = vunpack.i.h.bf16 %v5130_v30  ;;  %v5131_v36 = vunpack.i.l.bf16 %v5130_v30 }
 0x54d   :  { %v3748_v5 = vpop.permute.xlu1 %3747 }
 0x54e   :  { %3789 = vst.msk [vmem:[#allocation2 + $0x49] sm:$0xff] %vm990_vm10, %v3748_v5  ;;  %v3698_v55 = vadd.f32 %v5229_v18, %v5132_v48  ;;  %v3696_v8 = vadd.f32 %v5230_v12, %v5131_v36 }
 0x550   :  { %v3714_v19 = vmul.f32 0.5, %v3698_v55  ;;  %v3712_v52 = vmul.f32 0.5, %v3696_v8 }
 0x552   :  { %3737 = vrot.lane.b32.xlu2 %v3704_v61, %s5260_s20  ;;  %3745 = vrot.lane.b32.xlu1 %v3708_v57, %s5260_s20 }
 0x553   :  { %v3744_v59 = vpop.permute.xlu2 %3743 }
 0x554   :  { %3787 = vst.msk [vmem:[#allocation2 + $0x31] sm:$0xff] %vm990_vm10, %v3744_v59 }
 0x555   :  { %v6871_v62 = vld [vmem:[#allocation2 + $0x4a] sm:$0x1]  ;;  %v6873_v2 = vld [vmem:[#allocation2 + $0x49] sm:$0x1]  ;;  %v6876_v46 = vld [vmem:[#allocation2 + $0x4b] sm:$0x1] }
 0x556   :  { %v6878_v15 = vld [vmem:[#allocation2 + $0x4c] sm:$0x1]  ;;  %v6880_v22 = vld [vmem:[#allocation2 + $0x4d] sm:$0x1]  ;;  %v6882_v23 = vld [vmem:[#allocation2 + $0x4e] sm:$0x1] }
 0x557   :  { %v6884_v44 = vld [vmem:[#allocation2 + $0x4f] sm:$0x1]  ;;  %v6886_v25 = vld [vmem:[#allocation2 + $0x50] sm:$0x1]  ;;  %v3834_v31 = vrot.slane %v6871_v62, 5  ;;  %v3883_v4 = vrot.slane %v6873_v2, 5 }
 0x558   :  { %v3938_v53 = vrot.slane %v6876_v46, 5  ;;  %v3994_v3 = vrot.slane %v6878_v15, 5  ;;  %v7447_v46 = vrot.slane %v6882_v23, 5  ;;  %v7448_v15 = vrot.slane %v6884_v44, 5 }
 0x55a   :  { %3757 = vrot.lane.b32.xlu2 %v3714_v19, %s5260_s20  ;;  %3753 = vrot.lane.b32.xlu1 %v3712_v52, %s5260_s20 }
 0x55b   :  { %v5135_v27 = vpop.permute.xlu0 %5134  ;;  %v6896_v37 = vld [vmem:[#allocation2 + $0x32] sm:$0x1]  ;;  %v6901_v5 = vld [vmem:[#allocation2 + $0x31] sm:$0x1]  ;;  %v6903_v48 = vld [vmem:[#allocation2 + $0x33] sm:$0x1] }
 0x55c   :  { %v5137_v35 = vunpack.i.h.bf16 %v5135_v27  ;;  %v5136_v21 = vunpack.i.l.bf16 %v5135_v27  ;;  %v6905_v36 = vld [vmem:[#allocation2 + $0x34] sm:$0x1]  ;;  %v6907_v57 = vld [vmem:[#allocation2 + $0x35] sm:$0x1]  ;;  %v6909_v59 = vld [vmem:[#allocation2 + $0x36] sm:$0x1] }
 0x55d   :  { %v6911_v18 = vld [vmem:[#allocation2 + $0x37] sm:$0x1]  ;;  %v3831_v12 = vrot.slane %v6896_v37, 6  ;;  %v6915_v8 = vld [vmem:[#allocation2 + $0x38] sm:$0x1]  ;;  %v3881_v27 = vrot.slane %v6901_v5, 6 }
 0x55e   :  { %v3702_v32 = vadd.f32 %v5137_v35, %v6589_v54  ;;  %v3700_v63 = vadd.f32 %v5231_v58, %v5136_v21  ;;  %v5042_v54 = vld [vmem:[%s7435_s5 + $0x10] sm:$0xff]  ;;  %v3936_v21 = vrot.slane %v6903_v48, 6  ;;  %v5053_v58 = vld [vmem:[%s7435_s5 + $0x48] sm:$0xff]  ;;  %v4048_v45 = vrot.slane %v6907_v57, 6 }
 0x55f   :  { %3866 = vmatpush.msrb.mxu0 %v5042_v54  ;;  %v5055_v54 = vld [vmem:[%s7435_s5 + $0x50] sm:$0xff]  ;;  %v4104_v20 = vrot.slane %v6909_v59, 6 }
 0x560   :  { %v3716_v6 = vmul.f32 0.5, %v3700_v63  ;;  %v3718_v56 = vmul.f32 0.5, %v3702_v32  ;;  %v5056_v63 = vld [vmem:[%s7435_s5 + $0x58] sm:$0xff] }
 0x561   :  { %4076 = vmatpush.msra.mxu0 %v5053_v58  ;;  %4132 = vmatpush.msra.mxu1 %v5056_v63 }
 0x562   :  { %3761 = vrot.lane.b32.xlu0 %v3716_v6, %s5260_s20  ;;  %3765 = vrot.lane.b32.xlu1 %v3718_v56, %s5260_s20  ;;  %v5059_v6 = vld [vmem:[%s7435_s5 + $0x68] sm:$0xff] }
 0x563   :  { %v3736_v14 = vpop.permute.xlu0 %3735  ;;  %4188 = vmatpush.msra.mxu2 %v5059_v6  ;;  %4077 = vmatpush.msra.mxu0 %v5052_v34 }
 0x564   :  { %3783 = vst.msk [vmem:[#allocation2 + $0x1] sm:$0xff] %vm990_vm10, %v3736_v14  ;;  %v3992_v14 = vrot.slane %v6905_v36, 6  ;;  %v4216_v36 = vrot.slane %v6915_v8, 6  ;;  %4133 = vmatpush.msra.mxu1 %v5055_v54 }
 0x56b   :  { %v3809_v55 = vld [vmem:[#allocation2 + $0x2] sm:$0x1]  ;;  %v3799_v52 = vld [vmem:[#allocation2 + $0x1] sm:$0x1]  ;;  %v3915_v35 = vld [vmem:[#allocation2 + $0x3] sm:$0x1] }
 0x56c   :  { %v3971_v32 = vld [vmem:[#allocation2 + $0x4] sm:$0x1]  ;;  %v4027_v57 = vld [vmem:[#allocation2 + $0x5] sm:$0x1]  ;;  %v3880_v60 = vsel %vm3829_vm11, %v3879_v16, %v3799_v52  ;;  %v3935_v10 = vsel %vm3829_vm11, %v3934_v17, %v3915_v35  ;;  %v4083_v16 = vld [vmem:[#allocation2 + $0x6] sm:$0x1] }
 0x56d   :  { %v4139_v52 = vld [vmem:[#allocation2 + $0x7] sm:$0x1]  ;;  %v4195_v30 = vld [vmem:[#allocation2 + $0x8] sm:$0x1]  ;;  %v3882_v17 = vsel %vm3832_vm12, %v3881_v27, %v3880_v60  ;;  %v3937_v51 = vsel %vm3832_vm12, %v3936_v21, %v3935_v10  ;;  %v4103_v5 = vsel %vm3829_vm11, %v4102_v40, %v4083_v16 }
 0x56e   :  { %v4159_v60 = vsel %vm3829_vm11, %v4158_v13, %v4139_v52  ;;  %v4215_v48 = vsel %vm3829_vm11, %v4214_v9, %v4195_v30  ;;  %v4105_v52 = vsel %vm3832_vm12, %v4104_v20, %v4103_v5 }
 0x576   :  { %v3752_v0 = vpop.permute.xlu2 %3751 }
 0x577   :  { %3791 = vst.msk [vmem:[#allocation2 + $0x61] sm:$0xff] %vm990_vm10, %v3752_v0  ;;  %v5062_v0 = vld [vmem:[%s7435_s5 + $0x78] sm:$0xff] }
 0x578   :  { %4244 = vmatpush.msra.mxu3 %v5062_v0  ;;  %v3830_v0 = vsel %vm3829_vm11, %v3828_v43, %v3809_v55  ;;  %v3991_v43 = vsel %vm3829_vm11, %v3990_v24, %v3971_v32 }
 0x579   :  { %v3833_v24 = vsel %vm3832_vm12, %v3831_v12, %v3830_v0 }
 0x57a   :  { %v3836_v59 = vsel %vm3835_vm13, %v3834_v31, %v3833_v24  ;;  %v7445_v31 = vrot.slane %v6880_v22, 5  ;;  %v7449_v22 = vrot.slane %v6886_v25, 5 }
 0x57e   :  { %v6917_v19 = vld [vmem:[#allocation2 + $0x62] sm:$0x1]  ;;  %v6930_v56 = vld [vmem:[#allocation2 + $0x61] sm:$0x1]  ;;  %v6956_v58 = vld [vmem:[#allocation2 + $0x65] sm:$0x1] }
 0x57f   :  { %v6958_v63 = vld [vmem:[#allocation2 + $0x66] sm:$0x1]  ;;  %v6965_v1 = vld [vmem:[#allocation2 + $0x67] sm:$0x1]  ;;  %v6967_v42 = vld [vmem:[#allocation2 + $0x68] sm:$0x1] }
 0x58e   :  { %v3756_v47 = vpop.permute.xlu0 %3755 }
 0x58f   :  { %3793 = vst.msk [vmem:[#allocation2 + $0x79] sm:$0xff] %vm990_vm10, %v3756_v47  ;;  %v6944_v47 = vld [vmem:[#allocation2 + $0x63] sm:$0x1] }
 0x596   :  { %v3742_v41 = vpop.permute.xlu0 %3741  ;;  %v6960_v6 = vld [vmem:[#allocation2 + $0x7a] sm:$0x1]  ;;  %v6970_v54 = vld [vmem:[#allocation2 + $0x79] sm:$0x1]  ;;  %v6975_v50 = vld [vmem:[#allocation2 + $0x7b] sm:$0x1] }
 0x597   :  { %3786 = vst.msk [vmem:[#allocation2 + $0x21] sm:$0xff] %vm990_vm10, %v3742_v41  ;;  %v5058_v41 = vld [vmem:[%s7435_s5 + $0x60] sm:$0xff]  ;;  %v6994_v34 = vld [vmem:[#allocation2 + $0x7c] sm:$0x1]  ;;  %v6996_v11 = vld [vmem:[#allocation2 + $0x7d] sm:$0x1] }
 0x598   :  { %4189 = vmatpush.msra.mxu2 %v5058_v41  ;;  %v3885_v41 = vrot.slane %v6930_v56, 4  ;;  %v7003_v26 = vld [vmem:[#allocation2 + $0x7f] sm:$0x1]  ;;  %v7005_v38 = vld [vmem:[#allocation2 + $0x80] sm:$0x1]  ;;  %v4054_v7 = vrot.slane %v6996_v11, 3 }
 0x599   :  { %v4166_v28 = vrot.slane %v7003_v26, 3  ;;  %v4222_v33 = vrot.slane %v7005_v38, 3 }
 0x59e   :  { %v3750_v29 = vpop.permute.xlu0 %3749  ;;  %v7019_v32 = vld [vmem:[#allocation2 + $0x22] sm:$0x1]  ;;  %v7021_v35 = vld [vmem:[#allocation2 + $0x23] sm:$0x1]  ;;  %v7033_v12 = vld [vmem:[#allocation2 + $0x24] sm:$0x1] }
 0x59f   :  { %3790 = vst.msk [vmem:[#allocation2 + $0x51] sm:$0xff] %vm990_vm10, %v3750_v29  ;;  %v5061_v29 = vld [vmem:[%s7435_s5 + $0x70] sm:$0xff]  ;;  %v7035_v27 = vld [vmem:[#allocation2 + $0x25] sm:$0x1]  ;;  %v7037_v21 = vld [vmem:[#allocation2 + $0x26] sm:$0x1] }
 0x5a0   :  { %4245 = vmatpush.msra.mxu3 %v5061_v29  ;;  %v7001_v29 = vld [vmem:[#allocation2 + $0x7e] sm:$0x1]  ;;  %v7043_v13 = vld [vmem:[#allocation2 + $0x27] sm:$0x1]  ;;  %v7065_v10 = vld [vmem:[#allocation2 + $0x28] sm:$0x1] }
 0x5a1   :  { %v4110_v40 = vrot.slane %v7001_v29, 3 }
 0x5a4   :  { %v3764_v49 = vpop.permute.xlu2 %3763 }
 0x5a5   :  { %3797 = vst.msk [vmem:[#allocation2 + $0xa9] sm:$0xff] %vm990_vm10, %v3764_v49  ;;  %v4160_v49 = vrot.slane %v6911_v18, 6 }
 0x5a6   :  { %v7062_v30 = vld [vmem:[#allocation2 + $0x51] sm:$0x1]  ;;  %v7072_v20 = vld [vmem:[#allocation2 + $0x53] sm:$0x1]  ;;  %v7074_v18 = vld [vmem:[#allocation2 + $0x54] sm:$0x1] }
 0x5ac   :  { %v3738_v61 = vpop.permute.xlu2 %3737  ;;  %v3806_v8 = vld [vmem:[#allocation2 + $0xa9] sm:$0x1]  ;;  %v3922_v5 = vld [vmem:[#allocation2 + $0xab] sm:$0x1]  ;;  %v3978_v2 = vld [vmem:[#allocation2 + $0xac] sm:$0x1] }
 0x5ad   :  { %3784 = vst.msk [vmem:[#allocation2 + $0x9] sm:$0xff] %vm990_vm10, %v3738_v61  ;;  %v6954_v61 = vld [vmem:[#allocation2 + $0x64] sm:$0x1]  ;;  %v7091_v16 = vld [vmem:[#allocation2 + $0xad] sm:$0x1] }
 0x5b4   :  { %v3758_v55 = vpop.permute.xlu2 %3757  ;;  %v4475_v11 = vld [vmem:[#allocation2 + $0xd] sm:$0x1] }
 0x5b5   :  { %3794 = vst.msk [vmem:[#allocation2 + $0x81] sm:$0xff] %vm990_vm10, %v3758_v55  ;;  %v4047_v55 = vsel %vm3829_vm11, %v4046_v39, %v4027_v57  ;;  %v3993_v39 = vsel %vm3832_vm12, %v3992_v14, %v3991_v43  ;;  %v7017_v57 = vld [vmem:[#allocation2 + $0x21] sm:$0x1]  ;;  %v3998_v14 = vrot.slane %v6994_v34, 3  ;;  %v5065_v34 = vld [vmem:[%s7435_s5 + $0x88] sm:$0xff] }
 0x5b6   :  { %v4049_v37 = vsel %vm3832_vm12, %v4048_v45, %v4047_v55  ;;  %v4270_v9 = vrot.slane %v7017_v57, 7  ;;  %v4161_v55 = vsel %vm3832_vm12, %v4160_v49, %v4159_v60  ;;  %v4217_v45 = vsel %vm3832_vm12, %v4216_v36, %v4215_v48  ;;  %v3816_v49 = vld [vmem:[#allocation2 + $0xaa] sm:$0x1]  ;;  %v7225_v57 = vld [vmem:[#allocation2 + $0x58] sm:$0x1] }
 0x5b7   :  { %v3884_v36 = vsel %vm3835_vm13, %v3883_v4, %v3882_v17  ;;  %v3939_v60 = vsel %vm3835_vm13, %v3938_v53, %v3937_v51  ;;  %v3995_v62 = vsel %vm3835_vm13, %v3994_v3, %v3993_v39  ;;  %v4051_v24 = vsel %vm3835_vm13, %v7445_v31, %v4049_v37  ;;  %v7093_v4 = vld [vmem:[#allocation2 + $0xae] sm:$0x1]  ;;  %v7114_v31 = vld [vmem:[#allocation2 + $0xaf] sm:$0x1] }
 0x5b8   :  { %v7446_v48 = vrot.slane %v6917_v19, 4  ;;  %v4107_v53 = vsel %vm3835_vm13, %v7447_v46, %v4105_v52  ;;  %v7101_v3 = vsel %vm3835_vm13, %v7448_v15, %v4161_v55  ;;  %v7106_v19 = vsel %vm3835_vm13, %v7449_v22, %v4217_v45 }
 0x5b9   :  { %v3846_v23 = vrot.slane %v3816_v49, 1  ;;  %v3891_v37 = vrot.slane %v3806_v8, 1  ;;  %v3946_v52 = vrot.slane %v3922_v5, 1  ;;  %v4058_v55 = vrot.slane %v7091_v16, 1 }
 0x5ba   :  { %v3839_v43 = vsel %vm3838_vm14, %v7446_v48, %v3836_v59  ;;  %v4002_v59 = vrot.slane %v3978_v2, 1  ;;  %v4114_v25 = vrot.slane %v7093_v4, 1  ;;  %v3886_v49 = vsel %vm3838_vm14, %v3885_v41, %v3884_v36 }
 0x5bb   :  { %v7450_v5 = vrot.slane %v6944_v47, 4  ;;  %v7451_v22 = vrot.slane %v6954_v61, 4  ;;  %v7452_v51 = vrot.slane %v6956_v58, 4  ;;  %v7453_v17 = vrot.slane %v6960_v6, 3  ;;  %v7140_v6 = vld [vmem:[#allocation2 + $0xb0] sm:$0x1] }
 0x5bc   :  { %v3760_v0 = vpop.permute.xlu1 %3759  ;;  %v7222_v38 = vld [vmem:[#allocation2 + $0x81] sm:$0x1] }
 0x5bd   :  { %3795 = vst.msk [vmem:[#allocation2 + $0x91] sm:$0xff] %vm990_vm10, %v3760_v0  ;;  %v7070_v0 = vld [vmem:[#allocation2 + $0x52] sm:$0x1]  ;;  %v3941_v2 = vsel %vm3838_vm14, %v7450_v5, %v3939_v60  ;;  %v3997_v44 = vsel %vm3838_vm14, %v7451_v22, %v3995_v62  ;;  %v4053_v45 = vsel %vm3838_vm14, %v7452_v51, %v4051_v24  ;;  %v3842_v56 = vsel %vm3841_vm15, %v7453_v17, %v3839_v43 }
 0x5be   :  { %v7454_v60 = vrot.slane %v6970_v54, 3  ;;  %v7455_v62 = vrot.slane %v6975_v50, 3  ;;  %v3999_v54 = vsel %vm3841_vm15, %v3998_v14, %v3997_v44  ;;  %v4251_v14 = vld [vmem:[#allocation2 + $0x9] sm:$0x1]  ;;  %v7160_v44 = vld [vmem:[#allocation2 + $0x56] sm:$0x1] }
 0x5c0   :  { %v3888_v61 = vsel %vm3841_vm15, %v7454_v60, %v3886_v49  ;;  %v3943_v58 = vsel %vm3841_vm15, %v7455_v62, %v3941_v2  ;;  %v7148_v49 = vld [vmem:[#allocation2 + $0x55] sm:$0x1]  ;;  %v5068_v60 = vld [vmem:[%s7435_s5 + $0x98] sm:$0xff]  ;;  %v7174_v62 = vld [vmem:[#allocation2 + $0x57] sm:$0x1] }
 0x5c4   :  { %v3746_v48 = vpop.permute.xlu1 %3745  ;;  %v3815_v46 = vld [vmem:[#allocation2 + $0x92] sm:$0x1]  ;;  %v3805_v15 = vld [vmem:[#allocation2 + $0x91] sm:$0x1]  ;;  %v3921_v8 = vld [vmem:[#allocation2 + $0x93] sm:$0x1] }
 0x5c5   :  { %3788 = vst.msk [vmem:[#allocation2 + $0x39] sm:$0xff] %vm990_vm10, %v3746_v48  ;;  %v3843_v41 = vrot.slane %v3815_v46, 2  ;;  %v3889_v36 = vrot.slane %v3805_v15, 2  ;;  %v3944_v39 = vrot.slane %v3921_v8, 2  ;;  %v3977_v47 = vld [vmem:[#allocation2 + $0x94] sm:$0x1] }
 0x5c6   :  { %v4000_v5 = vrot.slane %v3977_v47, 2  ;;  %v4033_v24 = vld [vmem:[#allocation2 + $0x95] sm:$0x1]  ;;  %v4089_v51 = vld [vmem:[#allocation2 + $0x96] sm:$0x1]  ;;  %v4170_v48 = vrot.slane %v7114_v31, 1 }
 0x5c7   :  { %v3845_v43 = vsel %vm3844_vm0, %v3843_v41, %v3842_v56  ;;  %v3890_v17 = vsel %vm3844_vm0, %v3889_v36, %v3888_v61  ;;  %v3945_v46 = vsel %vm3844_vm0, %v3944_v39, %v3943_v58  ;;  %v4145_v50 = vld [vmem:[#allocation2 + $0x97] sm:$0x1]  ;;  %v4201_v15 = vld [vmem:[#allocation2 + $0x98] sm:$0x1]  ;;  %v5071_v39 = vld [vmem:[%s7435_s5 + $0xa8] sm:$0xff]  ;;  %v4112_v36 = vrot.slane %v4089_v51, 2 }
 0x5c8   :  { %v3848_v8 = vsel %vm3847_vm2, %v3846_v23, %v3845_v43  ;;  %v3892_v2 = vsel %vm3847_vm2, %v3891_v37, %v3890_v17  ;;  %v3947_v22 = vsel %vm3847_vm2, %v3946_v52, %v3945_v46  ;;  %v4001_v56 = vsel %vm3844_vm0, %v4000_v5, %v3999_v54  ;;  %v5074_v47 = vld [vmem:[%s7435_s5 + $0xb8] sm:$0xff]  ;;  %v4307_v61 = vld [vmem:[#allocation2 + $0xa] sm:$0x1]  ;;  %v5070_v51 = vld [vmem:[%s7435_s5 + $0xa0] sm:$0xff] }
 0x5c9   :  { %5044 = vmatmul.msk.f32.vlgmr.msrb.gmra.mxu0 %vm990_vm10, %v3848_v8  ;;  %5045 = vmatmul.msk.f32.vlgmr.msrb.gmra.mxu1 %vm990_vm10, %v3892_v2  ;;  %v4003_v23 = vsel %vm3847_vm2, %v4002_v59, %v4001_v56  ;;  %v4056_v37 = vrot.slane %v4033_v24, 2  ;;  %v7456_v52 = vrot.slane %v6958_v63, 4  ;;  %v7457_v63 = vrot.slane %v6965_v1, 4  ;;  %v5064_v43 = vld [vmem:[%s7435_s5 + $0x80] sm:$0xff]  ;;  %v4363_v17 = vld [vmem:[#allocation2 + $0xb] sm:$0x1] }
 0x5ca   :  { %5048 = vmatmul.msk.f32.vlgmr.msrb.gmra.mxu2 %vm990_vm10, %v3947_v22  ;;  %5051 = vmatmul.msk.f32.vlgmr.msrb.gmra.mxu3 %vm990_vm10, %v4003_v23  ;;  %v4168_v59 = vrot.slane %v4145_v50, 2  ;;  %v7458_v58 = vrot.slane %v6967_v42, 4  ;;  %v4224_v24 = vrot.slane %v4201_v15, 2  ;;  %v4055_v1 = vsel %vm3841_vm15, %v4054_v7, %v4053_v45  ;;  %v5067_v46 = vld [vmem:[%s7435_s5 + $0x90] sm:$0xff]  ;;  %v4419_v54 = vld [vmem:[#allocation2 + $0xc] sm:$0x1] }
 0x5cb   :  { %v4109_v41 = vsel %vm3838_vm14, %v7456_v52, %v4107_v53  ;;  %v4165_v53 = vsel %vm3838_vm14, %v7457_v63, %v7101_v3  ;;  %v4226_v3 = vrot.slane %v7140_v6, 1  ;;  %4412 = vmatpush.msrb.mxu2 %v5071_v39  ;;  %4300 = vmatpush.msrb.mxu0 %v5065_v34  ;;  %v4498_v7 = vrot.slane %v7148_v49, 5  ;;  %v7229_v56 = vld [vmem:[#allocation2 + $0x82] sm:$0x1]  ;;  %v5083_v23 = vld [vmem:[%s7435_s5 + $0xe8] sm:$0xff] }
 0x5cc   :  { %v4221_v5 = vsel %vm3838_vm14, %v7458_v58, %v7106_v19  ;;  %v4111_v42 = vsel %vm3841_vm15, %v4110_v40, %v4109_v41  ;;  %v5073_v19 = vld [vmem:[%s7435_s5 + $0xb0] sm:$0xff]  ;;  %v3754_v45 = vpop.permute.xlu1 %3753  ;;  %v4167_v29 = vsel %vm3841_vm15, %v4166_v28, %v4165_v53  ;;  %4468 = vmatpush.msrb.mxu3 %v5074_v47  ;;  %4356 = vmatpush.msrb.mxu1 %v5068_v60  ;;  %v4253_v6 = vld [vmem:[#allocation2 + $0x39] sm:$0x1]  ;;  %v7215_v15 = vld [vmem:[#allocation2 + $0x3a] sm:$0x1]  ;;  %v4554_v2 = vrot.slane %v7160_v44, 5 }
 0x5cd   :  { %v4223_v40 = vsel %vm3841_vm15, %v4222_v33, %v4221_v5  ;;  %v4271_v50 = vsel %vm3829_vm11, %v4270_v9, %v4251_v14  ;;  %v7217_v8 = vld [vmem:[#allocation2 + $0x3b] sm:$0x1]  ;;  %3792 = vst.msk [vmem:[#allocation2 + $0x69] sm:$0xff] %vm990_vm10, %v3754_v45  ;;  %v4057_v26 = vsel %vm3844_vm0, %v4056_v37, %v4055_v1  ;;  %v4113_v28 = vsel %vm3844_vm0, %v4112_v36, %v4111_v42  ;;  %v4531_v33 = vld [vmem:[#allocation2 + $0xe] sm:$0x1]  ;;  %v5085_v45 = vld [vmem:[%s7435_s5 + $0xf0] sm:$0xff] }
 0x5ce   :  { %4413 = vmatpush.msrb.mxu2 %v5070_v51  ;;  %4301 = vmatpush.msrb.mxu0 %v5064_v43  ;;  %v4169_v9 = vsel %vm3844_vm0, %v4168_v59, %v4167_v29  ;;  %v4225_v22 = vsel %vm3844_vm0, %v4224_v24, %v4223_v40  ;;  %v7459_v39 = vrot.slane %v7019_v32, 7  ;;  %v7234_v14 = vld [vmem:[#allocation2 + $0x83] sm:$0x1]  ;;  %v4610_v37 = vrot.slane %v7174_v62, 5  ;;  %v7245_v32 = vld [vmem:[#allocation2 + $0x3c] sm:$0x1] }
 0x5cf   :  { %4469 = vmatpush.msrb.mxu3 %v5073_v19  ;;  %4357 = vmatpush.msrb.mxu1 %v5067_v46  ;;  %v4272_v52 = vrot.slane %v4253_v6, 6  ;;  %v4328_v41 = vrot.slane %v7215_v15, 6  ;;  %v7460_v36 = vrot.slane %v7021_v35, 7  ;;  %v4384_v60 = vrot.slane %v7217_v8, 6  ;;  %v4587_v63 = vld [vmem:[#allocation2 + $0xf] sm:$0x1] }
 0x5d0   :  { %v4327_v34 = vsel %vm3829_vm11, %v7459_v39, %v4307_v61  ;;  %v5077_v61 = vld [vmem:[%s7435_s5 + $0xc8] sm:$0xff]  ;;  %v4059_v53 = vsel %vm3847_vm2, %v4058_v55, %v4057_v26  ;;  %v4115_v59 = vsel %vm3847_vm2, %v4114_v25, %v4113_v28  ;;  %v7461_v35 = vrot.slane %v7033_v12, 7  ;;  %v7261_v5 = vld [vmem:[#allocation2 + $0x3d] sm:$0x1]  ;;  %v7266_v43 = vld [vmem:[#allocation2 + $0x3e] sm:$0x1] }
 0x5d1   :  { %v4383_v47 = vsel %vm3829_vm11, %v7460_v36, %v4363_v17  ;;  %v7462_v24 = vrot.slane %v7035_v27, 7  ;;  %v7268_v16 = vld [vmem:[#allocation2 + $0x3f] sm:$0x1]  ;;  %v4643_v55 = vld [vmem:[#allocation2 + $0x10] sm:$0x1]  ;;  %5054 = vmatmul.msk.f32.vlgmr.msra.gmra.mxu0 %vm990_vm10, %v4059_v53  ;;  %5057 = vmatmul.msk.f32.vlgmr.msra.gmra.mxu1 %vm990_vm10, %v4115_v59  ;;  %v4171_v12 = vsel %vm3847_vm2, %v4170_v48, %v4169_v9  ;;  %v4227_v4 = vsel %vm3847_vm2, %v4226_v3, %v4225_v22 }
 0x5d2   :  { %v7259_v58 = vsel %vm3829_vm11, %v7461_v35, %v4419_v54  ;;  %v4278_v25 = vrot.slane %v7222_v38, 3  ;;  %v7277_v27 = vld [vmem:[#allocation2 + $0x84] sm:$0x1]  ;;  %v5086_v17 = vld [vmem:[%s7435_s5 + $0xf8] sm:$0xff]  ;;  %v7285_v42 = vld [vmem:[#allocation2 + $0x85] sm:$0x1]  ;;  %5060 = vmatmul.msk.f32.vlgmr.msra.gmra.mxu2 %vm990_vm10, %v4171_v12  ;;  %5063 = vmatmul.msk.f32.vlgmr.msra.gmra.mxu3 %vm990_vm10, %v4227_v4  ;;  %v4273_v6 = vsel %vm3832_vm12, %v4272_v52, %v4271_v50 }
 0x5d3   :  { %v4495_v51 = vsel %vm3829_vm11, %v7462_v24, %v4475_v11  ;;  %v5080_v1 = vld [vmem:[%s7435_s5 + $0xd8] sm:$0xff]  ;;  %v7287_v19 = vld [vmem:[#allocation2 + $0x86] sm:$0x1]  ;;  %v4666_v31 = vrot.slane %v7225_v57, 5  ;;  %v4334_v48 = vrot.slane %v7229_v56, 3  ;;  %v4390_v3 = vrot.slane %v7234_v14, 3  ;;  %4636 = vmatpush.msra.mxu2 %v5083_v23  ;;  %4524 = vmatpush.msra.mxu0 %v5077_v61 }
 0x5d4   :  { %v4440_v46 = vrot.slane %v7245_v32, 6  ;;  %v5082_v54 = vld [vmem:[%s7435_s5 + $0xe0] sm:$0xff]  ;;  %v7463_v29 = vrot.slane %v7037_v21, 7  ;;  %v5079_v15 = vld [vmem:[%s7435_s5 + $0xd0] sm:$0xff]  ;;  %v4496_v8 = vrot.slane %v7261_v5, 6  ;;  %v4552_v26 = vrot.slane %v7266_v43, 6  ;;  %v3762_v22 = vpop.permute.xlu0 %3761  ;;  %v3766_v39 = vpop.permute.xlu1 %3765  ;;  %4692 = vmatpush.msra.mxu3 %v5086_v17  ;;  %4580 = vmatpush.msra.mxu1 %v5080_v1 }
 0x5d5   :  { %v5076_v11 = vld [vmem:[%s7435_s5 + $0xc0] sm:$0xff]  ;;  %v4608_v28 = vrot.slane %v7268_v16, 6  ;;  %v4255_v21 = vld [vmem:[#allocation2 + $0x69] sm:$0x1]  ;;  %v4311_v36 = vld [vmem:[#allocation2 + $0x6a] sm:$0x1]  ;;  %v4385_v23 = vsel %vm3832_vm12, %v4384_v60, %v4383_v47  ;;  %4637 = vmatpush.msra.mxu2 %v5082_v54 }
 0x5d6   :  { %v4551_v40 = vsel %vm3829_vm11, %v7463_v29, %v4531_v33  ;;  %v4645_v9 = vld [vmem:[#allocation2 + $0x40] sm:$0x1]  ;;  %v4329_v33 = vsel %vm3832_vm12, %v4328_v41, %v4327_v34  ;;  %v4367_v50 = vld [vmem:[#allocation2 + $0x6b] sm:$0x1]  ;;  %v7464_v52 = vrot.slane %v7043_v13, 7  ;;  %3796 = vst.msk [vmem:[#allocation2 + $0x99] sm:$0xff] %vm990_vm10, %v3762_v22  ;;  %4525 = vmatpush.msra.mxu0 %v5076_v11  ;;  %4693 = vmatpush.msra.mxu3 %v5085_v45 }
 0x5d7   :  { %v4276_v61 = vrot.slane %v4255_v21, 4  ;;  %v4332_v53 = vrot.slane %v4311_v36, 4  ;;  %v4388_v59 = vrot.slane %v4367_v50, 4  ;;  %v4423_v35 = vld [vmem:[#allocation2 + $0x6c] sm:$0x1]  ;;  %v7465_v5 = vrot.slane %v7065_v10, 7  ;;  %4581 = vmatpush.msra.mxu1 %v5079_v15 }
 0x5d8   :  { %v4607_v32 = vsel %vm3829_vm11, %v7464_v52, %v4587_v63  ;;  %3798 = vst.msk [vmem:[#allocation2 + $0xb1] sm:$0xff] %vm990_vm10, %v3766_v39  ;;  %v7466_v41 = vrot.slane %v7062_v30, 5  ;;  %v4446_v47 = vrot.slane %v7277_v27, 3  ;;  %v4479_v60 = vld [vmem:[#allocation2 + $0x6d] sm:$0x1]  ;;  %v4502_v63 = vrot.slane %v7285_v42, 3 }
 0x5d9   :  { %v4663_v34 = vsel %vm3829_vm11, %v7465_v5, %v4643_v55  ;;  %v4558_v24 = vrot.slane %v7287_v19, 3  ;;  %v7467_v43 = vrot.slane %v7070_v0, 5  ;;  %v7468_v16 = vrot.slane %v7072_v20, 5  ;;  %v7339_v4 = vld [vmem:[#allocation2 + $0x87] sm:$0x1]  ;;  %s5261_s5 = smov [#allocation3]  }
 0x5da   :  { %v4275_v13 = vsel %vm3835_vm13, %v7466_v41, %v4273_v6  ;;  %v4441_v30 = vsel %vm3832_vm12, %v4440_v46, %v7259_v58  ;;  %v4497_v12 = vsel %vm3832_vm12, %v4496_v8, %v4495_v51  ;;  %v7341_v17 = vld [vmem:[#allocation2 + $0x88] sm:$0x1]  ;;  %v4444_v1 = vrot.slane %v4423_v35, 4  ;;  %v4535_v54 = vld [vmem:[#allocation2 + $0x6e] sm:$0x1]  ;;  %s4755_s23 = sshll.u32 %s5261_s5, 4  ;;  %s4756_s23 = int_to_ptr.vmem [resolvable:$true] %s4755_s23 }
 0x5db   :  { %v4331_v10 = vsel %vm3835_vm13, %v7467_v43, %v4329_v33  ;;  %v4387_v55 = vsel %vm3835_vm13, %v7468_v16, %v4385_v23  ;;  %v4553_v11 = vsel %vm3832_vm12, %v4552_v26, %v4551_v40  ;;  %v4591_v0 = vld [vmem:[#allocation2 + $0x6f] sm:$0x1]  ;;  %v4609_v45 = vsel %vm3832_vm12, %v4608_v28, %v4607_v32  ;;  %v4647_v39 = vld [vmem:[#allocation2 + $0x70] sm:$0x1] }
 0x5dc   :  { %v4664_v29 = vrot.slane %v4645_v9, 6  ;;  %v4277_v20 = vsel %vm3838_vm14, %v4276_v61, %v4275_v13  ;;  %v4333_v6 = vsel %vm3838_vm14, %v4332_v53, %v4331_v10  ;;  %v4389_v58 = vsel %vm3838_vm14, %v4388_v59, %v4387_v55 }
 0x5dd   :  { %v4500_v46 = vrot.slane %v4479_v60, 4  ;;  %v7469_v51 = vrot.slane %v7074_v18, 5  ;;  %v4499_v8 = vsel %vm3835_vm13, %v4498_v7, %v4497_v12  ;;  %v4614_v40 = vrot.slane %v7339_v4, 3  ;;  %v4257_v21 = vld [vmem:[#allocation2 + $0x99] sm:$0x1] }
 0x5de   :  { %v4670_v26 = vrot.slane %v7341_v17, 3  ;;  %v4555_v28 = vsel %vm3835_vm13, %v4554_v2, %v4553_v11  ;;  %v4556_v9 = vrot.slane %v4535_v54, 4  ;;  %v4611_v22 = vsel %vm3835_vm13, %v4610_v37, %v4609_v45  ;;  %v4313_v7 = vld [vmem:[#allocation2 + $0x9a] sm:$0x1]  ;;  %v4369_v44 = vld [vmem:[#allocation2 + $0x9b] sm:$0x1] }
 0x5df   :  { %v4443_v15 = vsel %vm3835_vm13, %v7469_v51, %v4441_v30  ;;  %v4612_v18 = vrot.slane %v4591_v0, 4  ;;  %v4279_v49 = vsel %vm3841_vm15, %v4278_v25, %v4277_v20  ;;  %v4335_v36 = vsel %vm3841_vm15, %v4334_v48, %v4333_v6  ;;  %v4258_v37 = vld [vmem:[#allocation2 + $0xb1] sm:$0x1]  ;;  %v4314_v50 = vld [vmem:[#allocation2 + $0xb2] sm:$0x1] }
 0x5e0   :  { %v4391_v2 = vsel %vm3841_vm15, %v4390_v3, %v4389_v58  ;;  %v4665_v62 = vsel %vm3832_vm12, %v4664_v29, %v4663_v34  ;;  %v4280_v33 = vrot.slane %v4257_v21, 2  ;;  %v4336_v23 = vrot.slane %v4313_v7, 2  ;;  %v4370_v56 = vld [vmem:[#allocation2 + $0xb3] sm:$0x1]  ;;  %v4425_v59 = vld [vmem:[#allocation2 + $0x9c] sm:$0x1] }
 0x5e1   :  { %v4445_v38 = vsel %vm3838_vm14, %v4444_v1, %v4443_v15  ;;  %v4501_v25 = vsel %vm3838_vm14, %v4500_v46, %v4499_v8  ;;  %v4282_v52 = vrot.slane %v4258_v37, 1  ;;  %v4338_v32 = vrot.slane %v4314_v50, 1  ;;  %v4426_v35 = vld [vmem:[#allocation2 + $0xb4] sm:$0x1]  ;;  %v4481_v43 = vld [vmem:[#allocation2 + $0x9d] sm:$0x1] }
 0x5e2   :  { %v4392_v61 = vrot.slane %v4369_v44, 2  ;;  %v4668_v48 = vrot.slane %v4647_v39, 4  ;;  %v4281_v53 = vsel %vm3844_vm0, %v4280_v33, %v4279_v49  ;;  %v4337_v14 = vsel %vm3844_vm0, %v4336_v23, %v4335_v36  ;;  %v4482_v30 = vld [vmem:[#allocation2 + $0xb5] sm:$0x1]  ;;  %v4537_v1 = vld [vmem:[#allocation2 + $0x9e] sm:$0x1] }
 0x5e3   :  { %v4394_v3 = vrot.slane %v4370_v56, 1  ;;  %v4557_v5 = vsel %vm3838_vm14, %v4556_v9, %v4555_v28  ;;  %v4283_v34 = vsel %vm3847_vm2, %v4282_v52, %v4281_v53  ;;  %v4339_v41 = vsel %vm3847_vm2, %v4338_v32, %v4337_v14  ;;  %v4538_v11 = vld [vmem:[#allocation2 + $0xb6] sm:$0x1]  ;;  %v4593_v45 = vld [vmem:[#allocation2 + $0x9f] sm:$0x1] }
 0x5e4   :  { %v4393_v13 = vsel %vm3844_vm0, %v4392_v61, %v4391_v2  ;;  %v4448_v60 = vrot.slane %v4425_v59, 2  ;;  %5066 = vmatmul.msk.f32.vlgmr.msrb.gmra.mxu0 %vm990_vm10, %v4283_v34  ;;  %5069 = vmatmul.msk.f32.vlgmr.msrb.gmra.mxu1 %vm990_vm10, %v4339_v41  ;;  %v4447_v16 = vsel %vm3841_vm15, %v4446_v47, %v4445_v38  ;;  %v4450_v55 = vrot.slane %v4426_v35, 1  ;;  %v4594_v58 = vld [vmem:[#allocation2 + $0xb7] sm:$0x1]  ;;  %v4649_v51 = vld [vmem:[#allocation2 + $0xa0] sm:$0x1] }
 0x5e5   :  { %v4395_v10 = vsel %vm3847_vm2, %v4394_v3, %v4393_v13  ;;  %v4504_v12 = vrot.slane %v4481_v43, 2  ;;  %v4560_v0 = vrot.slane %v4537_v1, 2  ;;  %v4613_v29 = vsel %vm3838_vm14, %v4612_v18, %v4611_v22  ;;  %v4650_v57 = vld [vmem:[#allocation2 + $0xb8] sm:$0x1] }
 0x5e6   :  { %5072 = vmatmul.msk.f32.vlgmr.msrb.gmra.mxu2 %vm990_vm10, %v4395_v10  ;;  %v4449_v54 = vsel %vm3844_vm0, %v4448_v60, %v4447_v16  ;;  %v4667_v20 = vsel %vm3835_vm13, %v4666_v31, %v4665_v62  ;;  %v4503_v47 = vsel %vm3841_vm15, %v4502_v63, %v4501_v25  ;;  %v4559_v6 = vsel %vm3841_vm15, %v4558_v24, %v4557_v5 }
 0x5e7   :  { %v4451_v27 = vsel %vm3847_vm2, %v4450_v55, %v4449_v54  ;;  %v4616_v46 = vrot.slane %v4593_v45, 2  ;;  %v4506_v15 = vrot.slane %v4482_v30, 1  ;;  %v4562_v8 = vrot.slane %v4538_v11, 1 }
 0x5e8   :  { %5075 = vmatmul.msk.f32.vlgmr.msrb.gmra.mxu3 %vm990_vm10, %v4451_v27  ;;  %v4669_v31 = vsel %vm3838_vm14, %v4668_v48, %v4667_v20  ;;  %v4672_v28 = vrot.slane %v4649_v51, 2  ;;  %v4505_v9 = vsel %vm3844_vm0, %v4504_v12, %v4503_v47  ;;  %v4561_v42 = vsel %vm3844_vm0, %v4560_v0, %v4559_v6 }
 0x5e9   :  { %v4615_v19 = vsel %vm3841_vm15, %v4614_v40, %v4613_v29  ;;  %v4618_v63 = vrot.slane %v4594_v58, 1  ;;  %v4671_v22 = vsel %vm3841_vm15, %v4670_v26, %v4669_v31  ;;  %v4674_v18 = vrot.slane %v4650_v57, 1 }
 0x5ea   :  { %v4617_v24 = vsel %vm3844_vm0, %v4616_v46, %v4615_v19  ;;  %v4507_v39 = vsel %vm3847_vm2, %v4506_v15, %v4505_v9  ;;  %v4563_v21 = vsel %vm3847_vm2, %v4562_v8, %v4561_v42  ;;  %v4673_v49 = vsel %vm3844_vm0, %v4672_v28, %v4671_v22 }
 0x5eb   :  { %v4619_v4 = vsel %vm3847_vm2, %v4618_v63, %v4617_v24  ;;  %v4675_v40 = vsel %vm3847_vm2, %v4674_v18, %v4673_v49  ;;  %v7470_v30 = vmov 0.0  }
 0x5ec   :  { %5078 = vmatmul.msk.f32.vlgmr.msra.gmra.mxu0 %vm990_vm10, %v4507_v39  ;;  %5081 = vmatmul.msk.f32.vlgmr.msra.gmra.mxu1 %vm990_vm10, %v4563_v21 }
 0x5ee   :  { %5084 = vmatmul.msk.f32.vlgmr.msra.gmra.mxu2 %vm990_vm10, %v4619_v4 }
 0x5f0   :  { %5087 = vmatmul.msk.f32.vlgmr.msra.gmra.mxu3 %vm990_vm10, %v4675_v40  ;;  %vm4746_vm10 = vcmask 58368  }
 0x646   :  { %v3868_v17 = vpop.f32.mrf.mxu0  ;;  %v3912_v26 = vpop.f32.mrf.mxu1 }
 0x647   :  { %v3913_v7 = vadd.f32 %v3912_v26, %v3868_v17 }
 0x64d   :  { %v3967_v36 = vpop.f32.mrf.mxu2  ;;  %v4023_v2 = vpop.f32.mrf.mxu3 }
 0x64e   :  { %v3970_v44 = vadd.f32 %v3967_v36, %v3913_v7  ;;  %v4079_v37 = vpop.f32.mrf.mxu0  ;;  %v4135_v50 = vpop.f32.mrf.mxu1 }
 0x650   :  { %v4026_v62 = vadd.f32 %v4023_v2, %v3970_v44 }
 0x652   :  { %v4082_v33 = vadd.f32 %v4079_v37, %v4026_v62 }
 0x654   :  { %v4138_v23 = vadd.f32 %v4135_v50, %v4082_v33 }
 0x655   :  { %v4191_v38 = vpop.f32.mrf.mxu2  ;;  %v4247_v52 = vpop.f32.mrf.mxu3 }
 0x656   :  { %v4194_v25 = vadd.f32 %v4191_v38, %v4138_v23 }
 0x658   :  { %v4250_v32 = vadd.f32 %v4247_v52, %v4194_v25 }
 0x661   :  { %v4303_v56 = vpop.f32.mrf.mxu0  ;;  %v4359_v48 = vpop.f32.mrf.mxu1 }
 0x662   :  { %v4306_v61 = vadd.f32 %v4303_v56, %v4250_v32 }
 0x664   :  { %v4362_v53 = vadd.f32 %v4359_v48, %v4306_v61 }
 0x669   :  { %v4415_v14 = vpop.f32.mrf.mxu2  ;;  %v4527_v5 = vpop.f32.mrf.mxu0 }
 0x66a   :  { %v4418_v3 = vadd.f32 %v4415_v14, %v4362_v53  ;;  %v4583_v41 = vpop.f32.mrf.mxu1 }
 0x66b   :  { %v4471_v59 = vpop.f32.mrf.mxu3 }
 0x66c   :  { %v4474_v35 = vadd.f32 %v4471_v59, %v4418_v3 }
 0x66e   :  { %v4530_v34 = vadd.f32 %v4527_v5, %v4474_v35 }
 0x670   :  { %v4586_v13 = vadd.f32 %v4583_v41, %v4530_v34 }
 0x671   :  { %v4639_v60 = vpop.f32.mrf.mxu2 }
 0x672   :  { %v4642_v43 = vadd.f32 %v4639_v60, %v4586_v13 }
 0x673   :  { %v4695_v10 = vpop.f32.mrf.mxu3 }
 0x674   :  { %v4698_v16 = vadd.f32 %v4695_v10, %v4642_v43 }
 0x676   :  { %v4699_v55 = vmul.f32 0.5, %v4698_v16 }
 0x678   :  { %vm4701_vm3 = vcmp.ge.f32.partialorder %v4699_v55, 1.0 }
 0x679   :  { %v5088_v12 = vsel %vm4701_vm3, 1.0, %v7470_v30 }
 0x67a   :  { %v4704_v1 = vsub.f32 1.0, %v5088_v12  ;;  %4747 = vst.msk [vmem:[#allocation3] sm:$0x3] %vm4746_vm10, %v5088_v12 }
 0x67c   :  { %v4705_v54 = vmul.f32 %v4704_v1, %v4699_v55 }
 0x67e   :  { %v4707_v11 = vrot.slane %v4705_v54, 6 }
 0x680   :  { %v4709_v0 = vsub.f32 %v4698_v16, %v4707_v11 }
 0x682   :  { %v4710_v45 = vmul.f32 0.5, %v4709_v0 }
 0x684   :  { %v4712_v29 = vrot.slane %v4710_v45, 2 }
 0x686   :  { %v4714_v20 = vadd.f32 %v4712_v29, %v4705_v54 }
 0x688   :  { %vm4715_vm4 = vcmp.ge.f32.partialorder %v4714_v20, 1.0 }
 0x689   :  { %v5089_v27 = vsel %vm4715_vm4, 1.0, %v7470_v30 }
 0x68a   :  { %v4718_v47 = vsub.f32 1.0, %v5089_v27  ;;  %4748 = vst.msk [vmem:[#allocation3 + $0x2] sm:$0x3] %vm4746_vm10, %v5089_v27 }
 0x68c   :  { %v4719_v6 = vmul.f32 %v4718_v47, %v4714_v20 }
 0x68e   :  { %v4721_v58 = vrot.slane %v4719_v6, 4 }
 0x690   :  { %v4723_v46 = vsub.f32 %v4698_v16, %v4721_v58 }
 0x692   :  { %v4724_v51 = vmul.f32 0.5, %v4723_v46 }
 0x694   :  { %v4726_v15 = vrot.slane %v4724_v51, 4 }
 0x696   :  { %v4728_v8 = vadd.f32 %v4726_v15, %v4719_v6 }
 0x698   :  { %vm4729_vm5 = vcmp.ge.f32.partialorder %v4728_v8, 1.0 }
 0x699   :  { %v5090_v57 = vsel %vm4729_vm5, 1.0, %v7470_v30 }
 0x69a   :  { %v4732_v31 = vsub.f32 1.0, %v5090_v57  ;;  %4749 = vst.msk [vmem:[#allocation3 + $0x4] sm:$0x3] %vm4746_vm10, %v5090_v57 }
 0x69c   :  { %v4733_v28 = vmul.f32 %v4732_v31, %v4728_v8 }
 0x69e   :  { %v4735_v9 = vrot.slane %v4733_v28, 2 }
 0x6a0   :  { %v4737_v42 = vsub.f32 %v4698_v16, %v4735_v9 }
 0x6a2   :  { %v4738_v19 = vmul.f32 0.5, %v4737_v42 }
 0x6a4   :  { %v4740_v63 = vrot.slane %v4738_v19, 6 }
 0x6a6   :  { %v4742_v24 = vadd.f32 %v4740_v63, %v4733_v28 }
 0x6a8   :  { %vm4743_vm6 = vcmp.ge.f32.partialorder %v4742_v24, 1.0 }
 0x6a9   :  { %v5091_v22 = vsel %vm4743_vm6, 1.0, %v7470_v30 }
 0x6aa   :  { %4750 = vst.msk [vmem:[#allocation3 + $0x6] sm:$0x3] %vm4746_vm10, %v5091_v22 }
 0x6ab   :  { %4763 = dma.vmem_to_hbm [thread:$0]  %s4756_s23, 128, %s4758_s26, [#allocation4], %s5262_s27, %s5262_s27, %s5263_s28  }
 0x6ac   :  { %5256 = dma.done.wait [#allocation4], 128  }
 0x6ad   :  { %5257 = vsyncadd [#allocation4], 4294967168 }
 0x6ae   :  { %4768 = vsyncpa [#allocation4], 1 }

</bundles_post_ra>
